<compile_context>
chip_gen: v7x
topology: tpu7x:2x2x1
jax: 0.10.0
libtpu: 0.0.40
codegen_flags: <defaults>
</compile_context>

<pallas_src>
import functools

import jax
import jax.numpy as jnp
from jax import lax
from jax.experimental import pallas as pl
from jax.experimental.pallas import tpu as pltpu  # noqa: F401  (TPU backend import)

INITIAL_SIZE = 4  # the module uses 4 for both MNIST and CIFAR10 branches


# ----------------------------- Pallas kernels ------------------------------ #

def _fc_kernel(x_ref, w_ref, b_ref, o_ref):
    # (B, latent) @ (latent, 2048) + bias, f32 end-to-end (tiny, precision-critical).
    o_ref[...] = (
        jnp.dot(x_ref[...], w_ref[...], preferred_element_type=jnp.float32)
        + b_ref[...]
    )


def _fused_deconv_bn_relu_kernel(p_ref, w_ref, b_ref, g_ref, be_ref, o_ref, *, eps):
    """4-phase deconv matmul + bias + training-mode BatchNorm + ReLU, one kernel.

    p_ref: (4, M, 4*Cin)  bf16 phase patches
    w_ref: (4, 4*Cin, N)  bf16 phase weights (N = Cout padded to lane-dense 128k)
    b_ref/g_ref/be_ref: (1, N) f32 bias / gamma / beta (padded)
    o_ref: (4*M, N) f32 -- rows ordered [phase, row]
    """
    ys = [jnp.dot(p_ref[p], w_ref[p], preferred_element_type=jnp.float32)
          for p in range(4)]
    y = jnp.concatenate(ys, axis=0) + b_ref[...]          # (4*M, N), f32

    # One-pass batch statistics per channel (sum + sum of squares).
    cnt = y.shape[0]
    s = jnp.sum(y, axis=0, keepdims=True)
    ss = jnp.sum(y * y, axis=0, keepdims=True)
    mean = s * (1.0 / cnt)
    var = jnp.maximum(ss * (1.0 / cnt) - mean * mean, 0.0)
    scale = lax.rsqrt(var + eps) * g_ref[...]
    shift = be_ref[...] - mean * scale
    o_ref[...] = jnp.maximum(y * scale + shift, 0.0)


def _fused_deconv_tanh_kernel(p_ref, w_ref, b_ref, o_ref):
    """4-phase deconv matmul + bias + tanh (final layer)."""
    ys = [jnp.dot(p_ref[p], w_ref[p], preferred_element_type=jnp.float32)
          for p in range(4)]
    o_ref[...] = jnp.tanh(jnp.concatenate(ys, axis=0) + b_ref[...])


# ------------------------------ JAX glue ----------------------------------- #

def _pad_row(v, n, fill=0.0):
    return jnp.pad(v, (0, n - v.shape[0]), constant_values=fill).reshape(1, n)


def _phase_decompose(x_nhwc, w):
    """Sub-pixel decomposition of ConvTranspose2d(k=4, s=2, p=1).

    For output parity ph (rows) / pw (cols), the transposed conv reduces to a
    2x2 conv over the *undilated* input:
      parity 0: input offsets {m-1, m}   with kernel taps {3, 1}
      parity 1: input offsets {m, m+1}   with kernel taps {2, 0}
    Returns bf16 patches (4, M, 4*Cin), bf16 weights (4, 4*Cin, N) with the
    output-channel dim zero-padded to a multiple of 128, and shape info.
    """
    B, H, W_, Cin = x_nhwc.shape
    Cout = w.shape[1]                       # w: (Cin, Cout, kH, kW) torch layout
    n_pad = (-Cout) % 128
    N = Cout + n_pad

    xp = jnp.pad(x_nhwc, ((0, 0), (1, 1), (1, 1), (0, 0)))
    offs = ((0, 1), (1, 2))                 # padded-coord offsets per parity
    kidx = ((3, 1), (2, 0))                 # matching kernel tap indices

    patches, wmats = [], []
    for ph in range(2):
        for pw in range(2):
            taps, wt = [], []
            for a in range(2):
                for c in range(2):
                    dy, dx = offs[ph][a], offs[pw][c]
                    taps.append(xp[:, dy:dy + H, dx:dx + W_, :])        # (B,H,W,Cin)
                    wt.append(w[:, :, kidx[ph][a], kidx[pw][c]])        # (Cin,Cout)
            patches.append(
                jnp.concatenate(taps, axis=-1).reshape(B * H * W_, 4 * Cin))
            wmats.append(jnp.concatenate(wt, axis=0))                   # (4*Cin,Cout)

    P = jnp.stack(patches, axis=0).astype(jnp.bfloat16)                 # (4,M,4Cin)
    Wm = jnp.stack(wmats, axis=0)
    Wm = jnp.pad(Wm, ((0, 0), (0, 0), (0, n_pad))).astype(jnp.bfloat16)  # (4,4Cin,N)
    return P, Wm, (B, H, W_, Cout, N)


def _interleave_phases(y, B, H, W_, Cout, N):
    # y: (4*M, N) rows ordered [ph, pw, b, h, w]; slice pad channels & interleave.
    y = y.reshape(2, 2, B, H, W_, N)[..., :Cout]
    y = jnp.transpose(y, (2, 3, 0, 4, 1, 5))         # (B, H, 2, W, 2, Cout)
    return y.reshape(B, 2 * H, 2 * W_, Cout)


def fc_layer(z, w, b):
    """z @ w.T + b via a single-block Pallas matmul (N=2048 is lane-dense)."""
    M, _ = z.shape
    N = w.shape[0]
    return pl.pallas_call(
        _fc_kernel,
        out_shape=jax.ShapeDtypeStruct((M, N), jnp.float32),
    )(z, w.T, b.reshape(1, N))


def deconv_bn_relu(x_nhwc, w, b, gamma, beta, eps=1e-5):
    P, Wm, (B, H, W_, Cout, N) = _phase_decompose(x_nhwc, w)
    M = B * H * W_
    kern = functools.partial(_fused_deconv_bn_relu_kernel, eps=eps)
    y = pl.pallas_call(
        kern,
        out_shape=jax.ShapeDtypeStruct((4 * M, N), jnp.float32),
    )(P, Wm, _pad_row(b, N), _pad_row(gamma, N, 1.0), _pad_row(beta, N))
    return _interleave_phases(y, B, H, W_, Cout, N)


def deconv_tanh(x_nhwc, w, b):
    P, Wm, (B, H, W_, Cout, N) = _phase_decompose(x_nhwc, w)
    M = B * H * W_
    y = pl.pallas_call(
        _fused_deconv_tanh_kernel,
        out_shape=jax.ShapeDtypeStruct((4 * M, N), jnp.float32),
    )(P, Wm, _pad_row(b, N))
    return _interleave_phases(y, B, H, W_, Cout, N)


@jax.jit
def decoder_forward(z, params):
    B = z.shape[0]
    h = fc_layer(z, params["fc_w"], params["fc_b"])                  # (B, 2048)
    # torch: x.view(B, 128, 4, 4) (NCHW) -> go NHWC internally
    x = jnp.transpose(h.reshape(B, 128, INITIAL_SIZE, INITIAL_SIZE), (0, 2, 3, 1))
    x = deconv_bn_relu(x, params["w1"], params["b1"], params["g1"], params["be1"])
    x = deconv_bn_relu(x, params["w2"], params["b2"], params["g2"], params["be2"])
    x = deconv_tanh(x, params["w3"], params["b3"])
    return jnp.transpose(x, (0, 3, 1, 2))                            # back to NCHW


# --------------------------- pure-JAX reference ----------------------------- #

def _deconv_ref(x_nchw, w, b):
    wf = jnp.transpose(w[:, :, ::-1, ::-1], (1, 0, 2, 3))            # OIHW
    out = lax.conv_general_dilated(
        x_nchw, wf, window_strides=(1, 1), padding=((2, 2), (2, 2)),
        lhs_dilation=(2, 2), dimension_numbers=("NCHW", "OIHW", "NCHW"))
    return out + b[None, :, None, None]


def _bn_ref(x, g, b, eps=1e-5):
    mean = jnp.mean(x, axis=(0, 2, 3), keepdims=True)
    var = jnp.mean(jnp.square(x - mean), axis=(0, 2, 3), keepdims=True)
    return (x - mean) / jnp.sqrt(var + eps) * g[None, :, None, None] + b[None, :, None, None]


def decoder_reference(z, params):
    B = z.shape[0]
    h = z @ params["fc_w"].T + params["fc_b"]
    x = h.reshape(B, 128, INITIAL_SIZE, INITIAL_SIZE)
    x = jnp.maximum(_bn_ref(_deconv_ref(x, params["w1"], params["b1"]),
                            params["g1"], params["be1"]), 0.0)
    x = jnp.maximum(_bn_ref(_deconv_ref(x, params["w2"], params["b2"]),
                            params["g2"], params["be2"]), 0.0)
    x = jnp.tanh(_deconv_ref(x, params["w3"], params["b3"]))
    return x


# --------------------------------- main ------------------------------------ #

if __name__ == "__main__":
    latent_dim, out_channels, B = 32, 3, 2
    fc_out = 128 * INITIAL_SIZE * INITIAL_SIZE

    key = jax.random.PRNGKey(0)
    ks = jax.random.split(key, 12)
    params = {
        "fc_w": 0.05 * jax.random.normal(ks[0], (fc_out, latent_dim), jnp.float32),
        "fc_b": 0.05 * jax.random.normal(ks[1], (fc_out,), jnp.float32),
        "w1":   0.05 * jax.random.normal(ks[2], (128, 64, 4, 4), jnp.float32),
        "b1":   0.05 * jax.random.normal(ks[3], (64,), jnp.float32),
        "g1":   1.0 + 0.1 * jax.random.normal(ks[4], (64,), jnp.float32),
        "be1":  0.1 * jax.random.normal(ks[5], (64,), jnp.float32),
        "w2":   0.05 * jax.random.normal(ks[6], (64, 32, 4, 4), jnp.float32),
        "b2":   0.05 * jax.random.normal(ks[7], (32,), jnp.float32),
        "g2":   1.0 + 0.1 * jax.random.normal(ks[8], (32,), jnp.float32),
        "be2":  0.1 * jax.random.normal(ks[9], (32,), jnp.float32),
        "w3":   0.05 * jax.random.normal(ks[10], (32, out_channels, 4, 4), jnp.float32),
        "b3":   0.05 * jax.random.normal(ks[11], (out_channels,), jnp.float32),
    }
    z = jax.random.normal(jax.random.PRNGKey(1), (B, latent_dim), jnp.float32)

    out = jax.block_until_ready(decoder_forward(z, params))
    assert out.shape == (B, out_channels, 4 * 2 ** 3, 4 * 2 ** 3), out.shape

    ref = jax.block_until_ready(decoder_reference(z, params))
    max_err = float(jnp.max(jnp.abs(out - ref)))
    # bf16 MXU inputs (per v6e/v7x feedback) vs f32 reference -> slightly looser tol.
    assert max_err < 2e-2, max_err

    print("KERNEL_OK")
</pallas_src>

<mosaic_0001>
module attributes {stable_mosaic.version = 11 : i64} {
  func.func @_fc_kernel(%arg0: memref<2x32xf32, #tpu.memory_space<vmem>>, %arg1: memref<32x2048xf32, #tpu.memory_space<vmem>>, %arg2: memref<1x2048xf32, #tpu.memory_space<vmem>>, %arg3: memref<2x2048xf32, #tpu.memory_space<vmem>>) attributes {dimension_semantics = [], scalar_prefetch = 0 : i64, scratch_operands = 0 : i64, tpu.core_type = #tpu.core_type<tc>} {
    %c0 = arith.constant 0 : index
    %c0_0 = arith.constant 0 : index
    %0 = vector.load %arg0[%c0, %c0_0] : memref<2x32xf32, #tpu.memory_space<vmem>>, vector<2x32xf32>
    %c0_1 = arith.constant 0 : index
    %c0_2 = arith.constant 0 : index
    %1 = vector.load %arg1[%c0_1, %c0_2] : memref<32x2048xf32, #tpu.memory_space<vmem>>, vector<32x2048xf32>
    %cst = arith.constant dense<0.000000e+00> : vector<2x2048xf32>
    %2 = tpu.matmul %0, %1, %cst {dimension_numbers = #tpu.dot_dimension_numbers<[1], [0], [0], [1], [0, 0, 1, 1], [], []>} : vector<2x32xf32>, vector<32x2048xf32>, vector<2x2048xf32> -> vector<2x2048xf32>
    %c0_3 = arith.constant 0 : index
    %c0_4 = arith.constant 0 : index
    %3 = vector.load %arg2[%c0_3, %c0_4] : memref<1x2048xf32, #tpu.memory_space<vmem>>, vector<1x2048xf32>
    %4 = vector.broadcast %3 : vector<1x2048xf32> to vector<2x2048xf32>
    %5 = arith.addf %2, %4 : vector<2x2048xf32>
    %c0_5 = arith.constant 0 : index
    %c0_6 = arith.constant 0 : index
    %6 = vector.load %arg3[%c0_5, %c0_6] : memref<2x2048xf32, #tpu.memory_space<vmem>>, vector<2x2048xf32>
    tpu.vector_store %arg3[%c0_5, %c0_6], %5 {strides = array<i32>} : memref<2x2048xf32, #tpu.memory_space<vmem>>, vector<2x2048xf32>,
    return
  }
}

module attributes {stable_mosaic.version = 11 : i64} {
  func.func @_fused_deconv_bn_relu_kernel(%arg0: memref<4x32x512xbf16, #tpu.memory_space<vmem>>, %arg1: memref<4x512x128xbf16, #tpu.memory_space<vmem>>, %arg2: memref<1x128xf32, #tpu.memory_space<vmem>>, %arg3: memref<1x128xf32, #tpu.memory_space<vmem>>, %arg4: memref<1x128xf32, #tpu.memory_space<vmem>>, %arg5: memref<128x128xf32, #tpu.memory_space<vmem>>) attributes {dimension_semantics = [], scalar_prefetch = 0 : i64, scratch_operands = 0 : i64, tpu.core_type = #tpu.core_type<tc>} {
    %c0 = arith.constant 0 : index
    %c0_0 = arith.constant 0 : index
    %c0_1 = arith.constant 0 : index
    %0 = vector.load %arg0[%c0, %c0_0, %c0_1] : memref<4x32x512xbf16, #tpu.memory_space<vmem>>, vector<1x32x512xbf16>
    %1 = vector.shape_cast %0 : vector<1x32x512xbf16> to vector<32x512xbf16>
    %c0_2 = arith.constant 0 : index
    %c0_3 = arith.constant 0 : index
    %c0_4 = arith.constant 0 : index
    %2 = vector.load %arg1[%c0_2, %c0_3, %c0_4] : memref<4x512x128xbf16, #tpu.memory_space<vmem>>, vector<1x512x128xbf16>
    %3 = vector.shape_cast %2 : vector<1x512x128xbf16> to vector<512x128xbf16>
    %cst = arith.constant dense<0.000000e+00> : vector<32x128xf32>
    %4 = tpu.matmul %1, %3, %cst {dimension_numbers = #tpu.dot_dimension_numbers<[1], [0], [0], [1], [0, 0, 1, 1], [], []>} : vector<32x512xbf16>, vector<512x128xbf16>, vector<32x128xf32> -> vector<32x128xf32>
    %c1 = arith.constant 1 : index
    %c0_5 = arith.constant 0 : index
    %c0_6 = arith.constant 0 : index
    %5 = vector.load %arg0[%c1, %c0_5, %c0_6] : memref<4x32x512xbf16, #tpu.memory_space<vmem>>, vector<1x32x512xbf16>
    %6 = vector.shape_cast %5 : vector<1x32x512xbf16> to vector<32x512xbf16>
    %c1_7 = arith.constant 1 : index
    %c0_8 = arith.constant 0 : index
    %c0_9 = arith.constant 0 : index
    %7 = vector.load %arg1[%c1_7, %c0_8, %c0_9] : memref<4x512x128xbf16, #tpu.memory_space<vmem>>, vector<1x512x128xbf16>
    %8 = vector.shape_cast %7 : vector<1x512x128xbf16> to vector<512x128xbf16>
    %cst_10 = arith.constant dense<0.000000e+00> : vector<32x128xf32>
    %9 = tpu.matmul %6, %8, %cst_10 {dimension_numbers = #tpu.dot_dimension_numbers<[1], [0], [0], [1], [0, 0, 1, 1], [], []>} : vector<32x512xbf16>, vector<512x128xbf16>, vector<32x128xf32> -> vector<32x128xf32>
    %c2 = arith.constant 2 : index
    %c0_11 = arith.constant 0 : index
    %c0_12 = arith.constant 0 : index
    %10 = vector.load %arg0[%c2, %c0_11, %c0_12] : memref<4x32x512xbf16, #tpu.memory_space<vmem>>, vector<1x32x512xbf16>
    %11 = vector.shape_cast %10 : vector<1x32x512xbf16> to vector<32x512xbf16>
    %c2_13 = arith.constant 2 : index
    %c0_14 = arith.constant 0 : index
    %c0_15 = arith.constant 0 : index
    %12 = vector.load %arg1[%c2_13, %c0_14, %c0_15] : memref<4x512x128xbf16, #tpu.memory_space<vmem>>, vector<1x512x128xbf16>
    %13 = vector.shape_cast %12 : vector<1x512x128xbf16> to vector<512x128xbf16>
    %cst_16 = arith.constant dense<0.000000e+00> : vector<32x128xf32>
    %14 = tpu.matmul %11, %13, %cst_16 {dimension_numbers = #tpu.dot_dimension_numbers<[1], [0], [0], [1], [0, 0, 1, 1], [], []>} : vector<32x512xbf16>, vector<512x128xbf16>, vector<32x128xf32> -> vector<32x128xf32>
    %c3 = arith.constant 3 : index
    %c0_17 = arith.constant 0 : index
    %c0_18 = arith.constant 0 : index
    %15 = vector.load %arg0[%c3, %c0_17, %c0_18] : memref<4x32x512xbf16, #tpu.memory_space<vmem>>, vector<1x32x512xbf16>
    %16 = vector.shape_cast %15 : vector<1x32x512xbf16> to vector<32x512xbf16>
    %c3_19 = arith.constant 3 : index
    %c0_20 = arith.constant 0 : index
    %c0_21 = arith.constant 0 : index
    %17 = vector.load %arg1[%c3_19, %c0_20, %c0_21] : memref<4x512x128xbf16, #tpu.memory_space<vmem>>, vector<1x512x128xbf16>
    %18 = vector.shape_cast %17 : vector<1x512x128xbf16> to vector<512x128xbf16>
    %cst_22 = arith.constant dense<0.000000e+00> : vector<32x128xf32>
    %19 = tpu.matmul %16, %18, %cst_22 {dimension_numbers = #tpu.dot_dimension_numbers<[1], [0], [0], [1], [0, 0, 1, 1], [], []>} : vector<32x512xbf16>, vector<512x128xbf16>, vector<32x128xf32> -> vector<32x128xf32>
    %20 = tpu.concatenate %4, %9, %14, %19 in 0 : vector<32x128xf32>, vector<32x128xf32>, vector<32x128xf32>, vector<32x128xf32> -> vector<128x128xf32>
    %c0_23 = arith.constant 0 : index
    %c0_24 = arith.constant 0 : index
    %21 = vector.load %arg2[%c0_23, %c0_24] : memref<1x128xf32, #tpu.memory_space<vmem>>, vector<1x128xf32>
    %22 = vector.broadcast %21 : vector<1x128xf32> to vector<128x128xf32>
    %23 = arith.addf %20, %22 : vector<128x128xf32>
    %cst_25 = arith.constant dense<0.000000e+00> : vector<128xf32>
    %24 = vector.multi_reduction <add>, %23, %cst_25 [0] : vector<128x128xf32> to vector<128xf32>
    %25 = vector.shape_cast %24 : vector<128xf32> to vector<1x128xf32>
    %26 = arith.mulf %23, %23 : vector<128x128xf32>
    %cst_26 = arith.constant dense<0.000000e+00> : vector<128xf32>
    %27 = vector.multi_reduction <add>, %26, %cst_26 [0] : vector<128x128xf32> to vector<128xf32>
    %28 = vector.shape_cast %27 : vector<128xf32> to vector<1x128xf32>
    %cst_27 = arith.constant 7.812500e-03 : f32
    %29 = vector.broadcast %cst_27 : f32 to vector<1x128xf32>
    %30 = arith.mulf %25, %29 : vector<1x128xf32>
    %cst_28 = arith.constant 7.812500e-03 : f32
    %31 = vector.broadcast %cst_28 : f32 to vector<1x128xf32>
    %32 = arith.mulf %28, %31 : vector<1x128xf32>
    %33 = arith.mulf %30, %30 : vector<1x128xf32>
    %34 = arith.subf %32, %33 : vector<1x128xf32>
    %cst_29 = arith.constant 0.000000e+00 : f32
    %35 = vector.broadcast %cst_29 : f32 to vector<1x128xf32>
    %36 = arith.maximumf %34, %35 : vector<1x128xf32>
    %cst_30 = arith.constant 9.99999974E-6 : f32
    %37 = vector.broadcast %cst_30 : f32 to vector<1x128xf32>
    %38 = arith.addf %36, %37 : vector<1x128xf32>
    %39 = math.rsqrt %38 : vector<1x128xf32>
    %c0_31 = arith.constant 0 : index
    %c0_32 = arith.constant 0 : index
    %40 = vector.load %arg3[%c0_31, %c0_32] : memref<1x128xf32, #tpu.memory_space<vmem>>, vector<1x128xf32>
    %41 = arith.mulf %39, %40 : vector<1x128xf32>
    %c0_33 = arith.constant 0 : index
    %c0_34 = arith.constant 0 : index
    %42 = vector.load %arg4[%c0_33, %c0_34] : memref<1x128xf32, #tpu.memory_space<vmem>>, vector<1x128xf32>
    %43 = arith.mulf %30, %41 : vector<1x128xf32>
    %44 = arith.subf %42, %43 : vector<1x128xf32>
    %45 = vector.broadcast %41 : vector<1x128xf32> to vector<128x128xf32>
    %46 = arith.mulf %23, %45 : vector<128x128xf32>
    %47 = vector.broadcast %44 : vector<1x128xf32> to vector<128x128xf32>
    %48 = arith.addf %46, %47 : vector<128x128xf32>
    %cst_35 = arith.constant 0.000000e+00 : f32
    %49 = vector.broadcast %cst_35 : f32 to vector<128x128xf32>
    %50 = arith.maximumf %48, %49 : vector<128x128xf32>
    %c0_36 = arith.constant 0 : index
    %c0_37 = arith.constant 0 : index
    %51 = vector.load %arg5[%c0_36, %c0_37] : memref<128x128xf32, #tpu.memory_space<vmem>>, vector<128x128xf32>
    tpu.vector_store %arg5[%c0_36, %c0_37], %50 {strides = array<i32>} : memref<128x128xf32, #tpu.memory_space<vmem>>, vector<128x128xf32>,
    return
  }
}

module attributes {stable_mosaic.version = 11 : i64} {
  func.func @_fused_deconv_bn_relu_kernel(%arg0: memref<4x128x256xbf16, #tpu.memory_space<vmem>>, %arg1: memref<4x256x128xbf16, #tpu.memory_space<vmem>>, %arg2: memref<1x128xf32, #tpu.memory_space<vmem>>, %arg3: memref<1x128xf32, #tpu.memory_space<vmem>>, %arg4: memref<1x128xf32, #tpu.memory_space<vmem>>, %arg5: memref<512x128xf32, #tpu.memory_space<vmem>>) attributes {dimension_semantics = [], scalar_prefetch = 0 : i64, scratch_operands = 0 : i64, tpu.core_type = #tpu.core_type<tc>} {
    %c0 = arith.constant 0 : index
    %c0_0 = arith.constant 0 : index
    %c0_1 = arith.constant 0 : index
    %0 = vector.load %arg0[%c0, %c0_0, %c0_1] : memref<4x128x256xbf16, #tpu.memory_space<vmem>>, vector<1x128x256xbf16>
    %1 = vector.shape_cast %0 : vector<1x128x256xbf16> to vector<128x256xbf16>
    %c0_2 = arith.constant 0 : index
    %c0_3 = arith.constant 0 : index
    %c0_4 = arith.constant 0 : index
    %2 = vector.load %arg1[%c0_2, %c0_3, %c0_4] : memref<4x256x128xbf16, #tpu.memory_space<vmem>>, vector<1x256x128xbf16>
    %3 = vector.shape_cast %2 : vector<1x256x128xbf16> to vector<256x128xbf16>
    %cst = arith.constant dense<0.000000e+00> : vector<128x128xf32>
    %4 = tpu.matmul %1, %3, %cst {dimension_numbers = #tpu.dot_dimension_numbers<[1], [0], [0], [1], [0, 0, 1, 1], [], []>} : vector<128x256xbf16>, vector<256x128xbf16>, vector<128x128xf32> -> vector<128x128xf32>
    %c1 = arith.constant 1 : index
    %c0_5 = arith.constant 0 : index
    %c0_6 = arith.constant 0 : index
    %5 = vector.load %arg0[%c1, %c0_5, %c0_6] : memref<4x128x256xbf16, #tpu.memory_space<vmem>>, vector<1x128x256xbf16>
    %6 = vector.shape_cast %5 : vector<1x128x256xbf16> to vector<128x256xbf16>
    %c1_7 = arith.constant 1 : index
    %c0_8 = arith.constant 0 : index
    %c0_9 = arith.constant 0 : index
    %7 = vector.load %arg1[%c1_7, %c0_8, %c0_9] : memref<4x256x128xbf16, #tpu.memory_space<vmem>>, vector<1x256x128xbf16>
    %8 = vector.shape_cast %7 : vector<1x256x128xbf16> to vector<256x128xbf16>
    %cst_10 = arith.constant dense<0.000000e+00> : vector<128x128xf32>
    %9 = tpu.matmul %6, %8, %cst_10 {dimension_numbers = #tpu.dot_dimension_numbers<[1], [0], [0], [1], [0, 0, 1, 1], [], []>} : vector<128x256xbf16>, vector<256x128xbf16>, vector<128x128xf32> -> vector<128x128xf32>
    %c2 = arith.constant 2 : index
    %c0_11 = arith.constant 0 : index
    %c0_12 = arith.constant 0 : index
    %10 = vector.load %arg0[%c2, %c0_11, %c0_12] : memref<4x128x256xbf16, #tpu.memory_space<vmem>>, vector<1x128x256xbf16>
    %11 = vector.shape_cast %10 : vector<1x128x256xbf16> to vector<128x256xbf16>
    %c2_13 = arith.constant 2 : index
    %c0_14 = arith.constant 0 : index
    %c0_15 = arith.constant 0 : index
    %12 = vector.load %arg1[%c2_13, %c0_14, %c0_15] : memref<4x256x128xbf16, #tpu.memory_space<vmem>>, vector<1x256x128xbf16>
    %13 = vector.shape_cast %12 : vector<1x256x128xbf16> to vector<256x128xbf16>
    %cst_16 = arith.constant dense<0.000000e+00> : vector<128x128xf32>
    %14 = tpu.matmul %11, %13, %cst_16 {dimension_numbers = #tpu.dot_dimension_numbers<[1], [0], [0], [1], [0, 0, 1, 1], [], []>} : vector<128x256xbf16>, vector<256x128xbf16>, vector<128x128xf32> -> vector<128x128xf32>
    %c3 = arith.constant 3 : index
    %c0_17 = arith.constant 0 : index
    %c0_18 = arith.constant 0 : index
    %15 = vector.load %arg0[%c3, %c0_17, %c0_18] : memref<4x128x256xbf16, #tpu.memory_space<vmem>>, vector<1x128x256xbf16>
    %16 = vector.shape_cast %15 : vector<1x128x256xbf16> to vector<128x256xbf16>
    %c3_19 = arith.constant 3 : index
    %c0_20 = arith.constant 0 : index
    %c0_21 = arith.constant 0 : index
    %17 = vector.load %arg1[%c3_19, %c0_20, %c0_21] : memref<4x256x128xbf16, #tpu.memory_space<vmem>>, vector<1x256x128xbf16>
    %18 = vector.shape_cast %17 : vector<1x256x128xbf16> to vector<256x128xbf16>
    %cst_22 = arith.constant dense<0.000000e+00> : vector<128x128xf32>
    %19 = tpu.matmul %16, %18, %cst_22 {dimension_numbers = #tpu.dot_dimension_numbers<[1], [0], [0], [1], [0, 0, 1, 1], [], []>} : vector<128x256xbf16>, vector<256x128xbf16>, vector<128x128xf32> -> vector<128x128xf32>
    %20 = tpu.concatenate %4, %9, %14, %19 in 0 : vector<128x128xf32>, vector<128x128xf32>, vector<128x128xf32>, vector<128x128xf32> -> vector<512x128xf32>
    %c0_23 = arith.constant 0 : index
    %c0_24 = arith.constant 0 : index
    %21 = vector.load %arg2[%c0_23, %c0_24] : memref<1x128xf32, #tpu.memory_space<vmem>>, vector<1x128xf32>
    %22 = vector.broadcast %21 : vector<1x128xf32> to vector<512x128xf32>
    %23 = arith.addf %20, %22 : vector<512x128xf32>
    %cst_25 = arith.constant dense<0.000000e+00> : vector<128xf32>
    %24 = vector.multi_reduction <add>, %23, %cst_25 [0] : vector<512x128xf32> to vector<128xf32>
    %25 = vector.shape_cast %24 : vector<128xf32> to vector<1x128xf32>
    %26 = arith.mulf %23, %23 : vector<512x128xf32>
    %cst_26 = arith.constant dense<0.000000e+00> : vector<128xf32>
    %27 = vector.multi_reduction <add>, %26, %cst_26 [0] : vector<512x128xf32> to vector<128xf32>
    %28 = vector.shape_cast %27 : vector<128xf32> to vector<1x128xf32>
    %cst_27 = arith.constant 0.001953125 : f32
    %29 = vector.broadcast %cst_27 : f32 to vector<1x128xf32>
    %30 = arith.mulf %25, %29 : vector<1x128xf32>
    %cst_28 = arith.constant 0.001953125 : f32
    %31 = vector.broadcast %cst_28 : f32 to vector<1x128xf32>
    %32 = arith.mulf %28, %31 : vector<1x128xf32>
    %33 = arith.mulf %30, %30 : vector<1x128xf32>
    %34 = arith.subf %32, %33 : vector<1x128xf32>
    %cst_29 = arith.constant 0.000000e+00 : f32
    %35 = vector.broadcast %cst_29 : f32 to vector<1x128xf32>
    %36 = arith.maximumf %34, %35 : vector<1x128xf32>
    %cst_30 = arith.constant 9.99999974E-6 : f32
    %37 = vector.broadcast %cst_30 : f32 to vector<1x128xf32>
    %38 = arith.addf %36, %37 : vector<1x128xf32>
    %39 = math.rsqrt %38 : vector<1x128xf32>
    %c0_31 = arith.constant 0 : index
    %c0_32 = arith.constant 0 : index
    %40 = vector.load %arg3[%c0_31, %c0_32] : memref<1x128xf32, #tpu.memory_space<vmem>>, vector<1x128xf32>
    %41 = arith.mulf %39, %40 : vector<1x128xf32>
    %c0_33 = arith.constant 0 : index
    %c0_34 = arith.constant 0 : index
    %42 = vector.load %arg4[%c0_33, %c0_34] : memref<1x128xf32, #tpu.memory_space<vmem>>, vector<1x128xf32>
    %43 = arith.mulf %30, %41 : vector<1x128xf32>
    %44 = arith.subf %42, %43 : vector<1x128xf32>
    %45 = vector.broadcast %41 : vector<1x128xf32> to vector<512x128xf32>
    %46 = arith.mulf %23, %45 : vector<512x128xf32>
    %47 = vector.broadcast %44 : vector<1x128xf32> to vector<512x128xf32>
    %48 = arith.addf %46, %47 : vector<512x128xf32>
    %cst_35 = arith.constant 0.000000e+00 : f32
    %49 = vector.broadcast %cst_35 : f32 to vector<512x128xf32>
    %50 = arith.maximumf %48, %49 : vector<512x128xf32>
    %c0_36 = arith.constant 0 : index
    %c0_37 = arith.constant 0 : index
    %51 = vector.load %arg5[%c0_36, %c0_37] : memref<512x128xf32, #tpu.memory_space<vmem>>, vector<512x128xf32>
    tpu.vector_store %arg5[%c0_36, %c0_37], %50 {strides = array<i32>} : memref<512x128xf32, #tpu.memory_space<vmem>>, vector<512x128xf32>,
    return
  }
}

module attributes {stable_mosaic.version = 11 : i64} {
  func.func @_fused_deconv_tanh_kernel(%arg0: memref<4x512x128xbf16, #tpu.memory_space<vmem>>, %arg1: memref<4x128x128xbf16, #tpu.memory_space<vmem>>, %arg2: memref<1x128xf32, #tpu.memory_space<vmem>>, %arg3: memref<2048x128xf32, #tpu.memory_space<vmem>>) attributes {dimension_semantics = [], scalar_prefetch = 0 : i64, scratch_operands = 0 : i64, tpu.core_type = #tpu.core_type<tc>} {
    %c0 = arith.constant 0 : index
    %c0_0 = arith.constant 0 : index
    %c0_1 = arith.constant 0 : index
    %0 = vector.load %arg0[%c0, %c0_0, %c0_1] : memref<4x512x128xbf16, #tpu.memory_space<vmem>>, vector<1x512x128xbf16>
    %1 = vector.shape_cast %0 : vector<1x512x128xbf16> to vector<512x128xbf16>
    %c0_2 = arith.constant 0 : index
    %c0_3 = arith.constant 0 : index
    %c0_4 = arith.constant 0 : index
    %2 = vector.load %arg1[%c0_2, %c0_3, %c0_4] : memref<4x128x128xbf16, #tpu.memory_space<vmem>>, vector<1x128x128xbf16>
    %3 = vector.shape_cast %2 : vector<1x128x128xbf16> to vector<128x128xbf16>
    %cst = arith.constant dense<0.000000e+00> : vector<512x128xf32>
    %4 = tpu.matmul %1, %3, %cst {dimension_numbers = #tpu.dot_dimension_numbers<[1], [0], [0], [1], [0, 0, 1, 1], [], []>} : vector<512x128xbf16>, vector<128x128xbf16>, vector<512x128xf32> -> vector<512x128xf32>
    %c1 = arith.constant 1 : index
    %c0_5 = arith.constant 0 : index
    %c0_6 = arith.constant 0 : index
    %5 = vector.load %arg0[%c1, %c0_5, %c0_6] : memref<4x512x128xbf16, #tpu.memory_space<vmem>>, vector<1x512x128xbf16>
    %6 = vector.shape_cast %5 : vector<1x512x128xbf16> to vector<512x128xbf16>
    %c1_7 = arith.constant 1 : index
    %c0_8 = arith.constant 0 : index
    %c0_9 = arith.constant 0 : index
    %7 = vector.load %arg1[%c1_7, %c0_8, %c0_9] : memref<4x128x128xbf16, #tpu.memory_space<vmem>>, vector<1x128x128xbf16>
    %8 = vector.shape_cast %7 : vector<1x128x128xbf16> to vector<128x128xbf16>
    %cst_10 = arith.constant dense<0.000000e+00> : vector<512x128xf32>
    %9 = tpu.matmul %6, %8, %cst_10 {dimension_numbers = #tpu.dot_dimension_numbers<[1], [0], [0], [1], [0, 0, 1, 1], [], []>} : vector<512x128xbf16>, vector<128x128xbf16>, vector<512x128xf32> -> vector<512x128xf32>
    %c2 = arith.constant 2 : index
    %c0_11 = arith.constant 0 : index
    %c0_12 = arith.constant 0 : index
    %10 = vector.load %arg0[%c2, %c0_11, %c0_12] : memref<4x512x128xbf16, #tpu.memory_space<vmem>>, vector<1x512x128xbf16>
    %11 = vector.shape_cast %10 : vector<1x512x128xbf16> to vector<512x128xbf16>
    %c2_13 = arith.constant 2 : index
    %c0_14 = arith.constant 0 : index
    %c0_15 = arith.constant 0 : index
    %12 = vector.load %arg1[%c2_13, %c0_14, %c0_15] : memref<4x128x128xbf16, #tpu.memory_space<vmem>>, vector<1x128x128xbf16>
    %13 = vector.shape_cast %12 : vector<1x128x128xbf16> to vector<128x128xbf16>
    %cst_16 = arith.constant dense<0.000000e+00> : vector<512x128xf32>
    %14 = tpu.matmul %11, %13, %cst_16 {dimension_numbers = #tpu.dot_dimension_numbers<[1], [0], [0], [1], [0, 0, 1, 1], [], []>} : vector<512x128xbf16>, vector<128x128xbf16>, vector<512x128xf32> -> vector<512x128xf32>
    %c3 = arith.constant 3 : index
    %c0_17 = arith.constant 0 : index
    %c0_18 = arith.constant 0 : index
    %15 = vector.load %arg0[%c3, %c0_17, %c0_18] : memref<4x512x128xbf16, #tpu.memory_space<vmem>>, vector<1x512x128xbf16>
    %16 = vector.shape_cast %15 : vector<1x512x128xbf16> to vector<512x128xbf16>
    %c3_19 = arith.constant 3 : index
    %c0_20 = arith.constant 0 : index
    %c0_21 = arith.constant 0 : index
    %17 = vector.load %arg1[%c3_19, %c0_20, %c0_21] : memref<4x128x128xbf16, #tpu.memory_space<vmem>>, vector<1x128x128xbf16>
    %18 = vector.shape_cast %17 : vector<1x128x128xbf16> to vector<128x128xbf16>
    %cst_22 = arith.constant dense<0.000000e+00> : vector<512x128xf32>
    %19 = tpu.matmul %16, %18, %cst_22 {dimension_numbers = #tpu.dot_dimension_numbers<[1], [0], [0], [1], [0, 0, 1, 1], [], []>} : vector<512x128xbf16>, vector<128x128xbf16>, vector<512x128xf32> -> vector<512x128xf32>
    %20 = tpu.concatenate %4, %9, %14, %19 in 0 : vector<512x128xf32>, vector<512x128xf32>, vector<512x128xf32>, vector<512x128xf32> -> vector<2048x128xf32>
    %c0_23 = arith.constant 0 : index
    %c0_24 = arith.constant 0 : index
    %21 = vector.load %arg2[%c0_23, %c0_24] : memref<1x128xf32, #tpu.memory_space<vmem>>, vector<1x128xf32>
    %22 = vector.broadcast %21 : vector<1x128xf32> to vector<2048x128xf32>
    %23 = arith.addf %20, %22 : vector<2048x128xf32>
    %24 = math.tanh %23 : vector<2048x128xf32>
    %c0_25 = arith.constant 0 : index
    %c0_26 = arith.constant 0 : index
    %25 = vector.load %arg3[%c0_25, %c0_26] : memref<2048x128xf32, #tpu.memory_space<vmem>>, vector<2048x128xf32>
    tpu.vector_store %arg3[%c0_25, %c0_26], %24 {strides = array<i32>} : memref<2048x128xf32, #tpu.memory_space<vmem>>, vector<2048x128xf32>,
    return
  }
}

</mosaic_0001>

<bundles_post_ra>
// kernel: decoder_forward.4
= control target key start
LH: loop header
LB: loop body
LE: loop exit
PB: predicated region body
PF: predicated region fallthrough
CT: control target
= control target key end

     0   :  { %8 = vsyncpa [#allocation3], 0  ;;  %s1141_s0 = inlined_call_operand.hbm [shape: f32[2,32], index: 0, kind: input, shape index: {}]   ;;  %s1142_s1 = inlined_call_operand.hbm [shape: f32[32,2048], index: 1, kind: input, shape index: {}]   ;;  %s1143_s2 = inlined_call_operand.hbm [shape: f32[1,2048], index: 2, kind: input, shape index: {}]   ;;  %s1144_s3 = inlined_call_operand.vmem [shape: f32[2,2048], index: 3, kind: output, shape index: {}]  }
   0x1   :  { %9 = vsyncpa [#allocation5], 0  ;;  %s1019_s12 = smov [#allocation4]   ;;  %s949_s16 = scalar_lea.hbm %s1142_s1, 8192 }
   0x2   :  { %s25_s13 = sshll.u32 %s1019_s12, 4  ;;  %p950_p0 = scmp.ne.s32.totalorder %s1142_s1, %s949_s16  ;;  %s26_s13 = int_to_ptr.vmem [resolvable:$true] %s25_s13 }
   0x3   :  { %p953_p1 = scmp.lt.u32.totalorder %s949_s16, %s1142_s1 }
   0x5   :  { %p955_p2 = pnand %p953_p1, %p950_p0 }
   0x7   :  { %958 = shalt.err (!%p955_p2)
}
   0x8   :  { %s959_s21 = scalar_lea.vmem %s26_s13, 8192  ;;  %p964_p4 = scmp.lt.s32.totalorder %s26_s13, %s26_s13 }
   0x9   :  { %p960_p3 = scmp.ne.s32.totalorder %s26_s13, %s959_s21  ;;  %p965_p5 = scmp.lt.s32.totalorder %s959_s21, %s959_s21 }
   0xb   :  { %p966_p6 = por %p965_p5, %p964_p4 }
   0xd   :  { %p967_p7 = pnand %p966_p6, %p960_p3 }
   0xf   :  { %970 = shalt.err (!%p967_p7)
}
  0x10   :  { %s1020_s22 = smov 2048   ;;  %s1021_s23 = smov 128  }
  0x11   :  { %31 = dma.hbm_to_vmem [thread:$0]  %s1142_s1, 8192, %s26_s13, [#allocation5], %s1020_s22, %s1020_s22, %s1021_s23  }
  0x12   :  { %s1022_s26 = smov [#allocation2]   ;;  %s1023_s28 = smov [#allocation6]  }
  0x13   :  { %s16_s27 = sshll.u32 %s1022_s26, 4  ;;  %s38_s29 = sshll.u32 %s1023_s28, 4  ;;  %s17_s27 = int_to_ptr.vmem [resolvable:$true] %s16_s27  ;;  %s39_s29 = int_to_ptr.vmem [resolvable:$true] %s38_s29 }
  0x14   :  { %s971_s5 = scalar_lea.hbm %s1141_s0, 32 }
  0x15   :  { %p972_p8 = scmp.ne.s32.totalorder %s1141_s0, %s971_s5  ;;  %p975_p9 = scmp.lt.u32.totalorder %s971_s5, %s1141_s0 }
  0x17   :  { %p977_p10 = pnand %p975_p9, %p972_p8 }
  0x19   :  { %980 = shalt.err (!%p977_p10)
}
  0x1a   :  { %s981_s1 = scalar_lea.vmem %s17_s27, 32  ;;  %p986_p12 = scmp.lt.s32.totalorder %s17_s27, %s17_s27 }
  0x1b   :  { %p982_p11 = scmp.ne.s32.totalorder %s17_s27, %s981_s1  ;;  %p987_p13 = scmp.lt.s32.totalorder %s981_s1, %s981_s1 }
  0x1d   :  { %p988_p0 = por %p987_p13, %p986_p12 }
  0x1f   :  { %p989_p1 = pnand %p988_p0, %p982_p11 }
  0x21   :  { %992 = shalt.err (!%p989_p1)
}
  0x22   :  { %19 = dma.hbm_to_vmem [thread:$0]  %s1141_s0, 32, %s17_s27, [#allocation3]  }
  0x23   :  { %s993_s14 = scalar_lea.hbm %s1143_s2, 256 }
  0x24   :  { %p994_p2 = scmp.ne.s32.totalorder %s1143_s2, %s993_s14  ;;  %p997_p3 = scmp.lt.u32.totalorder %s993_s14, %s1143_s2 }
  0x26   :  { %p999_p4 = pnand %p997_p3, %p994_p2 }
  0x28   :  { %1002 = shalt.err (!%p999_p4)
}
  0x29   :  { %s1003_s19 = scalar_lea.vmem %s39_s29, 256  ;;  %p1008_p6 = scmp.lt.s32.totalorder %s39_s29, %s39_s29 }
  0x2a   :  { %p1004_p5 = scmp.ne.s32.totalorder %s39_s29, %s1003_s19  ;;  %p1009_p7 = scmp.lt.s32.totalorder %s1003_s19, %s1003_s19 }
  0x2c   :  { %p1010_p8 = por %p1009_p7, %p1008_p6 }
  0x2e   :  { %p1011_p9 = pnand %p1010_p8, %p1004_p5 }
  0x30   :  { %1014 = shalt.err (!%p1011_p9)
}
  0x31   :  { %41 = dma.hbm_to_vmem [thread:$0]  %s1143_s2, 256, %s39_s29, [#allocation5]  }
  0x32   :  { %1015 = dma.done.wait [#allocation3], 32  }
  0x33   :  { %1016 = vsyncadd [#allocation3], 4294967264 }
  0x34   :  { %1017 = dma.done.wait [#allocation5], 8448  }
  0x35   :  { %1018 = vsyncadd [#allocation5], 4294958848  ;;  %v1024_v0 = vmov 0.0   ;;  %v53_v1 = vld [vmem:[#allocation4 + $0x8] sm:$0xff]  ;;  %v55_v3 = vld [vmem:[#allocation4 + $0x18] sm:$0xff]  ;;  %vm200_vm0 = vcmask 261120  }
  0x36   :  { %268 = vmatprep.mubr.f32.mxu0 %v1024_v0  ;;  %339 = vmatprep.mubr.f32.mxu1 %v1024_v0  ;;  %v69_v2 = vld [vmem:[#allocation4 + $0x88] sm:$0xff]  ;;  %v71_v5 = vld [vmem:[#allocation4 + $0x98] sm:$0xff]  ;;  %v52_v6 = vld [vmem:[#allocation4] sm:$0xff] }
  0x37   :  { %v878_v4 = vpack.c.bf16 %v69_v2, %v53_v1  ;;  %v68_v7 = vld [vmem:[#allocation4 + $0x80] sm:$0xff]  ;;  %v886_v8 = vpack.c.bf16 %v71_v5, %v55_v3  ;;  %v54_v10 = vld [vmem:[#allocation4 + $0x10] sm:$0xff]  ;;  %v85_v12 = vld [vmem:[#allocation4 + $0x108] sm:$0xff] }
  0x38   :  { %v880_v9 = vpack.c.bf16 %v68_v7, %v52_v6  ;;  %v70_v11 = vld [vmem:[#allocation4 + $0x90] sm:$0xff]  ;;  %v101_v14 = vld [vmem:[#allocation4 + $0x188] sm:$0xff]  ;;  %v87_v15 = vld [vmem:[#allocation4 + $0x118] sm:$0xff] }
  0x39   :  { %879 = vmatprep.subr.bf16.mxu0 %v878_v4  ;;  %v888_v13 = vpack.c.bf16 %v70_v11, %v54_v10  ;;  %v103_v16 = vld [vmem:[#allocation4 + $0x198] sm:$0xff]  ;;  %887 = vmatprep.subr.bf16.mxu1 %v886_v8  ;;  %v882_v17 = vpack.c.bf16 %v101_v14, %v85_v12  ;;  %v84_v19 = vld [vmem:[#allocation4 + $0x100] sm:$0xff]  ;;  %v86_v21 = vld [vmem:[#allocation4 + $0x110] sm:$0xff] }
  0x3a   :  { %881 = vmatpush1.bf16.msra.mxu0 %v880_v9  ;;  %v890_v18 = vpack.c.bf16 %v103_v16, %v87_v15  ;;  %v100_v20 = vld [vmem:[#allocation4 + $0x180] sm:$0xff]  ;;  %v102_v23 = vld [vmem:[#allocation4 + $0x190] sm:$0xff]  ;;  %v57_v24 = vld [vmem:[#allocation4 + $0x28] sm:$0xff] }
  0x3b   :  { %889 = vmatpush1.bf16.msra.mxu1 %v888_v13  ;;  %v884_v22 = vpack.c.bf16 %v100_v20, %v84_v19  ;;  %883 = vmatprep.subr.bf16.mxu0 %v882_v17  ;;  %v892_v25 = vpack.c.bf16 %v102_v23, %v86_v21  ;;  %v1084_v26 = vld [vmem:[#allocation2] sm:$0x3]  ;;  %v73_v27 = vld [vmem:[#allocation4 + $0xa8] sm:$0xff]  ;;  %v56_v32 = vld [vmem:[#allocation4 + $0x20] sm:$0xff] }
  0x3c   :  { %891 = vmatprep.subr.bf16.mxu1 %v890_v18  ;;  %v59_v28 = vld [vmem:[#allocation4 + $0x38] sm:$0xff]  ;;  %v894_v30 = vpack.c.bf16 %v73_v27, %v57_v24  ;;  %v72_v33 = vld [vmem:[#allocation4 + $0xa0] sm:$0xff]  ;;  %v58_v34 = vld [vmem:[#allocation4 + $0x30] sm:$0xff] }
  0x3d   :  { %v75_v29 = vld [vmem:[#allocation4 + $0xb8] sm:$0xff]  ;;  %v896_v35 = vpack.c.bf16 %v72_v33, %v56_v32  ;;  %v74_v36 = vld [vmem:[#allocation4 + $0xb0] sm:$0xff]  ;;  %v89_v37 = vld [vmem:[#allocation4 + $0x128] sm:$0xff] }
  0x3e   :  { %v902_v31 = vpack.c.bf16 %v75_v29, %v59_v28  ;;  %885 = vmatpush1.bf16.msra.mxu0 %v884_v22  ;;  %v105_v38 = vld [vmem:[#allocation4 + $0x1a8] sm:$0xff]  ;;  %v904_v39 = vpack.c.bf16 %v74_v36, %v58_v34  ;;  %v91_v41 = vld [vmem:[#allocation4 + $0x138] sm:$0xff]  ;;  %v88_v43 = vld [vmem:[#allocation4 + $0x120] sm:$0xff]  ;;  %v120_v36 = vlaneseq }
  0x3f   :  { %893 = vmatpush1.bf16.msra.mxu1 %v892_v25  ;;  %895 = vmatprep.subr.bf16.mxu0 %v894_v30  ;;  %v898_v40 = vpack.c.bf16 %v105_v38, %v89_v37  ;;  %v107_v42 = vld [vmem:[#allocation4 + $0x1b8] sm:$0xff]  ;;  %v104_v45 = vld [vmem:[#allocation4 + $0x1a0] sm:$0xff]  ;;  %v90_v46 = vld [vmem:[#allocation4 + $0x130] sm:$0xff] }
  0x40   :  { %903 = vmatprep.subr.bf16.mxu1 %v902_v31  ;;  %v906_v44 = vpack.c.bf16 %v107_v42, %v91_v41  ;;  %v106_v47 = vld [vmem:[#allocation4 + $0x1b0] sm:$0xff]  ;;  %v61_v48 = vld [vmem:[#allocation4 + $0x48] sm:$0xff]  ;;  %v63_v50 = vld [vmem:[#allocation4 + $0x58] sm:$0xff]  ;;  %v900_v51 = vpack.c.bf16 %v104_v45, %v88_v43  ;;  %v1108_v37 = vshrl.u32 %v120_v36, 7 }
  0x41   :  { %870 = vmatmul.mubr.msk.f32.vlgmr.msra.gmra.mrb[0].mxu0 %vm200_vm0, %v1084_v26  ;;  %v77_v49 = vld [vmem:[#allocation4 + $0xc8] sm:$0xff]  ;;  %v79_v52 = vld [vmem:[#allocation4 + $0xd8] sm:$0xff]  ;;  %v908_v53 = vpack.c.bf16 %v106_v47, %v90_v46  ;;  %v60_v55 = vld [vmem:[#allocation4 + $0x40] sm:$0xff] }
  0x42   :  { %871 = vmatmul.mubr.msk.f32.vlgmr.msra.gmra.mrb[0].mxu1 %vm200_vm0, %v1084_v26  ;;  %897 = vmatpush1.bf16.msra.mxu0 %v896_v35  ;;  %v910_v54 = vpack.c.bf16 %v77_v49, %v61_v48  ;;  %v76_v56 = vld [vmem:[#allocation4 + $0xc0] sm:$0xff]  ;;  %v62_v57 = vld [vmem:[#allocation4 + $0x50] sm:$0xff]  ;;  %v918_v58 = vpack.c.bf16 %v79_v52, %v63_v50  ;;  %v93_v60 = vld [vmem:[#allocation4 + $0x148] sm:$0xff]  ;;  %v122_v38 = vsub.s32 0, %v1108_v37  ;;  %v130_v42 = vsub.s32 2, %v1108_v37 }
  0x43   :  { %905 = vmatpush1.bf16.msra.mxu1 %v904_v39  ;;  %899 = vmatprep.subr.bf16.mxu0 %v898_v40  ;;  %v78_v59 = vld [vmem:[#allocation4 + $0xd0] sm:$0xff]  ;;  %v109_v61 = vld [vmem:[#allocation4 + $0x1c8] sm:$0xff]  ;;  %v95_v62 = vld [vmem:[#allocation4 + $0x158] sm:$0xff]  ;;  %v912_v1 = vpack.c.bf16 %v76_v56, %v60_v55  ;;  %v1025_v39 = vmov 1983009808   ;;  %v134_v43 = vsub.s32 3, %v1108_v37 }
  0x44   :  { %907 = vmatprep.subr.bf16.mxu1 %v906_v44  ;;  %410 = vmatprep.mubr.f32.mxu0 %v1024_v0  ;;  %v111_v63 = vld [vmem:[#allocation4 + $0x1d8] sm:$0xff]  ;;  %v920_v2 = vpack.c.bf16 %v78_v59, %v62_v57  ;;  %v914_v3 = vpack.c.bf16 %v109_v61, %v93_v60  ;;  %v92_v4 = vld [vmem:[#allocation4 + $0x140] sm:$0xff]  ;;  %v94_v6 = vld [vmem:[#allocation4 + $0x150] sm:$0xff]  ;;  %v791_v40 = vunpack.c.l.s4 %v1025_v39  ;;  %v146_v57 = vsub.s32 6, %v1108_v37 }
  0x45   :  { %481 = vmatprep.mubr.f32.mxu1 %v1024_v0  ;;  %v108_v5 = vld [vmem:[#allocation4 + $0x1c0] sm:$0xff]  ;;  %v922_v7 = vpack.c.bf16 %v111_v63, %v95_v62  ;;  %v110_v8 = vld [vmem:[#allocation4 + $0x1d0] sm:$0xff]  ;;  %v65_v9 = vld [vmem:[#allocation4 + $0x68] sm:$0xff]  ;;  %v150_v60 = vsub.s32 7, %v1108_v37 }
  0x46   :  { %901 = vmatpush1.bf16.msra.mxu0 %v900_v51  ;;  %v81_v10 = vld [vmem:[#allocation4 + $0xe8] sm:$0xff]  ;;  %v67_v11 = vld [vmem:[#allocation4 + $0x78] sm:$0xff]  ;;  %v916_v13 = vpack.c.bf16 %v108_v5, %v92_v4  ;;  %v924_v14 = vpack.c.bf16 %v110_v8, %v94_v6  ;;  %v64_v16 = vld [vmem:[#allocation4 + $0x60] sm:$0xff]  ;;  %v792_v45 = vunpack.c.0.s8 %v791_v40 }
  0x47   :  { %909 = vmatpush1.bf16.msra.mxu1 %v908_v53  ;;  %911 = vmatprep.subr.bf16.mxu0 %v910_v54  ;;  %v83_v12 = vld [vmem:[#allocation4 + $0xf8] sm:$0xff]  ;;  %v926_v15 = vpack.c.bf16 %v81_v10, %v65_v9  ;;  %v80_v17 = vld [vmem:[#allocation4 + $0xe0] sm:$0xff]  ;;  %v66_v18 = vld [vmem:[#allocation4 + $0x70] sm:$0xff]  ;;  %v138_v53 = vsub.s32 4, %v1108_v37 }
  0x48   :  { %919 = vmatprep.subr.bf16.mxu1 %v918_v58  ;;  %v934_v19 = vpack.c.bf16 %v83_v12, %v67_v11  ;;  %v82_v20 = vld [vmem:[#allocation4 + $0xf0] sm:$0xff]  ;;  %v97_v21 = vld [vmem:[#allocation4 + $0x168] sm:$0xff]  ;;  %v99_v23 = vld [vmem:[#allocation4 + $0x178] sm:$0xff]  ;;  %v928_v25 = vpack.c.bf16 %v80_v17, %v64_v16  ;;  %v1115_v52 = vsub.s32 %v792_v45, %v1108_v37  ;;  %v142_v58 = vsub.s32 5, %v1108_v37 }
  0x49   :  { %872 = vmatmul.mubr.msk.f32.vlgmr.msra.gmra.mrb[2].mxu0 %vm200_vm0, %v1084_v26  ;;  %v113_v22 = vld [vmem:[#allocation4 + $0x1e8] sm:$0xff]  ;;  %v115_v24 = vld [vmem:[#allocation4 + $0x1f8] sm:$0xff]  ;;  %v936_v27 = vpack.c.bf16 %v82_v20, %v66_v18  ;;  %v96_v29 = vld [vmem:[#allocation4 + $0x160] sm:$0xff] }
  0x4a   :  { %873 = vmatmul.mubr.msk.f32.vlgmr.msra.gmra.mrb[2].mxu1 %vm200_vm0, %v1084_v26  ;;  %913 = vmatpush1.bf16.msra.mxu0 %v912_v1  ;;  %v930_v28 = vpack.c.bf16 %v113_v22, %v97_v21  ;;  %v112_v30 = vld [vmem:[#allocation4 + $0x1e0] sm:$0xff]  ;;  %v938_v31 = vpack.c.bf16 %v115_v24, %v99_v23  ;;  %v98_v32 = vld [vmem:[#allocation4 + $0x170] sm:$0xff] }
  0x4b   :  { %921 = vmatpush1.bf16.msra.mxu1 %v920_v2  ;;  %915 = vmatprep.subr.bf16.mxu0 %v914_v3  ;;  %v114_v33 = vld [vmem:[#allocation4 + $0x1f0] sm:$0xff]  ;;  %v932_v34 = vpack.c.bf16 %v112_v30, %v96_v29  ;;  %v116_v41 = vld [vmem:[#allocation6] sm:$0xff] }
  0x4c   :  { %923 = vmatprep.subr.bf16.mxu1 %v922_v7  ;;  %552 = vmatprep.mubr.f32.mxu0 %v1024_v0  ;;  %v940_v35 = vpack.c.bf16 %v114_v33, %v98_v32  ;;  %v123_v44 = vrot.slane %v116_v41, %v122_v38  ;;  %v131_v46 = vrot.slane %v116_v41, %v130_v42 }
  0x4d   :  { %623 = vmatprep.mubr.f32.mxu1 %v1024_v0  ;;  %v135_v48 = vrot.slane %v116_v41, %v134_v43  ;;  %v139_v63 = vrot.slane %v116_v41, %v138_v53  ;;  %v147_v2 = vrot.slane %v116_v41, %v146_v57  ;;  %v143_v3 = vrot.slane %v116_v41, %v142_v58 }
  0x4e   :  { %917 = vmatpush1.bf16.msra.mxu0 %v916_v13  ;;  %v151_v5 = vrot.slane %v116_v41, %v150_v60 }
  0x4f   :  { %925 = vmatpush1.bf16.msra.mxu1 %v924_v14  ;;  %927 = vmatprep.subr.bf16.mxu0 %v926_v15  ;;  %v117_v14 = vld [vmem:[#allocation6 + $0x8] sm:$0xff] }
  0x50   :  { %935 = vmatprep.subr.bf16.mxu1 %v934_v19  ;;  %v155_v18 = vrot.slane %v117_v14, %v122_v38  ;;  %v163_v20 = vrot.slane %v117_v14, %v130_v42  ;;  %v167_v23 = vrot.slane %v117_v14, %v134_v43  ;;  %v171_v36 = vrot.slane %v117_v14, %v138_v53 }
  0x51   :  { %874 = vmatmul.mubr.msk.f32.vlgmr.msra.gmra.mrb[4].mxu0 %vm200_vm0, %v1084_v26  ;;  %v179_v38 = vrot.slane %v117_v14, %v146_v57  ;;  %v175_v39 = vrot.slane %v117_v14, %v142_v58 }
  0x52   :  { %875 = vmatmul.mubr.msk.f32.vlgmr.msra.gmra.mrb[4].mxu1 %vm200_vm0, %v1084_v26  ;;  %929 = vmatpush1.bf16.msra.mxu0 %v928_v25 }
  0x53   :  { %937 = vmatpush1.bf16.msra.mxu1 %v936_v27  ;;  %931 = vmatprep.subr.bf16.mxu0 %v930_v28 }
  0x54   :  { %939 = vmatprep.subr.bf16.mxu1 %v938_v31  ;;  %694 = vmatprep.mubr.f32.mxu0 %v1024_v0 }
  0x55   :  { %765 = vmatprep.mubr.f32.mxu1 %v1024_v0  ;;  %v126_v0 = vsub.s32 1, %v1108_v37 }
  0x56   :  { %933 = vmatpush1.bf16.msra.mxu0 %v932_v34 }
  0x57   :  { %941 = vmatpush1.bf16.msra.mxu1 %v940_v35  ;;  %v127_v47 = vrot.slane %v116_v41, %v126_v0  ;;  %v159_v21 = vrot.slane %v117_v14, %v126_v0  ;;  %v183_v41 = vrot.slane %v117_v14, %v150_v60 }
  0x59   :  { %876 = vmatmul.mubr.msk.f32.vlgmr.msra.gmra.mrb[6].mxu0 %vm200_vm0, %v1084_v26 }
  0x5a   :  { %877 = vmatmul.mubr.msk.f32.vlgmr.msra.gmra.mrb[6].mxu1 %vm200_vm0, %v1084_v26 }
 0x114   :  { %v270_v26 = vpop.f32.mrb[0].mxu0 }
 0x115   :  { %v271_v49 = vadd.f32 %v270_v26, %v123_v44  ;;  %v341_v50 = vpop.f32.mrb[0].mxu1  ;;  %v272_v51 = vpop.f32.mrb[1].mxu0 }
 0x116   :  { %v342_v54 = vadd.f32 %v341_v50, %v131_v46  ;;  %v273_v55 = vadd.f32 %v272_v51, %v127_v47  ;;  %v343_v56 = vpop.f32.mrb[1].mxu1 }
 0x117   :  { %v344_v59 = vadd.f32 %v343_v56, %v135_v48 }
 0x118   :  { %v788_v61 = vcombine.low %v271_v49, %v273_v55 }
 0x119   :  { %v789_v62 = vcombine.low %v342_v54, %v344_v59 }
 0x11a   :  { %v796_v1 = vrot.slane %v788_v61, %v1115_v52 }
 0x11b   :  { %v803_v4 = vrot.slane %v789_v62, %v1115_v52 }
 0x11c   :  { %v412_v6 = vpop.f32.mrb[2].mxu0 }
 0x11d   :  { %v804_v7 = vcombine.low %v796_v1, %v803_v4  ;;  %v413_v8 = vadd.f32 %v412_v6, %v139_v63  ;;  %v483_v9 = vpop.f32.mrb[2].mxu1  ;;  %v414_v10 = vpop.f32.mrb[3].mxu0 }
 0x11e   :  { %v484_v11 = vadd.f32 %v483_v9, %v147_v2  ;;  %v415_v12 = vadd.f32 %v414_v10, %v143_v3  ;;  %v485_v13 = vpop.f32.mrb[3].mxu1 }
 0x11f   :  { %860 = vst [vmem:[%s1144_s3] sm:$0xff] %v804_v7  ;;  %v486_v15 = vadd.f32 %v485_v13, %v151_v5 }
 0x120   :  { %v805_v16 = vcombine.low %v413_v8, %v415_v12 }
 0x121   :  { %v806_v17 = vcombine.low %v484_v11, %v486_v15 }
 0x122   :  { %v813_v19 = vrot.slane %v805_v16, %v1115_v52 }
 0x123   :  { %v820_v22 = vrot.slane %v806_v17, %v1115_v52 }
 0x124   :  { %v554_v24 = vpop.f32.mrb[4].mxu0 }
 0x125   :  { %v821_v25 = vcombine.low %v813_v19, %v820_v22  ;;  %v555_v27 = vadd.f32 %v554_v24, %v155_v18  ;;  %v625_v28 = vpop.f32.mrb[4].mxu1  ;;  %v556_v29 = vpop.f32.mrb[5].mxu0 }
 0x126   :  { %v626_v30 = vadd.f32 %v625_v28, %v163_v20  ;;  %v557_v31 = vadd.f32 %v556_v29, %v159_v21  ;;  %v627_v32 = vpop.f32.mrb[5].mxu1 }
 0x127   :  { %861 = vst [vmem:[%s1144_s3 + $0x8] sm:$0xff] %v821_v25  ;;  %v628_v33 = vadd.f32 %v627_v32, %v167_v23 }
 0x128   :  { %v822_v34 = vcombine.low %v555_v27, %v557_v31 }
 0x129   :  { %v823_v35 = vcombine.low %v626_v30, %v628_v33 }
 0x12a   :  { %v830_v37 = vrot.slane %v822_v34, %v1115_v52 }
 0x12b   :  { %v837_v40 = vrot.slane %v823_v35, %v1115_v52 }
 0x12c   :  { %v696_v42 = vpop.f32.mrb[6].mxu0 }
 0x12d   :  { %v838_v0 = vcombine.low %v830_v37, %v837_v40  ;;  %v697_v43 = vadd.f32 %v696_v42, %v171_v36  ;;  %v767_v44 = vpop.f32.mrb[6].mxu1  ;;  %v698_v45 = vpop.f32.mrb[7].mxu0 }
 0x12e   :  { %v768_v46 = vadd.f32 %v767_v44, %v179_v38  ;;  %v699_v47 = vadd.f32 %v698_v45, %v175_v39  ;;  %v769_v48 = vpop.f32.mrb[7].mxu1 }
 0x12f   :  { %862 = vst [vmem:[%s1144_s3 + $0x10] sm:$0xff] %v838_v0  ;;  %v770_v26 = vadd.f32 %v769_v48, %v183_v41 }
 0x130   :  { %v839_v49 = vcombine.low %v697_v43, %v699_v47 }
 0x131   :  { %v840_v50 = vcombine.low %v768_v46, %v770_v26 }
 0x132   :  { %v847_v51 = vrot.slane %v839_v49, %v1115_v52 }
 0x133   :  { %v854_v53 = vrot.slane %v840_v50, %v1115_v52 }
 0x135   :  { %v855_v54 = vcombine.low %v847_v51, %v854_v53 }
 0x137   :  { %863 = vst [vmem:[%s1144_s3 + $0x18] sm:$0xff] %v855_v54 }
 0x138   :  { %868 = vsyncpa [#allocation3], 1 }
 0x139   :  { %869 = vsyncpa [#allocation5], 1 }

// kernel: decoder_forward.5
= control target key start
LH: loop header
LB: loop body
LE: loop exit
PB: predicated region body
PF: predicated region fallthrough
CT: control target
= control target key end

     0   :  { %s3254_s1 = inlined_call_operand.vmem [shape: bf16[4,512,128], index: 1, kind: input, shape index: {}]   ;;  %s3255_s0 = inlined_call_operand.vmem [shape: bf16[4,32,512], index: 0, kind: input, shape index: {}]   ;;  %s3256_s2 = inlined_call_operand.vmem [shape: f32[1,128], index: 2, kind: input, shape index: {}]   ;;  %s3257_s3 = inlined_call_operand.vmem [shape: f32[1,128], index: 3, kind: input, shape index: {}]   ;;  %s3258_s4 = inlined_call_operand.vmem [shape: f32[1,128], index: 4, kind: input, shape index: {}]   ;;  %s3259_s5 = inlined_call_operand.vmem [shape: f32[128,128], index: 5, kind: output, shape index: {}]  }
   0x1   :  { %v2407_v0 = vld [vmem:[%s3254_s1 + $0x40] sm:$0xff]   ;;  %v2411_v4 = vld [vmem:[%s3254_s1 + $0x48] sm:$0xff]   ;;  %v2415_v8 = vld [vmem:[%s3254_s1 + $0x50] sm:$0xff]  }
   0x2   :  { %v2408_v1 = vld [vmem:[%s3254_s1 + $0xc0] sm:$0xff]   ;;  %2183 = vmatprep.subr.bf16.mxu0 %v2407_v0  ;;  %v2412_v5 = vld [vmem:[%s3254_s1 + $0xc8] sm:$0xff]   ;;  %v2416_v9 = vld [vmem:[%s3254_s1 + $0xd0] sm:$0xff]  }
   0x3   :  { %v2409_v2 = vld [vmem:[%s3254_s1] sm:$0xff]   ;;  %2211 = vmatprep.subr.bf16.mxu1 %v2408_v1  ;;  %v2413_v6 = vld [vmem:[%s3254_s1 + $0x8] sm:$0xff]   ;;  %v2417_v10 = vld [vmem:[%s3254_s1 + $0x10] sm:$0xff]  }
   0x4   :  { %v2410_v3 = vld [vmem:[%s3254_s1 + $0x80] sm:$0xff]   ;;  %2184 = vmatpush3.bf16.msra.mxu0 %v2409_v2  ;;  %v2414_v7 = vld [vmem:[%s3254_s1 + $0x88] sm:$0xff]   ;;  %v2418_v11 = vld [vmem:[%s3254_s1 + $0x90] sm:$0xff]  }
   0x5   :  { %2212 = vmatpush3.bf16.msra.mxu1 %v2410_v3  ;;  %2185 = vmatprep.subr.bf16.mxu0 %v2411_v4  ;;  %v2419_v12 = vld [vmem:[%s3254_s1 + $0x58] sm:$0xff]   ;;  %v2423_v16 = vld [vmem:[%s3254_s1 + $0x60] sm:$0xff]   ;;  %v2427_v20 = vld [vmem:[%s3254_s1 + $0x68] sm:$0xff]  }
   0x6   :  { %2213 = vmatprep.subr.bf16.mxu1 %v2412_v5  ;;  %v2420_v13 = vld [vmem:[%s3254_s1 + $0xd8] sm:$0xff]   ;;  %v2424_v17 = vld [vmem:[%s3254_s1 + $0xe0] sm:$0xff]   ;;  %v2428_v21 = vld [vmem:[%s3254_s1 + $0xe8] sm:$0xff]  }
   0x7   :  { %v2421_v14 = vld [vmem:[%s3254_s1 + $0x18] sm:$0xff]   ;;  %v2425_v18 = vld [vmem:[%s3254_s1 + $0x20] sm:$0xff]   ;;  %v2429_v22 = vld [vmem:[%s3254_s1 + $0x28] sm:$0xff]  }
   0x8   :  { %2186 = vmatpush3.bf16.msra.mxu0 %v2413_v6  ;;  %v2422_v15 = vld [vmem:[%s3254_s1 + $0x98] sm:$0xff]   ;;  %v2426_v19 = vld [vmem:[%s3254_s1 + $0xa0] sm:$0xff]   ;;  %v2430_v23 = vld [vmem:[%s3254_s1 + $0xa8] sm:$0xff]  }
   0x9   :  { %2214 = vmatpush3.bf16.msra.mxu1 %v2414_v7  ;;  %2187 = vmatprep.subr.bf16.mxu0 %v2415_v8  ;;  %v2431_v24 = vld [vmem:[%s3254_s1 + $0x70] sm:$0xff]   ;;  %v2435_v28 = vld [vmem:[%s3254_s1 + $0x78] sm:$0xff]   ;;  %v2445_v36 = vld [vmem:[%s3254_s1 + $0x140] sm:$0xff]  }
   0xa   :  { %2215 = vmatprep.subr.bf16.mxu1 %v2416_v9  ;;  %v2432_v25 = vld [vmem:[%s3254_s1 + $0xf0] sm:$0xff]   ;;  %v2436_v29 = vld [vmem:[%s3254_s1 + $0xf8] sm:$0xff]   ;;  %v2446_v37 = vld [vmem:[%s3254_s1 + $0x1c0] sm:$0xff]  }
   0xb   :  { %v2433_v26 = vld [vmem:[%s3254_s1 + $0x30] sm:$0xff]   ;;  %v2437_v30 = vld [vmem:[%s3254_s1 + $0x38] sm:$0xff]   ;;  %v2447_v38 = vld [vmem:[%s3254_s1 + $0x100] sm:$0xff]  }
   0xc   :  { %2188 = vmatpush3.bf16.msra.mxu0 %v2417_v10  ;;  %v2434_v27 = vld [vmem:[%s3254_s1 + $0xb0] sm:$0xff]   ;;  %v2438_v31 = vld [vmem:[%s3254_s1 + $0xb8] sm:$0xff]   ;;  %v2448_v39 = vld [vmem:[%s3254_s1 + $0x180] sm:$0xff]  }
   0xd   :  { %2216 = vmatpush3.bf16.msra.mxu1 %v2418_v11  ;;  %2189 = vmatprep.subr.bf16.mxu0 %v2419_v12  ;;  %v2439_v32 = vld [vmem:[%s3255_s0] ss:$16 sps:$4 sm:$0xff]   ;;  %v2441_v33 = vld [vmem:[%s3255_s0 + $0x4] ss:$16 sps:$4 sm:$0xff]   ;;  %v2442_v34 = vld [vmem:[%s3255_s0 + $0x8] ss:$16 sps:$4 sm:$0xff]  }
   0xe   :  { %2217 = vmatprep.subr.bf16.mxu1 %v2420_v13  ;;  %v2444_v35 = vld [vmem:[%s3255_s0 + $0xc] ss:$16 sps:$4 sm:$0xff]   ;;  %357 = vmatprep.mubr.bf16.mxu0 %v2441_v33  ;;  %v2453_v44 = vld [vmem:[%s3255_s0 + $0x24] ss:$16 sps:$4 sm:$0xff]   ;;  %v2457_v46 = vld [vmem:[%s3255_s0 + $0x20] ss:$16 sps:$4 sm:$0xff]  }
   0xf   :  { %406 = vmatprep.mubr.bf16.mxu1 %v2444_v35  ;;  %v2449_v40 = vld [vmem:[%s3254_s1 + $0x148] sm:$0xff]   ;;  %v2459_v48 = vld [vmem:[%s3254_s1 + $0x150] sm:$0xff]   ;;  %v2463_v52 = vld [vmem:[%s3254_s1 + $0x158] sm:$0xff]  }
  0x10   :  { %2190 = vmatpush3.bf16.msra.mxu0 %v2421_v14  ;;  %v2450_v41 = vld [vmem:[%s3254_s1 + $0x1c8] sm:$0xff]   ;;  %v2460_v49 = vld [vmem:[%s3254_s1 + $0x1d0] sm:$0xff]   ;;  %v2464_v53 = vld [vmem:[%s3254_s1 + $0x1d8] sm:$0xff]  }
  0x11   :  { %2218 = vmatpush3.bf16.msra.mxu1 %v2422_v15  ;;  %2191 = vmatprep.subr.bf16.mxu0 %v2423_v16  ;;  %v2451_v42 = vld [vmem:[%s3254_s1 + $0x108] sm:$0xff]   ;;  %v2461_v50 = vld [vmem:[%s3254_s1 + $0x110] sm:$0xff]   ;;  %v2465_v54 = vld [vmem:[%s3254_s1 + $0x118] sm:$0xff]  }
  0x12   :  { %2219 = vmatprep.subr.bf16.mxu1 %v2424_v17  ;;  %v2452_v43 = vld [vmem:[%s3254_s1 + $0x188] sm:$0xff]   ;;  %v2462_v51 = vld [vmem:[%s3254_s1 + $0x190] sm:$0xff]   ;;  %v2466_v55 = vld [vmem:[%s3254_s1 + $0x198] sm:$0xff]  }
  0x13   :  { %v2455_v45 = vld [vmem:[%s3255_s0 + $0x2c] ss:$16 sps:$4 sm:$0xff]   ;;  %v2458_v47 = vld [vmem:[%s3255_s0 + $0x28] ss:$16 sps:$4 sm:$0xff]   ;;  %v2467_v56 = vld [vmem:[%s3254_s1 + $0x160] sm:$0xff]  }
  0x14   :  { %2192 = vmatpush3.bf16.msra.mxu0 %v2425_v18  ;;  %v2468_v57 = vld [vmem:[%s3254_s1 + $0x1e0] sm:$0xff]   ;;  %v2471_v60 = vld [vmem:[%s3254_s1 + $0x168] sm:$0xff]   ;;  %v2475_v0 = vld [vmem:[%s3254_s1 + $0x170] sm:$0xff]  }
  0x15   :  { %2220 = vmatpush3.bf16.msra.mxu1 %v2426_v19  ;;  %2193 = vmatprep.subr.bf16.mxu0 %v2427_v20  ;;  %v2469_v58 = vld [vmem:[%s3254_s1 + $0x120] sm:$0xff]   ;;  %v2472_v61 = vld [vmem:[%s3254_s1 + $0x1e8] sm:$0xff]   ;;  %v2476_v1 = vld [vmem:[%s3254_s1 + $0x1f0] sm:$0xff]  }
  0x16   :  { %2221 = vmatprep.subr.bf16.mxu1 %v2428_v21  ;;  %v2470_v59 = vld [vmem:[%s3254_s1 + $0x1a0] sm:$0xff]   ;;  %v2473_v62 = vld [vmem:[%s3254_s1 + $0x128] sm:$0xff]   ;;  %v2477_v2 = vld [vmem:[%s3254_s1 + $0x130] sm:$0xff]  }
  0x17   :  { %v2474_v63 = vld [vmem:[%s3254_s1 + $0x1a8] sm:$0xff]   ;;  %v2478_v3 = vld [vmem:[%s3254_s1 + $0x1b0] sm:$0xff]   ;;  %v2479_v4 = vld [vmem:[%s3254_s1 + $0x178] sm:$0xff]  }
  0x18   :  { %2194 = vmatpush3.bf16.msra.mxu0 %v2429_v22  ;;  %v2480_v5 = vld [vmem:[%s3254_s1 + $0x1f8] sm:$0xff]   ;;  %v2483_v8 = vld [vmem:[%s3255_s0 + $0x40] ss:$16 sps:$4 sm:$0xff]   ;;  %v2485_v9 = vld [vmem:[%s3255_s0 + $0x44] ss:$16 sps:$4 sm:$0xff]  }
  0x19   :  { %2222 = vmatpush3.bf16.msra.mxu1 %v2430_v23  ;;  %2195 = vmatprep.subr.bf16.mxu0 %v2431_v24  ;;  %v2481_v6 = vld [vmem:[%s3254_s1 + $0x138] sm:$0xff]   ;;  %v2489_v12 = vld [vmem:[%s3254_s1 + $0x240] sm:$0xff]   ;;  %v2493_v16 = vld [vmem:[%s3254_s1 + $0x248] sm:$0xff]  }
  0x1a   :  { %2223 = vmatprep.subr.bf16.mxu1 %v2432_v25  ;;  %v2482_v7 = vld [vmem:[%s3254_s1 + $0x1b8] sm:$0xff]   ;;  %v2490_v13 = vld [vmem:[%s3254_s1 + $0x2c0] sm:$0xff]   ;;  %v2494_v17 = vld [vmem:[%s3254_s1 + $0x2c8] sm:$0xff]  }
  0x1b   :  { %v2486_v10 = vld [vmem:[%s3255_s0 + $0x48] ss:$16 sps:$4 sm:$0xff]   ;;  %v2488_v11 = vld [vmem:[%s3255_s0 + $0x4c] ss:$16 sps:$4 sm:$0xff]   ;;  %v2491_v14 = vld [vmem:[%s3254_s1 + $0x200] sm:$0xff]  }
  0x1c   :  { %2196 = vmatpush3.bf16.msra.mxu0 %v2433_v26  ;;  %v2492_v15 = vld [vmem:[%s3254_s1 + $0x280] sm:$0xff]   ;;  %v2495_v18 = vld [vmem:[%s3254_s1 + $0x208] sm:$0xff]   ;;  %v2503_v24 = vld [vmem:[%s3254_s1 + $0x250] sm:$0xff]  }
  0x1d   :  { %2224 = vmatpush3.bf16.msra.mxu1 %v2434_v27  ;;  %2197 = vmatprep.subr.bf16.mxu0 %v2435_v28  ;;  %v2496_v19 = vld [vmem:[%s3254_s1 + $0x288] sm:$0xff]   ;;  %v2497_v20 = vld [vmem:[%s3255_s0 + $0x64] ss:$16 sps:$4 sm:$0xff]   ;;  %v2501_v22 = vld [vmem:[%s3255_s0 + $0x60] ss:$16 sps:$4 sm:$0xff]  }
  0x1e   :  { %2225 = vmatprep.subr.bf16.mxu1 %v2436_v29  ;;  %v2499_v21 = vld [vmem:[%s3255_s0 + $0x6c] ss:$16 sps:$4 sm:$0xff]   ;;  %v2502_v23 = vld [vmem:[%s3255_s0 + $0x68] ss:$16 sps:$4 sm:$0xff]   ;;  %v2504_v25 = vld [vmem:[%s3254_s1 + $0x2d0] sm:$0xff]  }
  0x1f   :  { %v2505_v26 = vld [vmem:[%s3254_s1 + $0x210] sm:$0xff]   ;;  %v2507_v28 = vld [vmem:[%s3254_s1 + $0x258] sm:$0xff]   ;;  %v2512_v33 = vld [vmem:[%s3254_s1 + $0x2e0] sm:$0xff]  }
  0x20   :  { %2198 = vmatpush3.bf16.msra.mxu0 %v2437_v30  ;;  %v2506_v27 = vld [vmem:[%s3254_s1 + $0x290] sm:$0xff]   ;;  %v2508_v29 = vld [vmem:[%s3254_s1 + $0x2d8] sm:$0xff]   ;;  %v2514_v35 = vld [vmem:[%s3254_s1 + $0x2a0] sm:$0xff]  }
  0x21   :  { %2226 = vmatpush3.bf16.msra.mxu1 %v2438_v31  ;;  %2239 = vmatprep.subr.bf16.mxu0 %v2445_v36  ;;  %v2509_v30 = vld [vmem:[%s3254_s1 + $0x218] sm:$0xff]   ;;  %v2515_v36 = vld [vmem:[%s3254_s1 + $0x268] sm:$0xff]  }
  0x22   :  { %2267 = vmatprep.subr.bf16.mxu1 %v2446_v37  ;;  %v2510_v31 = vld [vmem:[%s3254_s1 + $0x298] sm:$0xff]   ;;  %v2516_v37 = vld [vmem:[%s3254_s1 + $0x2e8] sm:$0xff]  }
  0x23   :  { %358 = vmatmul.mubr.bf16.vlgmr.msra.gmra.mrb[0].mxu0 %v2439_v32  ;;  %v2511_v32 = vld [vmem:[%s3254_s1 + $0x260] sm:$0xff]  }
  0x24   :  { %407 = vmatmul.mubr.bf16.vlgmr.msra.gmra.mrb[0].mxu1 %v2442_v34  ;;  %2240 = vmatpush3.bf16.msra.mxu0 %v2447_v38  ;;  %v2513_v34 = vld [vmem:[%s3254_s1 + $0x220] sm:$0xff]   ;;  %v2517_v38 = vld [vmem:[%s3254_s1 + $0x228] sm:$0xff]  }
  0x25   :  { %2268 = vmatpush3.bf16.msra.mxu1 %v2448_v39  ;;  %2241 = vmatprep.subr.bf16.mxu0 %v2449_v40  ;;  %v2518_v39 = vld [vmem:[%s3254_s1 + $0x2a8] sm:$0xff]   ;;  %v2519_v40 = vld [vmem:[%s3254_s1 + $0x270] sm:$0xff]  }
  0x26   :  { %2269 = vmatprep.subr.bf16.mxu1 %v2450_v41  ;;  %365 = vmatprep.mubr.bf16.mxu0 %v2453_v44  ;;  %v2520_v41 = vld [vmem:[%s3254_s1 + $0x2f0] sm:$0xff]   ;;  %v2523_v44 = vld [vmem:[%s3254_s1 + $0x278] sm:$0xff]  }
  0x27   :  { %414 = vmatprep.mubr.bf16.mxu1 %v2455_v45  ;;  %v2524_v45 = vld [vmem:[%s3254_s1 + $0x2f8] sm:$0xff]  }
  0x28   :  { %2242 = vmatpush3.bf16.msra.mxu0 %v2451_v42  ;;  %v2521_v42 = vld [vmem:[%s3254_s1 + $0x230] sm:$0xff]  }
  0x29   :  { %2270 = vmatpush3.bf16.msra.mxu1 %v2452_v43  ;;  %2243 = vmatprep.subr.bf16.mxu0 %v2459_v48  ;;  %v2522_v43 = vld [vmem:[%s3254_s1 + $0x2b0] sm:$0xff]  }
  0x2a   :  { %2271 = vmatprep.subr.bf16.mxu1 %v2460_v49  ;;  %v2527_v48 = vld [vmem:[%s3255_s0 + $0x80] ss:$16 sps:$4 sm:$0xff]   ;;  %v2529_v49 = vld [vmem:[%s3255_s0 + $0x84] ss:$16 sps:$4 sm:$0xff]  }
  0x2b   :  { %366 = vmatmul.mubr.bf16.gmra.mrb[4].mxu0 %v2457_v46  ;;  %v2525_v46 = vld [vmem:[%s3254_s1 + $0x238] sm:$0xff]  }
  0x2c   :  { %415 = vmatmul.mubr.bf16.gmra.mrb[4].mxu1 %v2458_v47  ;;  %2244 = vmatpush3.bf16.msra.mxu0 %v2461_v50  ;;  %v2526_v47 = vld [vmem:[%s3254_s1 + $0x2b8] sm:$0xff]  }
  0x2d   :  { %2272 = vmatpush3.bf16.msra.mxu1 %v2462_v51  ;;  %2245 = vmatprep.subr.bf16.mxu0 %v2463_v52  ;;  %v2530_v50 = vld [vmem:[%s3255_s0 + $0x88] ss:$16 sps:$4 sm:$0xff]   ;;  %v2532_v51 = vld [vmem:[%s3255_s0 + $0x8c] ss:$16 sps:$4 sm:$0xff]   ;;  %v2533_v52 = vld [vmem:[%s3254_s1 + $0x340] sm:$0xff]  }
  0x2e   :  { %2273 = vmatprep.subr.bf16.mxu1 %v2464_v53  ;;  %761 = vmatprep.mubr.bf16.mxu0 %v2485_v9  ;;  %v2534_v53 = vld [vmem:[%s3254_s1 + $0x3c0] sm:$0xff]  }
  0x2f   :  { %810 = vmatprep.mubr.bf16.mxu1 %v2488_v11  ;;  %v2556_v9 = vld [vmem:[%s3254_s1 + $0x3e0] sm:$0xff]  }
  0x30   :  { %2246 = vmatpush3.bf16.msra.mxu0 %v2465_v54  ;;  %v2535_v54 = vld [vmem:[%s3254_s1 + $0x300] sm:$0xff]  }
  0x31   :  { %2274 = vmatpush3.bf16.msra.mxu1 %v2466_v55  ;;  %2247 = vmatprep.subr.bf16.mxu0 %v2467_v56  ;;  %v2536_v55 = vld [vmem:[%s3254_s1 + $0x380] sm:$0xff]   ;;  %v2537_v56 = vld [vmem:[%s3254_s1 + $0x348] sm:$0xff]  }
  0x32   :  { %2275 = vmatprep.subr.bf16.mxu1 %v2468_v57  ;;  %v2538_v57 = vld [vmem:[%s3254_s1 + $0x3c8] sm:$0xff]   ;;  %v2558_v11 = vld [vmem:[%s3254_s1 + $0x3a0] sm:$0xff]  }
  0x34   :  { %2248 = vmatpush3.bf16.msra.mxu0 %v2469_v58  ;;  %v2539_v58 = vld [vmem:[%s3254_s1 + $0x308] sm:$0xff]  }
  0x35   :  { %2276 = vmatpush3.bf16.msra.mxu1 %v2470_v59  ;;  %2249 = vmatprep.subr.bf16.mxu0 %v2471_v60  ;;  %v2540_v59 = vld [vmem:[%s3254_s1 + $0x388] sm:$0xff]   ;;  %v2541_v60 = vld [vmem:[%s3255_s0 + $0xa4] ss:$16 sps:$4 sm:$0xff]  }
  0x36   :  { %2277 = vmatprep.subr.bf16.mxu1 %v2472_v61  ;;  %v2543_v61 = vld [vmem:[%s3255_s0 + $0xac] ss:$16 sps:$4 sm:$0xff]  }
  0x38   :  { %2250 = vmatpush3.bf16.msra.mxu0 %v2473_v62  ;;  %v2545_v62 = vld [vmem:[%s3255_s0 + $0xa0] ss:$16 sps:$4 sm:$0xff]  }
  0x39   :  { %2278 = vmatpush3.bf16.msra.mxu1 %v2474_v63  ;;  %2251 = vmatprep.subr.bf16.mxu0 %v2475_v0  ;;  %v2546_v63 = vld [vmem:[%s3255_s0 + $0xa8] ss:$16 sps:$4 sm:$0xff]   ;;  %v2547_v0 = vld [vmem:[%s3254_s1 + $0x350] sm:$0xff]  }
  0x3a   :  { %2279 = vmatprep.subr.bf16.mxu1 %v2476_v1  ;;  %v2548_v1 = vld [vmem:[%s3254_s1 + $0x3d0] sm:$0xff]  }
  0x3c   :  { %2252 = vmatpush3.bf16.msra.mxu0 %v2477_v2  ;;  %v2549_v2 = vld [vmem:[%s3254_s1 + $0x310] sm:$0xff]  }
  0x3d   :  { %2280 = vmatpush3.bf16.msra.mxu1 %v2478_v3  ;;  %2253 = vmatprep.subr.bf16.mxu0 %v2479_v4  ;;  %v2550_v3 = vld [vmem:[%s3254_s1 + $0x390] sm:$0xff]   ;;  %v2551_v4 = vld [vmem:[%s3254_s1 + $0x358] sm:$0xff]  }
  0x3e   :  { %2281 = vmatprep.subr.bf16.mxu1 %v2480_v5  ;;  %v2552_v5 = vld [vmem:[%s3254_s1 + $0x3d8] sm:$0xff]  }
  0x40   :  { %2254 = vmatpush3.bf16.msra.mxu0 %v2481_v6  ;;  %v2553_v6 = vld [vmem:[%s3254_s1 + $0x318] sm:$0xff]  }
  0x41   :  { %2282 = vmatpush3.bf16.msra.mxu1 %v2482_v7  ;;  %2295 = vmatprep.subr.bf16.mxu0 %v2489_v12  ;;  %v2554_v7 = vld [vmem:[%s3254_s1 + $0x398] sm:$0xff]   ;;  %v2559_v12 = vld [vmem:[%s3254_s1 + $0x368] sm:$0xff]  }
  0x42   :  { %2323 = vmatprep.subr.bf16.mxu1 %v2490_v13  ;;  %v2560_v13 = vld [vmem:[%s3254_s1 + $0x3e8] sm:$0xff]  }
  0x43   :  { %762 = vmatmul.mubr.bf16.vlgmr.msra.gmra.mrb[8].mxu0 %v2483_v8  ;;  %v2555_v8 = vld [vmem:[%s3254_s1 + $0x360] sm:$0xff]  }
  0x44   :  { %811 = vmatmul.mubr.bf16.vlgmr.msra.gmra.mrb[8].mxu1 %v2486_v10  ;;  %2296 = vmatpush3.bf16.msra.mxu0 %v2491_v14  ;;  %v2557_v10 = vld [vmem:[%s3254_s1 + $0x320] sm:$0xff]   ;;  %v2561_v14 = vld [vmem:[%s3254_s1 + $0x328] sm:$0xff]  }
  0x45   :  { %2324 = vmatpush3.bf16.msra.mxu1 %v2492_v15  ;;  %2297 = vmatprep.subr.bf16.mxu0 %v2493_v16  ;;  %v2562_v15 = vld [vmem:[%s3254_s1 + $0x3a8] sm:$0xff]   ;;  %v2563_v16 = vld [vmem:[%s3254_s1 + $0x370] sm:$0xff]  }
  0x46   :  { %2325 = vmatprep.subr.bf16.mxu1 %v2494_v17  ;;  %769 = vmatprep.mubr.bf16.mxu0 %v2497_v20  ;;  %v2564_v17 = vld [vmem:[%s3254_s1 + $0x3f0] sm:$0xff]   ;;  %v2567_v20 = vld [vmem:[%s3254_s1 + $0x378] sm:$0xff]  }
  0x47   :  { %818 = vmatprep.mubr.bf16.mxu1 %v2499_v21  ;;  %v2568_v21 = vld [vmem:[%s3254_s1 + $0x3f8] sm:$0xff]  }
  0x48   :  { %2298 = vmatpush3.bf16.msra.mxu0 %v2495_v18  ;;  %v2565_v18 = vld [vmem:[%s3254_s1 + $0x330] sm:$0xff]  }
  0x49   :  { %2326 = vmatpush3.bf16.msra.mxu1 %v2496_v19  ;;  %2299 = vmatprep.subr.bf16.mxu0 %v2503_v24  ;;  %v2566_v19 = vld [vmem:[%s3254_s1 + $0x3b0] sm:$0xff]  }
  0x4a   :  { %2327 = vmatprep.subr.bf16.mxu1 %v2504_v25  ;;  %v2571_v24 = vld [vmem:[%s3255_s0 + $0xc0] ss:$16 sps:$4 sm:$0xff]   ;;  %v2573_v25 = vld [vmem:[%s3255_s0 + $0xc4] ss:$16 sps:$4 sm:$0xff]  }
  0x4b   :  { %770 = vmatmul.mubr.bf16.gmra.mrb[12].mxu0 %v2501_v22  ;;  %v2569_v22 = vld [vmem:[%s3254_s1 + $0x338] sm:$0xff]  }
  0x4c   :  { %819 = vmatmul.mubr.bf16.gmra.mrb[12].mxu1 %v2502_v23  ;;  %2300 = vmatpush3.bf16.msra.mxu0 %v2505_v26  ;;  %v2570_v23 = vld [vmem:[%s3254_s1 + $0x3b8] sm:$0xff]  }
  0x4d   :  { %2328 = vmatpush3.bf16.msra.mxu1 %v2506_v27  ;;  %2301 = vmatprep.subr.bf16.mxu0 %v2507_v28  ;;  %v2574_v26 = vld [vmem:[%s3255_s0 + $0xc8] ss:$16 sps:$4 sm:$0xff]   ;;  %v2576_v27 = vld [vmem:[%s3255_s0 + $0xcc] ss:$16 sps:$4 sm:$0xff]   ;;  %v2577_v28 = vld [vmem:[%s3255_s0 + $0xe4] ss:$16 sps:$4 sm:$0xff]  }
  0x4e   :  { %2329 = vmatprep.subr.bf16.mxu1 %v2508_v29  ;;  %1165 = vmatprep.mubr.bf16.mxu0 %v2529_v49  ;;  %v2579_v29 = vld [vmem:[%s3255_s0 + $0xec] ss:$16 sps:$4 sm:$0xff]  }
  0x4f   :  { %1214 = vmatprep.mubr.bf16.mxu1 %v2532_v51 }
  0x50   :  { %2302 = vmatpush3.bf16.msra.mxu0 %v2509_v30  ;;  %v2581_v30 = vld [vmem:[%s3255_s0 + $0xe0] ss:$16 sps:$4 sm:$0xff]  }
  0x51   :  { %2330 = vmatpush3.bf16.msra.mxu1 %v2510_v31  ;;  %2303 = vmatprep.subr.bf16.mxu0 %v2511_v32  ;;  %v2582_v31 = vld [vmem:[%s3255_s0 + $0xe8] ss:$16 sps:$4 sm:$0xff]  }
  0x52   :  { %2331 = vmatprep.subr.bf16.mxu1 %v2512_v33 }
  0x54   :  { %2304 = vmatpush3.bf16.msra.mxu0 %v2513_v34 }
  0x55   :  { %2332 = vmatpush3.bf16.msra.mxu1 %v2514_v35  ;;  %2305 = vmatprep.subr.bf16.mxu0 %v2515_v36 }
  0x56   :  { %2333 = vmatprep.subr.bf16.mxu1 %v2516_v37 }
  0x58   :  { %2306 = vmatpush3.bf16.msra.mxu0 %v2517_v38 }
  0x59   :  { %2334 = vmatpush3.bf16.msra.mxu1 %v2518_v39  ;;  %2307 = vmatprep.subr.bf16.mxu0 %v2519_v40 }
  0x5a   :  { %2335 = vmatprep.subr.bf16.mxu1 %v2520_v41 }
  0x5c   :  { %2308 = vmatpush3.bf16.msra.mxu0 %v2521_v42 }
  0x5d   :  { %2336 = vmatpush3.bf16.msra.mxu1 %v2522_v43  ;;  %2309 = vmatprep.subr.bf16.mxu0 %v2523_v44 }
  0x5e   :  { %2337 = vmatprep.subr.bf16.mxu1 %v2524_v45 }
  0x60   :  { %2310 = vmatpush3.bf16.msra.mxu0 %v2525_v46 }
  0x61   :  { %2338 = vmatpush3.bf16.msra.mxu1 %v2526_v47  ;;  %2351 = vmatprep.subr.bf16.mxu0 %v2533_v52 }
  0x62   :  { %2379 = vmatprep.subr.bf16.mxu1 %v2534_v53 }
  0x63   :  { %1166 = vmatmul.mubr.bf16.vlgmr.msra.gmra.mrb[16].mxu0 %v2527_v48 }
  0x64   :  { %1215 = vmatmul.mubr.bf16.vlgmr.msra.gmra.mrb[16].mxu1 %v2530_v50  ;;  %2352 = vmatpush3.bf16.msra.mxu0 %v2535_v54 }
  0x65   :  { %2380 = vmatpush3.bf16.msra.mxu1 %v2536_v55  ;;  %2353 = vmatprep.subr.bf16.mxu0 %v2537_v56 }
  0x66   :  { %2381 = vmatprep.subr.bf16.mxu1 %v2538_v57  ;;  %1173 = vmatprep.mubr.bf16.mxu0 %v2541_v60  ;;  %v3098_v60 = vld [vmem:[%s3256_s2] ss:$0 sm:$0xff] }
  0x67   :  { %1222 = vmatprep.mubr.bf16.mxu1 %v2543_v61 }
  0x68   :  { %2354 = vmatpush3.bf16.msra.mxu0 %v2539_v58 }
  0x69   :  { %2382 = vmatpush3.bf16.msra.mxu1 %v2540_v59  ;;  %2355 = vmatprep.subr.bf16.mxu0 %v2547_v0 }
  0x6a   :  { %2383 = vmatprep.subr.bf16.mxu1 %v2548_v1 }
  0x6b   :  { %1174 = vmatmul.mubr.bf16.gmra.mrb[20].mxu0 %v2545_v62 }
  0x6c   :  { %1223 = vmatmul.mubr.bf16.gmra.mrb[20].mxu1 %v2546_v63  ;;  %2356 = vmatpush3.bf16.msra.mxu0 %v2549_v2 }
  0x6d   :  { %2384 = vmatpush3.bf16.msra.mxu1 %v2550_v3  ;;  %2357 = vmatprep.subr.bf16.mxu0 %v2551_v4 }
  0x6e   :  { %2385 = vmatprep.subr.bf16.mxu1 %v2552_v5  ;;  %1569 = vmatprep.mubr.bf16.mxu0 %v2573_v25 }
  0x6f   :  { %1618 = vmatprep.mubr.bf16.mxu1 %v2576_v27 }
  0x70   :  { %2358 = vmatpush3.bf16.msra.mxu0 %v2553_v6 }
  0x71   :  { %2386 = vmatpush3.bf16.msra.mxu1 %v2554_v7  ;;  %2359 = vmatprep.subr.bf16.mxu0 %v2555_v8 }
  0x72   :  { %2387 = vmatprep.subr.bf16.mxu1 %v2556_v9 }
  0x74   :  { %2360 = vmatpush3.bf16.msra.mxu0 %v2557_v10 }
  0x75   :  { %2388 = vmatpush3.bf16.msra.mxu1 %v2558_v11  ;;  %2361 = vmatprep.subr.bf16.mxu0 %v2559_v12 }
  0x76   :  { %2389 = vmatprep.subr.bf16.mxu1 %v2560_v13 }
  0x78   :  { %2362 = vmatpush3.bf16.msra.mxu0 %v2561_v14 }
  0x79   :  { %2390 = vmatpush3.bf16.msra.mxu1 %v2562_v15  ;;  %2363 = vmatprep.subr.bf16.mxu0 %v2563_v16 }
  0x7a   :  { %2391 = vmatprep.subr.bf16.mxu1 %v2564_v17 }
  0x7c   :  { %2364 = vmatpush3.bf16.msra.mxu0 %v2565_v18 }
  0x7d   :  { %2392 = vmatpush3.bf16.msra.mxu1 %v2566_v19  ;;  %2365 = vmatprep.subr.bf16.mxu0 %v2567_v20 }
  0x7e   :  { %2393 = vmatprep.subr.bf16.mxu1 %v2568_v21 }
  0x80   :  { %2366 = vmatpush3.bf16.msra.mxu0 %v2569_v22 }
  0x81   :  { %2394 = vmatpush3.bf16.msra.mxu1 %v2570_v23 }
  0x83   :  { %1570 = vmatmul.mubr.bf16.vlgmr.msra.gmra.mrb[24].mxu0 %v2571_v24 }
  0x84   :  { %1619 = vmatmul.mubr.bf16.vlgmr.msra.gmra.mrb[24].mxu1 %v2574_v26  ;;  %1577 = vmatprep.mubr.bf16.mxu0 %v2577_v28 }
  0x85   :  { %1626 = vmatprep.mubr.bf16.mxu1 %v2579_v29 }
  0x8b   :  { %1578 = vmatmul.mubr.bf16.gmra.mrb[28].mxu0 %v2581_v30 }
  0x8c   :  { %1627 = vmatmul.mubr.bf16.gmra.mrb[28].mxu1 %v2582_v31 }
  0xf6   :  { %v2199_v32 = vpop.f32.mrb[0].mxu0 }
  0xf7   :  { %v2227_v33 = vpop.f32.mrb[0].mxu1  ;;  %v2200_v34 = vpop.f32.mrb[1].mxu0 }
  0xf8   :  { %v2201_v35 = vadd.f32 %v2200_v34, %v2199_v32  ;;  %v2228_v36 = vpop.f32.mrb[1].mxu1  ;;  %v2202_v37 = vpop.f32.mrb[2].mxu0 }
  0xf9   :  { %v2229_v38 = vadd.f32 %v2228_v36, %v2227_v33  ;;  %v2230_v39 = vpop.f32.mrb[2].mxu1  ;;  %v2203_v40 = vpop.f32.mrb[3].mxu0 }
  0xfa   :  { %v2204_v41 = vadd.f32 %v2203_v40, %v2202_v37  ;;  %v2231_v42 = vpop.f32.mrb[3].mxu1 }
  0xfb   :  { %v409_v43 = vadd.f32 %v2229_v38, %v2201_v35  ;;  %v2232_v44 = vadd.f32 %v2231_v42, %v2230_v39 }
  0xfd   :  { %v412_v45 = vadd.f32 %v2232_v44, %v2204_v41  ;;  %v3104_v62 = vadd.f32 %v3098_v60, %v409_v43 }
  0xfe   :  { %v2205_v46 = vpop.f32.mrb[4].mxu0 }
  0xff   :  { %v2233_v47 = vpop.f32.mrb[4].mxu1  ;;  %v2206_v48 = vpop.f32.mrb[5].mxu0  ;;  %v3101_v61 = vadd.f32 %v3098_v60, %v412_v45  ;;  %v1679_v2 = vmul.f32 %v3104_v62, %v3104_v62 }
 0x100   :  { %v2207_v49 = vadd.f32 %v2206_v48, %v2205_v46  ;;  %v2234_v50 = vpop.f32.mrb[5].mxu1  ;;  %v2208_v51 = vpop.f32.mrb[6].mxu0 }
 0x101   :  { %v2235_v52 = vadd.f32 %v2234_v50, %v2233_v47  ;;  %v2236_v53 = vpop.f32.mrb[6].mxu1  ;;  %v2209_v54 = vpop.f32.mrb[7].mxu0  ;;  %v1680_v0 = vmul.f32 %v3101_v61, %v3101_v61  ;;  %v1658_v3 = vadd.f32 %v3101_v61, %v3104_v62 }
 0x102   :  { %v2210_v55 = vadd.f32 %v2209_v54, %v2208_v51  ;;  %v2237_v56 = vpop.f32.mrb[7].mxu1 }
 0x103   :  { %v417_v57 = vadd.f32 %v2235_v52, %v2207_v49  ;;  %v2238_v58 = vadd.f32 %v2237_v56, %v2236_v53  ;;  %v1695_v11 = vadd.f32 %v1680_v0, %v1679_v2 }
 0x105   :  { %v420_v59 = vadd.f32 %v2238_v58, %v2210_v55  ;;  %v3107_v63 = vadd.f32 %v3098_v60, %v417_v57 }
 0x107   :  { %v1681_v4 = vmul.f32 %v3107_v63, %v3107_v63  ;;  %v3118_v5 = vadd.f32 %v3098_v60, %v420_v59  ;;  %v1659_v12 = vadd.f32 %v1658_v3, %v3107_v63 }
 0x109   :  { %v1696_v18 = vadd.f32 %v1695_v11, %v1681_v4  ;;  %v1682_v19 = vmul.f32 %v3118_v5, %v3118_v5  ;;  %v1660_v22 = vadd.f32 %v1659_v12, %v3118_v5 }
 0x10b   :  { %v1697_v25 = vadd.f32 %v1696_v18, %v1682_v19 }
 0x116   :  { %v2255_v1 = vpop.f32.mrb[8].mxu0 }
 0x117   :  { %v2283_v6 = vpop.f32.mrb[8].mxu1  ;;  %v2256_v7 = vpop.f32.mrb[9].mxu0 }
 0x118   :  { %v2257_v8 = vadd.f32 %v2256_v7, %v2255_v1  ;;  %v2284_v9 = vpop.f32.mrb[9].mxu1  ;;  %v2258_v10 = vpop.f32.mrb[10].mxu0 }
 0x119   :  { %v2285_v13 = vadd.f32 %v2284_v9, %v2283_v6  ;;  %v2286_v14 = vpop.f32.mrb[10].mxu1  ;;  %v2259_v15 = vpop.f32.mrb[11].mxu0 }
 0x11a   :  { %v2260_v16 = vadd.f32 %v2259_v15, %v2258_v10  ;;  %v2287_v17 = vpop.f32.mrb[11].mxu1 }
 0x11b   :  { %v813_v20 = vadd.f32 %v2285_v13, %v2257_v8  ;;  %v2288_v21 = vadd.f32 %v2287_v17, %v2286_v14 }
 0x11d   :  { %v3125_v23 = vadd.f32 %v3098_v60, %v813_v20  ;;  %v816_v24 = vadd.f32 %v2288_v21, %v2260_v16 }
 0x11e   :  { %v2261_v32 = vpop.f32.mrb[12].mxu0 }
 0x11f   :  { %v1661_v26 = vadd.f32 %v1660_v22, %v3125_v23  ;;  %v1683_v27 = vmul.f32 %v3125_v23, %v3125_v23  ;;  %v3131_v28 = vadd.f32 %v3098_v60, %v816_v24  ;;  %v2289_v33 = vpop.f32.mrb[12].mxu1  ;;  %v2262_v34 = vpop.f32.mrb[13].mxu0 }
 0x120   :  { %v2290_v35 = vpop.f32.mrb[13].mxu1  ;;  %v2263_v37 = vadd.f32 %v2262_v34, %v2261_v32  ;;  %v2264_v39 = vpop.f32.mrb[14].mxu0 }
 0x121   :  { %v1698_v29 = vadd.f32 %v1697_v25, %v1683_v27  ;;  %v1662_v30 = vadd.f32 %v1661_v26, %v3131_v28  ;;  %v1684_v31 = vmul.f32 %v3131_v28, %v3131_v28  ;;  %v2291_v38 = vadd.f32 %v2290_v35, %v2289_v33  ;;  %v2292_v40 = vpop.f32.mrb[14].mxu1  ;;  %v2265_v41 = vpop.f32.mrb[15].mxu0 }
 0x122   :  { %v2293_v42 = vpop.f32.mrb[15].mxu1  ;;  %v2266_v44 = vadd.f32 %v2265_v41, %v2264_v39 }
 0x123   :  { %v1699_v36 = vadd.f32 %v1698_v29, %v1684_v31  ;;  %v821_v43 = vadd.f32 %v2291_v38, %v2263_v37  ;;  %v2294_v45 = vadd.f32 %v2293_v42, %v2292_v40 }
 0x125   :  { %v3137_v46 = vadd.f32 %v3098_v60, %v821_v43  ;;  %v824_v47 = vadd.f32 %v2294_v45, %v2266_v44 }
 0x127   :  { %v1663_v48 = vadd.f32 %v1662_v30, %v3137_v46  ;;  %v1685_v49 = vmul.f32 %v3137_v46, %v3137_v46  ;;  %v3143_v50 = vadd.f32 %v3098_v60, %v824_v47 }
 0x129   :  { %v1700_v51 = vadd.f32 %v1699_v36, %v1685_v49  ;;  %v1664_v52 = vadd.f32 %v1663_v48, %v3143_v50  ;;  %v1686_v53 = vmul.f32 %v3143_v50, %v3143_v50 }
 0x12b   :  { %v1701_v54 = vadd.f32 %v1700_v51, %v1686_v53 }
 0x136   :  { %v2311_v55 = vpop.f32.mrb[16].mxu0 }
 0x137   :  { %v2312_v56 = vpop.f32.mrb[17].mxu0  ;;  %v2339_v57 = vpop.f32.mrb[16].mxu1 }
 0x138   :  { %v2313_v58 = vadd.f32 %v2312_v56, %v2311_v55  ;;  %v2314_v59 = vpop.f32.mrb[18].mxu0  ;;  %v2340_v0 = vpop.f32.mrb[17].mxu1 }
 0x139   :  { %v2315_v1 = vpop.f32.mrb[19].mxu0  ;;  %v2341_v2 = vadd.f32 %v2340_v0, %v2339_v57  ;;  %v2342_v3 = vpop.f32.mrb[18].mxu1 }
 0x13a   :  { %v2316_v4 = vadd.f32 %v2315_v1, %v2314_v59  ;;  %v2343_v6 = vpop.f32.mrb[19].mxu1 }
 0x13b   :  { %v1217_v7 = vadd.f32 %v2341_v2, %v2313_v58  ;;  %v2344_v8 = vadd.f32 %v2343_v6, %v2342_v3 }
 0x13d   :  { %v3149_v9 = vadd.f32 %v3098_v60, %v1217_v7  ;;  %v1220_v10 = vadd.f32 %v2344_v8, %v2316_v4 }
 0x13e   :  { %v2317_v14 = vpop.f32.mrb[20].mxu0 }
 0x13f   :  { %v1665_v11 = vadd.f32 %v1664_v52, %v3149_v9  ;;  %v1687_v12 = vmul.f32 %v3149_v9, %v3149_v9  ;;  %v3155_v13 = vadd.f32 %v3098_v60, %v1220_v10  ;;  %v2345_v18 = vpop.f32.mrb[20].mxu1  ;;  %v2318_v19 = vpop.f32.mrb[21].mxu0 }
 0x140   :  { %v2319_v20 = vadd.f32 %v2318_v19, %v2317_v14  ;;  %v2346_v21 = vpop.f32.mrb[21].mxu1  ;;  %v2320_v22 = vpop.f32.mrb[22].mxu0 }
 0x141   :  { %v1702_v15 = vadd.f32 %v1701_v54, %v1687_v12  ;;  %v1666_v16 = vadd.f32 %v1665_v11, %v3155_v13  ;;  %v1688_v17 = vmul.f32 %v3155_v13, %v3155_v13  ;;  %v2347_v25 = vadd.f32 %v2346_v21, %v2345_v18  ;;  %v2348_v26 = vpop.f32.mrb[22].mxu1  ;;  %v2321_v27 = vpop.f32.mrb[23].mxu0 }
 0x142   :  { %v2322_v29 = vadd.f32 %v2321_v27, %v2320_v22  ;;  %v2349_v30 = vpop.f32.mrb[23].mxu1 }
 0x143   :  { %v1703_v24 = vadd.f32 %v1702_v15, %v1688_v17  ;;  %v1225_v31 = vadd.f32 %v2347_v25, %v2319_v20  ;;  %v2350_v32 = vadd.f32 %v2349_v30, %v2348_v26 }
 0x145   :  { %v3161_v33 = vadd.f32 %v3098_v60, %v1225_v31  ;;  %v1228_v34 = vadd.f32 %v2350_v32, %v2322_v29 }
 0x147   :  { %v1667_v35 = vadd.f32 %v1666_v16, %v3161_v33  ;;  %v1689_v36 = vmul.f32 %v3161_v33, %v3161_v33  ;;  %v3167_v37 = vadd.f32 %v3098_v60, %v1228_v34 }
 0x149   :  { %v1704_v38 = vadd.f32 %v1703_v24, %v1689_v36  ;;  %v1668_v39 = vadd.f32 %v1667_v35, %v3167_v37  ;;  %v1690_v40 = vmul.f32 %v3167_v37, %v3167_v37 }
 0x14b   :  { %v1705_v41 = vadd.f32 %v1704_v38, %v1690_v40 }
 0x156   :  { %v2367_v42 = vpop.f32.mrb[24].mxu0 }
 0x157   :  { %v2395_v43 = vpop.f32.mrb[24].mxu1  ;;  %v2368_v44 = vpop.f32.mrb[25].mxu0 }
 0x158   :  { %v2369_v45 = vadd.f32 %v2368_v44, %v2367_v42  ;;  %v2396_v47 = vpop.f32.mrb[25].mxu1  ;;  %v2370_v48 = vpop.f32.mrb[26].mxu0 }
 0x159   :  { %v2397_v49 = vadd.f32 %v2396_v47, %v2395_v43  ;;  %v2398_v51 = vpop.f32.mrb[26].mxu1  ;;  %v2371_v52 = vpop.f32.mrb[27].mxu0 }
 0x15a   :  { %v2372_v53 = vadd.f32 %v2371_v52, %v2370_v48  ;;  %v2399_v54 = vpop.f32.mrb[27].mxu1 }
 0x15b   :  { %v1621_v55 = vadd.f32 %v2397_v49, %v2369_v45  ;;  %v2400_v56 = vadd.f32 %v2399_v54, %v2398_v51  ;;  %v1728_v54 = vlaneseq }
 0x15d   :  { %v3173_v57 = vadd.f32 %v3098_v60, %v1621_v55  ;;  %v1624_v58 = vadd.f32 %v2400_v56, %v2372_v53  ;;  %v1729_v55 = vshrl.u32 %v1728_v54, 7  ;;  %v1723_v56 = vld [vmem:[%s3257_s3] sm:$0x1] }
 0x15e   :  { %v2373_v59 = vpop.f32.mrb[28].mxu0 }
 0x15f   :  { %v1669_v0 = vadd.f32 %v1668_v39, %v3173_v57  ;;  %v1691_v1 = vmul.f32 %v3173_v57, %v3173_v57  ;;  %v3179_v2 = vadd.f32 %v3098_v60, %v1624_v58  ;;  %v2401_v3 = vpop.f32.mrb[28].mxu1  ;;  %v2374_v4 = vpop.f32.mrb[29].mxu0  ;;  %v1730_v58 = vsub.s32 0, %v1729_v55 }
 0x160   :  { %v2375_v6 = vadd.f32 %v2374_v4, %v2373_v59  ;;  %v2402_v7 = vpop.f32.mrb[29].mxu1  ;;  %v2376_v8 = vpop.f32.mrb[30].mxu0 }
 0x161   :  { %v1706_v10 = vadd.f32 %v1705_v41, %v1691_v1  ;;  %v1670_v11 = vadd.f32 %v1669_v0, %v3179_v2  ;;  %v1692_v12 = vmul.f32 %v3179_v2, %v3179_v2  ;;  %v2403_v14 = vadd.f32 %v2402_v7, %v2401_v3  ;;  %v2404_v15 = vpop.f32.mrb[30].mxu1  ;;  %v2377_v16 = vpop.f32.mrb[31].mxu0  ;;  %v1725_v1 = vld [vmem:[%s3258_s4] sm:$0x1] }
 0x162   :  { %v2378_v17 = vadd.f32 %v2377_v16, %v2376_v8  ;;  %v2405_v18 = vpop.f32.mrb[31].mxu1 }
 0x163   :  { %v1707_v19 = vadd.f32 %v1706_v10, %v1692_v12  ;;  %v1629_v20 = vadd.f32 %v2403_v14, %v2375_v6  ;;  %v2406_v21 = vadd.f32 %v2405_v18, %v2404_v15 }
 0x165   :  { %v1656_v22 = vadd.f32 %v3098_v60, %v1629_v20  ;;  %v1632_v24 = vadd.f32 %v2406_v21, %v2378_v17 }
 0x167   :  { %v1671_v25 = vadd.f32 %v1670_v11, %v1656_v22  ;;  %v1693_v26 = vmul.f32 %v1656_v22, %v1656_v22  ;;  %v1657_v27 = vadd.f32 %v3098_v60, %v1632_v24 }
 0x169   :  { %v1708_v29 = vadd.f32 %v1707_v19, %v1693_v26  ;;  %v1672_v30 = vadd.f32 %v1671_v25, %v1657_v27  ;;  %v1694_v31 = vmul.f32 %v1657_v27, %v1657_v27 }
 0x16b   :  { %v1673_v32 = vrot.slane %v1672_v30, 4  ;;  %v1709_v34 = vadd.f32 %v1708_v29, %v1694_v31 }
 0x16d   :  { %v1674_v35 = vadd.f32 %v1673_v32, %v1672_v30  ;;  %v1710_v36 = vrot.slane %v1709_v34, 4 }
 0x16f   :  { %v1675_v38 = vrot.slane %v1674_v35, 2  ;;  %v1711_v39 = vadd.f32 %v1710_v36, %v1709_v34 }
 0x171   :  { %v1676_v40 = vadd.f32 %v1675_v38, %v1674_v35  ;;  %v1712_v41 = vrot.slane %v1711_v39, 2 }
 0x173   :  { %v1677_v42 = vrot.slane %v1676_v40, 1  ;;  %v1713_v43 = vadd.f32 %v1712_v41, %v1711_v39 }
 0x175   :  { %v1678_v44 = vadd.f32 %v1677_v42, %v1676_v40  ;;  %v1714_v45 = vrot.slane %v1713_v43, 1 }
 0x177   :  { %v1715_v47 = vadd.f32 %v1714_v45, %v1713_v43  ;;  %v1716_v48 = vmul.f32 0.0078125, %v1678_v44 }
 0x179   :  { %v1717_v49 = vmul.f32 0.0078125, %v1715_v47  ;;  %v1718_v51 = vmul.f32 %v1716_v48, %v1716_v48 }
 0x17b   :  { %v1719_v60 = vsub.f32 %v1717_v49, %v1718_v51 }
 0x17d   :  { %v1720_v52 = vmax.f32 %v1719_v60, 0.0 }
 0x17f   :  { %v1721_v53 = vadd.f32 1e-05, %v1720_v52 }
 0x181   :  { %2583 = vrsqrt.f32 %v1721_v53 }
 0x18b   :  { %v2584_v59 = vpop.eup %2583 }
 0x18c   :  { %v1724_v0 = vmul.f32 %v2584_v59, %v1723_v56 }
 0x18e   :  { %v1726_v3 = vmul.f32 %v1724_v0, %v1716_v48  ;;  %v1731_v4 = vrot.slane %v1724_v0, %v1730_v58 }
 0x190   :  { %v1727_v6 = vsub.f32 %v1725_v1, %v1726_v3  ;;  %v1732_v7 = vmul.f32 %v1731_v4, %v3104_v62  ;;  %v1733_v8 = vmul.f32 %v1731_v4, %v3101_v61  ;;  %v1736_v10 = vmul.f32 %v1731_v4, %v3125_v23 }
 0x191   :  { %v1737_v11 = vmul.f32 %v1731_v4, %v3131_v28  ;;  %v1738_v12 = vmul.f32 %v1731_v4, %v3137_v46  ;;  %v1739_v14 = vmul.f32 %v1731_v4, %v3143_v50  ;;  %v1740_v15 = vmul.f32 %v1731_v4, %v3149_v9 }
 0x192   :  { %v1741_v16 = vmul.f32 %v1731_v4, %v3155_v13  ;;  %v1742_v17 = vmul.f32 %v1731_v4, %v3161_v33  ;;  %v1743_v18 = vmul.f32 %v1731_v4, %v3167_v37  ;;  %v1744_v62 = vmul.f32 %v1731_v4, %v3173_v57 }
 0x193   :  { %v1745_v61 = vmul.f32 %v1731_v4, %v3179_v2  ;;  %v1746_v19 = vmul.f32 %v1731_v4, %v1656_v22  ;;  %v1734_v23 = vmul.f32 %v1731_v4, %v3107_v63  ;;  %v1735_v28 = vmul.f32 %v1731_v4, %v3118_v5 }
 0x194   :  { %v1747_v46 = vmul.f32 %v1731_v4, %v1657_v27  ;;  %v1752_v20 = vrot.slane %v1727_v6, %v1730_v58 }
 0x196   :  { %v1754_v50 = vadd.f32 %v1752_v20, %v1732_v7  ;;  %v1755_v21 = vadd.f32 %v1752_v20, %v1733_v8  ;;  %v1756_v9 = vadd.f32 %v1752_v20, %v1734_v23  ;;  %v1757_v24 = vadd.f32 %v1752_v20, %v1735_v28 }
 0x197   :  { %v1758_v13 = vadd.f32 %v1752_v20, %v1736_v10  ;;  %v1759_v25 = vadd.f32 %v1752_v20, %v1737_v11  ;;  %v1760_v33 = vadd.f32 %v1752_v20, %v1738_v12  ;;  %v1761_v26 = vadd.f32 %v1752_v20, %v1739_v14 }
 0x198   :  { %v1762_v37 = vadd.f32 %v1752_v20, %v1740_v15  ;;  %v1763_v29 = vadd.f32 %v1752_v20, %v1741_v16  ;;  %v1764_v57 = vadd.f32 %v1752_v20, %v1742_v17  ;;  %v1765_v30 = vadd.f32 %v1752_v20, %v1743_v18 }
 0x199   :  { %v1766_v2 = vadd.f32 %v1752_v20, %v1744_v62  ;;  %v1767_v22 = vadd.f32 %v1752_v20, %v1745_v61  ;;  %v1768_v31 = vadd.f32 %v1752_v20, %v1746_v19  ;;  %v1769_v63 = vadd.f32 %v1752_v20, %v1747_v46 }
 0x19a   :  { %v1770_v32 = vmax.f32 %v1754_v50, 0.0  ;;  %v1771_v5 = vmax.f32 %v1755_v21, 0.0  ;;  %v1772_v27 = vmax.f32 %v1756_v9, 0.0  ;;  %v1773_v34 = vmax.f32 %v1757_v24, 0.0 }
 0x19b   :  { %v1774_v35 = vmax.f32 %v1758_v13, 0.0  ;;  %v1775_v36 = vmax.f32 %v1759_v25, 0.0  ;;  %v1776_v38 = vmax.f32 %v1760_v33, 0.0  ;;  %v1777_v39 = vmax.f32 %v1761_v26, 0.0 }
 0x19c   :  { %v1778_v40 = vmax.f32 %v1762_v37, 0.0  ;;  %v1779_v41 = vmax.f32 %v1763_v29, 0.0  ;;  %v1780_v42 = vmax.f32 %v1764_v57, 0.0  ;;  %v1781_v43 = vmax.f32 %v1765_v30, 0.0  ;;  %1786 = vst [vmem:[%s3259_s5] sm:$0xff] %v1770_v32  ;;  %1787 = vst [vmem:[%s3259_s5 + $0x8] sm:$0xff] %v1771_v5 }
 0x19d   :  { %1788 = vst [vmem:[%s3259_s5 + $0x10] sm:$0xff] %v1772_v27  ;;  %1789 = vst [vmem:[%s3259_s5 + $0x18] sm:$0xff] %v1773_v34  ;;  %v1782_v44 = vmax.f32 %v1766_v2, 0.0  ;;  %v1783_v45 = vmax.f32 %v1767_v22, 0.0  ;;  %v1784_v47 = vmax.f32 %v1768_v31, 0.0  ;;  %v1785_v48 = vmax.f32 %v1769_v63, 0.0 }
 0x19e   :  { %1790 = vst [vmem:[%s3259_s5 + $0x20] sm:$0xff] %v1774_v35  ;;  %1791 = vst [vmem:[%s3259_s5 + $0x28] sm:$0xff] %v1775_v36 }
 0x19f   :  { %1792 = vst [vmem:[%s3259_s5 + $0x30] sm:$0xff] %v1776_v38  ;;  %1793 = vst [vmem:[%s3259_s5 + $0x38] sm:$0xff] %v1777_v39 }
 0x1a0   :  { %1794 = vst [vmem:[%s3259_s5 + $0x40] sm:$0xff] %v1778_v40  ;;  %1795 = vst [vmem:[%s3259_s5 + $0x48] sm:$0xff] %v1779_v41 }
 0x1a1   :  { %1796 = vst [vmem:[%s3259_s5 + $0x50] sm:$0xff] %v1780_v42  ;;  %1797 = vst [vmem:[%s3259_s5 + $0x58] sm:$0xff] %v1781_v43 }
 0x1a2   :  { %1798 = vst [vmem:[%s3259_s5 + $0x60] sm:$0xff] %v1782_v44  ;;  %1799 = vst [vmem:[%s3259_s5 + $0x68] sm:$0xff] %v1783_v45 }
 0x1a3   :  { %1800 = vst [vmem:[%s3259_s5 + $0x70] sm:$0xff] %v1784_v47  ;;  %1801 = vst [vmem:[%s3259_s5 + $0x78] sm:$0xff] %v1785_v48 }

// kernel: decoder_forward.6
= control target key start
LH: loop header
LB: loop body
LE: loop exit
PB: predicated region body
PF: predicated region fallthrough
CT: control target
= control target key end

     0   :  { %s4217_s1 = inlined_call_operand.vmem [shape: bf16[4,256,128], index: 1, kind: input, shape index: {}]   ;;  %s4218_s0 = inlined_call_operand.vmem [shape: bf16[4,128,256], index: 0, kind: input, shape index: {}]   ;;  %s4219_s2 = inlined_call_operand.vmem [shape: f32[1,128], index: 2, kind: input, shape index: {}]   ;;  %s4220_s3 = inlined_call_operand.vmem [shape: f32[1,128], index: 3, kind: input, shape index: {}]   ;;  %s4221_s4 = inlined_call_operand.vmem [shape: f32[1,128], index: 4, kind: input, shape index: {}]   ;;  %s4222_s5 = inlined_call_operand.vmem [shape: f32[512,128], index: 5, kind: output, shape index: {}]  }
   0x1   :  { %v2395_v0 = vld [vmem:[%s4217_s1 + $0x40] sm:$0xff]   ;;  %v2397_v2 = vld [vmem:[%s4217_s1 + $0x48] sm:$0xff]   ;;  %v2399_v4 = vld [vmem:[%s4217_s1 + $0x50] sm:$0xff]  }
   0x2   :  { %v2396_v1 = vld [vmem:[%s4217_s1] sm:$0xff]   ;;  %2139 = vmatprep.subr.bf16.mxu0 %v2395_v0  ;;  %v2398_v3 = vld [vmem:[%s4217_s1 + $0x8] sm:$0xff]   ;;  %v2400_v5 = vld [vmem:[%s4217_s1 + $0x10] sm:$0xff]  }
   0x3   :  { %2140 = vmatpush3.bf16.msra.mxu0 %v2396_v1  ;;  %v2401_v6 = vld [vmem:[%s4217_s1 + $0x58] sm:$0xff]   ;;  %v2403_v8 = vld [vmem:[%s4217_s1 + $0x60] sm:$0xff]   ;;  %v2405_v10 = vld [vmem:[%s4217_s1 + $0x68] sm:$0xff]  }
   0x4   :  { %2141 = vmatprep.subr.bf16.mxu0 %v2397_v2  ;;  %v2402_v7 = vld [vmem:[%s4217_s1 + $0x18] sm:$0xff]   ;;  %v2404_v9 = vld [vmem:[%s4217_s1 + $0x20] sm:$0xff]   ;;  %v2406_v12 = vld [vmem:[%s4217_s1 + $0x28] sm:$0xff]  }
   0x5   :  { %v2411_v11 = vld [vmem:[%s4217_s1 + $0xc0] sm:$0xff]   ;;  %v2407_v15 = vld [vmem:[%s4217_s1 + $0x70] sm:$0xff]   ;;  %v2409_v17 = vld [vmem:[%s4217_s1 + $0x78] sm:$0xff]  }
   0x6   :  { %2203 = vmatprep.subr.bf16.mxu1 %v2411_v11  ;;  %v2414_v13 = vld [vmem:[%s4218_s0 + $0x4] ss:$8 sps:$4 sm:$0xff]   ;;  %v2408_v16 = vld [vmem:[%s4217_s1 + $0x30] sm:$0xff]   ;;  %v2410_v22 = vld [vmem:[%s4217_s1 + $0x38] sm:$0xff]  }
   0x7   :  { %2142 = vmatpush3.bf16.msra.mxu0 %v2398_v3  ;;  %v2415_v14 = vld [vmem:[%s4217_s1 + $0x80] sm:$0xff]   ;;  %277 = vmatprep.mubr.bf16.mxu0 %v2414_v13  ;;  %v2418_v18 = vld [vmem:[%s4217_s1 + $0xc8] sm:$0xff]   ;;  %v2420_v20 = vld [vmem:[%s4217_s1 + $0xd0] sm:$0xff]  }
   0x8   :  { %2143 = vmatprep.subr.bf16.mxu0 %v2399_v4  ;;  %2204 = vmatpush3.bf16.msra.mxu1 %v2415_v14  ;;  %v2419_v19 = vld [vmem:[%s4217_s1 + $0x88] sm:$0xff]   ;;  %v2423_v21 = vld [vmem:[%s4217_s1 + $0x90] sm:$0xff]   ;;  %v2416_v24 = vld [vmem:[%s4217_s1 + $0x140] sm:$0xff]  }
   0x9   :  { %2205 = vmatprep.subr.bf16.mxu1 %v2418_v18  ;;  %v2412_v23 = vld [vmem:[%s4218_s0] ss:$8 sps:$4 sm:$0xff]   ;;  %v2421_v26 = vld [vmem:[%s4218_s0 + $0x14] ss:$8 sps:$4 sm:$0xff]   ;;  %v2424_v34 = vld [vmem:[%s4218_s0 + $0x10] ss:$8 sps:$4 sm:$0xff]  }
   0xa   :  { %v2417_v25 = vld [vmem:[%s4217_s1 + $0x100] sm:$0xff]   ;;  %v2427_v27 = vld [vmem:[%s4217_s1 + $0xd8] sm:$0xff]   ;;  %v2425_v30 = vld [vmem:[%s4217_s1 + $0x148] sm:$0xff]  }
   0xb   :  { %2144 = vmatpush3.bf16.msra.mxu0 %v2400_v5  ;;  %v2428_v28 = vld [vmem:[%s4217_s1 + $0x98] sm:$0xff]   ;;  %v2429_v29 = vld [vmem:[%s4217_s1 + $0xe0] sm:$0xff]   ;;  %v2426_v32 = vld [vmem:[%s4217_s1 + $0x108] sm:$0xff]  }
   0xc   :  { %2145 = vmatprep.subr.bf16.mxu0 %v2401_v6  ;;  %2206 = vmatpush3.bf16.msra.mxu1 %v2419_v19  ;;  %v2432_v31 = vld [vmem:[%s4217_s1 + $0xa0] sm:$0xff]   ;;  %v2434_v33 = vld [vmem:[%s4217_s1 + $0x150] sm:$0xff]   ;;  %v2436_v35 = vld [vmem:[%s4217_s1 + $0xe8] sm:$0xff]  }
   0xd   :  { %2207 = vmatprep.subr.bf16.mxu1 %v2420_v20  ;;  %v2430_v36 = vld [vmem:[%s4218_s0 + $0x24] ss:$8 sps:$4 sm:$0xff]   ;;  %v2438_v38 = vld [vmem:[%s4217_s1 + $0xf0] sm:$0xff]   ;;  %v2443_v41 = vld [vmem:[%s4217_s1 + $0x158] sm:$0xff]  }
   0xe   :  { %v2437_v37 = vld [vmem:[%s4217_s1 + $0xa8] sm:$0xff]   ;;  %v2435_v39 = vld [vmem:[%s4217_s1 + $0x110] sm:$0xff]   ;;  %v2444_v42 = vld [vmem:[%s4217_s1 + $0x118] sm:$0xff]  }
   0xf   :  { %2146 = vmatpush3.bf16.msra.mxu0 %v2402_v7  ;;  %v2441_v40 = vld [vmem:[%s4217_s1 + $0xb0] sm:$0xff]   ;;  %v2445_v43 = vld [vmem:[%s4217_s1 + $0xf8] sm:$0xff]   ;;  %v2433_v45 = vld [vmem:[%s4218_s0 + $0x20] ss:$8 sps:$4 sm:$0xff]  }
  0x10   :  { %2147 = vmatprep.subr.bf16.mxu0 %v2403_v8  ;;  %2208 = vmatpush3.bf16.msra.mxu1 %v2423_v21  ;;  %v2446_v44 = vld [vmem:[%s4217_s1 + $0xb8] sm:$0xff]   ;;  %v2449_v46 = vld [vmem:[%s4218_s0 + $0x84] ss:$8 sps:$4 sm:$0xff]   ;;  %v2447_v48 = vld [vmem:[%s4218_s0 + $0x80] ss:$8 sps:$4 sm:$0xff]  }
  0x11   :  { %2209 = vmatprep.subr.bf16.mxu1 %v2427_v27  ;;  %v2439_v47 = vld [vmem:[%s4218_s0 + $0x34] ss:$8 sps:$4 sm:$0xff]   ;;  %600 = vmatprep.mubr.bf16.mxu1 %v2449_v46  ;;  %v2453_v49 = vld [vmem:[%s4217_s1 + $0x160] sm:$0xff]   ;;  %v2442_v54 = vld [vmem:[%s4218_s0 + $0x30] ss:$8 sps:$4 sm:$0xff]  }
  0x12   :  { %v2454_v50 = vld [vmem:[%s4217_s1 + $0x1c0] sm:$0xff]   ;;  %v2457_v53 = vld [vmem:[%s4218_s0 + $0x94] ss:$8 sps:$4 sm:$0xff]   ;;  %v2459_v56 = vld [vmem:[%s4218_s0 + $0x90] ss:$8 sps:$4 sm:$0xff]  }
  0x13   :  { %2148 = vmatpush3.bf16.msra.mxu0 %v2404_v9  ;;  %v2455_v51 = vld [vmem:[%s4217_s1 + $0x120] sm:$0xff]   ;;  %v2463_v57 = vld [vmem:[%s4217_s1 + $0x168] sm:$0xff]   ;;  %v2460_v63 = vld [vmem:[%s4218_s0 + $0x54] ss:$8 sps:$4 sm:$0xff]  }
  0x14   :  { %2149 = vmatprep.subr.bf16.mxu0 %v2405_v10  ;;  %2210 = vmatpush3.bf16.msra.mxu1 %v2428_v28  ;;  %v2456_v52 = vld [vmem:[%s4217_s1 + $0x180] sm:$0xff]   ;;  %v2464_v58 = vld [vmem:[%s4217_s1 + $0x1c8] sm:$0xff]   ;;  %v2473_v1 = vld [vmem:[%s4217_s1 + $0x170] sm:$0xff]  }
  0x15   :  { %2211 = vmatprep.subr.bf16.mxu1 %v2429_v29  ;;  %v2450_v55 = vld [vmem:[%s4218_s0 + $0x44] ss:$8 sps:$4 sm:$0xff]   ;;  %v2452_v62 = vld [vmem:[%s4218_s0 + $0x40] ss:$8 sps:$4 sm:$0xff]   ;;  %v2474_v2 = vld [vmem:[%s4217_s1 + $0x1d0] sm:$0xff]  }
  0x16   :  { %v2465_v59 = vld [vmem:[%s4217_s1 + $0x128] sm:$0xff]   ;;  %v2475_v3 = vld [vmem:[%s4217_s1 + $0x130] sm:$0xff]   ;;  %v2483_v7 = vld [vmem:[%s4217_s1 + $0x178] sm:$0xff]  }
  0x17   :  { %2150 = vmatpush3.bf16.msra.mxu0 %v2406_v12  ;;  %v2466_v60 = vld [vmem:[%s4217_s1 + $0x188] sm:$0xff]   ;;  %v2476_v4 = vld [vmem:[%s4217_s1 + $0x190] sm:$0xff]   ;;  %v2484_v9 = vld [vmem:[%s4217_s1 + $0x1d8] sm:$0xff]  }
  0x18   :  { %2151 = vmatprep.subr.bf16.mxu0 %v2407_v15  ;;  %2212 = vmatpush3.bf16.msra.mxu1 %v2432_v31  ;;  %v2467_v61 = vld [vmem:[%s4218_s0 + $0xa4] ss:$8 sps:$4 sm:$0xff]   ;;  %v2469_v0 = vld [vmem:[%s4218_s0 + $0xa0] ss:$8 sps:$4 sm:$0xff]   ;;  %v2477_v5 = vld [vmem:[%s4218_s0 + $0xb4] ss:$8 sps:$4 sm:$0xff]  }
  0x19   :  { %2213 = vmatprep.subr.bf16.mxu1 %v2436_v35  ;;  %v2462_v6 = vld [vmem:[%s4218_s0 + $0x50] ss:$8 sps:$4 sm:$0xff]   ;;  %v2470_v8 = vld [vmem:[%s4218_s0 + $0x64] ss:$8 sps:$4 sm:$0xff]   ;;  %v2489_v18 = vld [vmem:[%s4218_s0 + $0xc0] ss:$8 sps:$4 sm:$0xff]  }
  0x1a   :  { %v2485_v10 = vld [vmem:[%s4217_s1 + $0x138] sm:$0xff]   ;;  %v2487_v13 = vld [vmem:[%s4218_s0 + $0xc4] ss:$8 sps:$4 sm:$0xff]   ;;  %v2524_v46 = vld [vmem:[%s4218_s0 + $0x140] ss:$8 sps:$4 sm:$0xff]  }
  0x1b   :  { %2152 = vmatpush3.bf16.msra.mxu0 %v2408_v16  ;;  %v2486_v11 = vld [vmem:[%s4217_s1 + $0x198] sm:$0xff]   ;;  %v2493_v14 = vld [vmem:[%s4217_s1 + $0x1e0] sm:$0xff]   ;;  %v2501_v20 = vld [vmem:[%s4217_s1 + $0x1e8] sm:$0xff]  }
  0x1c   :  { %2153 = vmatprep.subr.bf16.mxu0 %v2409_v17  ;;  %2214 = vmatpush3.bf16.msra.mxu1 %v2437_v37  ;;  %v2479_v12 = vld [vmem:[%s4218_s0 + $0xb0] ss:$8 sps:$4 sm:$0xff]   ;;  %v2494_v15 = vld [vmem:[%s4217_s1 + $0x1a0] sm:$0xff]   ;;  %v2480_v17 = vld [vmem:[%s4218_s0 + $0x74] ss:$8 sps:$4 sm:$0xff]  }
  0x1d   :  { %2215 = vmatprep.subr.bf16.mxu1 %v2438_v38  ;;  %v2472_v16 = vld [vmem:[%s4218_s0 + $0x60] ss:$8 sps:$4 sm:$0xff]   ;;  %v2495_v19 = vld [vmem:[%s4218_s0 + $0xd4] ss:$8 sps:$4 sm:$0xff]   ;;  %v2503_v27 = vld [vmem:[%s4218_s0 + $0xe4] ss:$8 sps:$4 sm:$0xff]  }
  0x1e   :  { %v2502_v21 = vld [vmem:[%s4217_s1 + $0x1a8] sm:$0xff]   ;;  %v2517_v28 = vld [vmem:[%s4217_s1 + $0x1f8] sm:$0xff]  }
  0x1f   :  { %2154 = vmatpush3.bf16.msra.mxu0 %v2410_v22  ;;  %v2509_v22 = vld [vmem:[%s4217_s1 + $0x1f0] sm:$0xff]   ;;  %v2518_v29 = vld [vmem:[%s4217_s1 + $0x1b8] sm:$0xff]   ;;  %v2506_v35 = vld [vmem:[%s4218_s0 + $0x124] ss:$8 sps:$4 sm:$0xff]  }
  0x20   :  { %2267 = vmatprep.subr.bf16.mxu0 %v2416_v24  ;;  %2216 = vmatpush3.bf16.msra.mxu1 %v2441_v40  ;;  %v2482_v24 = vld [vmem:[%s4218_s0 + $0x70] ss:$8 sps:$4 sm:$0xff]   ;;  %v2498_v31 = vld [vmem:[%s4218_s0 + $0x114] ss:$8 sps:$4 sm:$0xff]   ;;  %v2521_v37 = vld [vmem:[%s4218_s0 + $0x184] ss:$8 sps:$4 sm:$0xff]  }
  0x21   :  { %2217 = vmatprep.subr.bf16.mxu1 %v2445_v43  ;;  %v2508_v38 = vld [vmem:[%s4218_s0 + $0x120] ss:$8 sps:$4 sm:$0xff]   ;;  %v2522_v43 = vld [vmem:[%s4218_s0 + $0x144] ss:$8 sps:$4 sm:$0xff]  }
  0x22   :  { %278 = vmatmul.mubr.bf16.vlgmr.msra.gmra.mrb[0].mxu0 %v2412_v23  ;;  %v2510_v23 = vld [vmem:[%s4217_s1 + $0x1b0] sm:$0xff]   ;;  %v2519_v40 = vld [vmem:[%s4218_s0 + $0x180] ss:$8 sps:$4 sm:$0xff]  }
  0x23   :  { %2268 = vmatpush3.bf16.msra.mxu0 %v2417_v25  ;;  %285 = vmatprep.mubr.bf16.mxu0 %v2421_v26  ;;  %v2492_v25 = vld [vmem:[%s4218_s0 + $0x104] ss:$8 sps:$4 sm:$0xff]   ;;  %v2497_v26 = vld [vmem:[%s4218_s0 + $0xd0] ss:$8 sps:$4 sm:$0xff]  }
  0x24   :  { %2269 = vmatprep.subr.bf16.mxu0 %v2425_v30  ;;  %2218 = vmatpush3.bf16.msra.mxu1 %v2446_v44  ;;  %v2490_v30 = vld [vmem:[%s4218_s0 + $0x100] ss:$8 sps:$4 sm:$0xff]   ;;  %v2527_v44 = vld [vmem:[%s4218_s0 + $0x190] ss:$8 sps:$4 sm:$0xff]  }
  0x25   :  { %2331 = vmatprep.subr.bf16.mxu1 %v2454_v50  ;;  %v2530_v50 = vld [vmem:[%s4218_s0 + $0x150] ss:$8 sps:$4 sm:$0xff]  }
  0x27   :  { %2270 = vmatpush3.bf16.msra.mxu0 %v2426_v32  ;;  %601 = vmatmul.mubr.bf16.vlgmr.msra.gmra.mrb[0].mxu1 %v2447_v48  ;;  %v2505_v32 = vld [vmem:[%s4218_s0 + $0xe0] ss:$8 sps:$4 sm:$0xff]  }
  0x28   :  { %2271 = vmatprep.subr.bf16.mxu0 %v2434_v33  ;;  %2332 = vmatpush3.bf16.msra.mxu1 %v2456_v52  ;;  %v2511_v33 = vld [vmem:[%s4218_s0 + $0xf4] ss:$8 sps:$4 sm:$0xff]   ;;  %v2533_v48 = vld [vmem:[%s4218_s0 + $0x1a0] ss:$8 sps:$4 sm:$0xff]   ;;  %v2539_v52 = vld [vmem:[%s4218_s0 + $0x1b0] ss:$8 sps:$4 sm:$0xff]  }
  0x29   :  { %608 = vmatprep.mubr.bf16.mxu1 %v2457_v53  ;;  %2333 = vmatprep.subr.bf16.mxu1 %v2464_v58  ;;  %v2543_v53 = vld [vmem:[%s4218_s0 + $0x1c4] ss:$8 sps:$4 sm:$0xff]   ;;  %v2542_v58 = vld [vmem:[%s4218_s0 + $0x170] ss:$8 sps:$4 sm:$0xff]  }
  0x2a   :  { %286 = vmatmul.mubr.bf16.gmra.mrb[4].mxu0 %v2424_v34  ;;  %v2500_v34 = vld [vmem:[%s4218_s0 + $0x110] ss:$8 sps:$4 sm:$0xff]  }
  0x2b   :  { %293 = vmatprep.mubr.bf16.mxu0 %v2430_v36  ;;  %2272 = vmatpush3.bf16.msra.mxu0 %v2435_v39  ;;  %v2513_v36 = vld [vmem:[%s4218_s0 + $0xf0] ss:$8 sps:$4 sm:$0xff]   ;;  %v2514_v39 = vld [vmem:[%s4218_s0 + $0x134] ss:$8 sps:$4 sm:$0xff]  }
  0x2c   :  { %2273 = vmatprep.subr.bf16.mxu0 %v2443_v41  ;;  %2334 = vmatpush3.bf16.msra.mxu1 %v2466_v60  ;;  %v2525_v41 = vld [vmem:[%s4218_s0 + $0x194] ss:$8 sps:$4 sm:$0xff]   ;;  %v2549_v60 = vld [vmem:[%s4218_s0 + $0x1e4] ss:$8 sps:$4 sm:$0xff]  }
  0x2d   :  { %2335 = vmatprep.subr.bf16.mxu1 %v2474_v2 }
  0x2f   :  { %2274 = vmatpush3.bf16.msra.mxu0 %v2444_v42  ;;  %609 = vmatmul.mubr.bf16.gmra.mrb[4].mxu1 %v2459_v56  ;;  %v2516_v42 = vld [vmem:[%s4218_s0 + $0x130] ss:$8 sps:$4 sm:$0xff]   ;;  %v2545_v56 = vld [vmem:[%s4218_s0 + $0x1c0] ss:$8 sps:$4 sm:$0xff]  }
  0x30   :  { %2275 = vmatprep.subr.bf16.mxu0 %v2453_v49  ;;  %616 = vmatprep.mubr.bf16.mxu1 %v2467_v61  ;;  %v2537_v49 = vld [vmem:[%s4218_s0 + $0x1b4] ss:$8 sps:$4 sm:$0xff]   ;;  %v2551_v61 = vld [vmem:[%s4218_s0 + $0x1e0] ss:$8 sps:$4 sm:$0xff]  }
  0x31   :  { %2336 = vmatpush3.bf16.msra.mxu1 %v2476_v4 }
  0x32   :  { %294 = vmatmul.mubr.bf16.gmra.mrb[8].mxu0 %v2433_v45  ;;  %2337 = vmatprep.subr.bf16.mxu1 %v2484_v9  ;;  %v2531_v45 = vld [vmem:[%s4218_s0 + $0x1a4] ss:$8 sps:$4 sm:$0xff]  }
  0x33   :  { %301 = vmatprep.mubr.bf16.mxu0 %v2439_v47  ;;  %2276 = vmatpush3.bf16.msra.mxu0 %v2455_v51  ;;  %v2528_v47 = vld [vmem:[%s4218_s0 + $0x154] ss:$8 sps:$4 sm:$0xff]   ;;  %v2534_v51 = vld [vmem:[%s4218_s0 + $0x164] ss:$8 sps:$4 sm:$0xff]  }
  0x34   :  { %2277 = vmatprep.subr.bf16.mxu0 %v2463_v57  ;;  %v2546_v57 = vld [vmem:[%s4218_s0 + $0x1d4] ss:$8 sps:$4 sm:$0xff]  }
  0x35   :  { %2338 = vmatpush3.bf16.msra.mxu1 %v2486_v11 }
  0x36   :  { %2339 = vmatprep.subr.bf16.mxu1 %v2493_v14 }
  0x37   :  { %2278 = vmatpush3.bf16.msra.mxu0 %v2465_v59  ;;  %617 = vmatmul.mubr.bf16.gmra.mrb[8].mxu1 %v2469_v0  ;;  %v2548_v59 = vld [vmem:[%s4218_s0 + $0x1d0] ss:$8 sps:$4 sm:$0xff]  }
  0x38   :  { %2279 = vmatprep.subr.bf16.mxu0 %v2473_v1  ;;  %624 = vmatprep.mubr.bf16.mxu1 %v2477_v5 }
  0x39   :  { %2340 = vmatpush3.bf16.msra.mxu1 %v2494_v15 }
  0x3a   :  { %302 = vmatmul.mubr.bf16.gmra.mrb[12].mxu0 %v2442_v54  ;;  %2341 = vmatprep.subr.bf16.mxu1 %v2501_v20  ;;  %v2536_v54 = vld [vmem:[%s4218_s0 + $0x160] ss:$8 sps:$4 sm:$0xff]  }
  0x3b   :  { %309 = vmatprep.mubr.bf16.mxu0 %v2450_v55  ;;  %2280 = vmatpush3.bf16.msra.mxu0 %v2475_v3  ;;  %v2540_v55 = vld [vmem:[%s4218_s0 + $0x174] ss:$8 sps:$4 sm:$0xff]  }
  0x3c   :  { %2281 = vmatprep.subr.bf16.mxu0 %v2483_v7 }
  0x3d   :  { %2342 = vmatpush3.bf16.msra.mxu1 %v2502_v21 }
  0x3e   :  { %2343 = vmatprep.subr.bf16.mxu1 %v2509_v22 }
  0x3f   :  { %2282 = vmatpush3.bf16.msra.mxu0 %v2485_v10  ;;  %625 = vmatmul.mubr.bf16.gmra.mrb[12].mxu1 %v2479_v12  ;;  %v2974_v12 = vld [vmem:[%s4219_s2] ss:$0 sm:$0xff] }
  0x40   :  { %632 = vmatprep.mubr.bf16.mxu1 %v2487_v13 }
  0x41   :  { %2344 = vmatpush3.bf16.msra.mxu1 %v2510_v23 }
  0x42   :  { %310 = vmatmul.mubr.bf16.gmra.mrb[16].mxu0 %v2452_v62  ;;  %2345 = vmatprep.subr.bf16.mxu1 %v2517_v28  ;;  %v2552_v62 = vld [vmem:[%s4218_s0 + $0x1f4] ss:$8 sps:$4 sm:$0xff]  }
  0x43   :  { %317 = vmatprep.mubr.bf16.mxu0 %v2460_v63  ;;  %v2554_v63 = vld [vmem:[%s4218_s0 + $0x1f0] ss:$8 sps:$4 sm:$0xff]  }
  0x45   :  { %2346 = vmatpush3.bf16.msra.mxu1 %v2518_v29 }
  0x47   :  { %633 = vmatmul.mubr.bf16.gmra.mrb[16].mxu1 %v2489_v18 }
  0x48   :  { %640 = vmatprep.mubr.bf16.mxu1 %v2495_v19 }
  0x4a   :  { %318 = vmatmul.mubr.bf16.gmra.mrb[20].mxu0 %v2462_v6 }
  0x4b   :  { %325 = vmatprep.mubr.bf16.mxu0 %v2470_v8 }
  0x4f   :  { %641 = vmatmul.mubr.bf16.gmra.mrb[20].mxu1 %v2497_v26 }
  0x50   :  { %648 = vmatprep.mubr.bf16.mxu1 %v2503_v27 }
  0x52   :  { %326 = vmatmul.mubr.bf16.gmra.mrb[24].mxu0 %v2472_v16 }
  0x53   :  { %333 = vmatprep.mubr.bf16.mxu0 %v2480_v17 }
  0x57   :  { %649 = vmatmul.mubr.bf16.gmra.mrb[24].mxu1 %v2505_v32 }
  0x58   :  { %656 = vmatprep.mubr.bf16.mxu1 %v2511_v33 }
  0x5a   :  { %334 = vmatmul.mubr.bf16.gmra.mrb[28].mxu0 %v2482_v24 }
  0x5b   :  { %923 = vmatprep.mubr.bf16.mxu0 %v2492_v25 }
  0x5f   :  { %657 = vmatmul.mubr.bf16.gmra.mrb[28].mxu1 %v2513_v36 }
  0x60   :  { %1246 = vmatprep.mubr.bf16.mxu1 %v2521_v37 }
  0x62   :  { %924 = vmatmul.mubr.bf16.vlgmr.msra.gmra.mrb[32].mxu0 %v2490_v30 }
  0x63   :  { %931 = vmatprep.mubr.bf16.mxu0 %v2498_v31 }
  0x67   :  { %1247 = vmatmul.mubr.bf16.vlgmr.msra.gmra.mrb[32].mxu1 %v2519_v40 }
  0x68   :  { %1254 = vmatprep.mubr.bf16.mxu1 %v2525_v41 }
  0x6a   :  { %932 = vmatmul.mubr.bf16.gmra.mrb[36].mxu0 %v2500_v34 }
  0x6b   :  { %939 = vmatprep.mubr.bf16.mxu0 %v2506_v35 }
  0x6f   :  { %1255 = vmatmul.mubr.bf16.gmra.mrb[36].mxu1 %v2527_v44 }
  0x70   :  { %1262 = vmatprep.mubr.bf16.mxu1 %v2531_v45 }
  0x72   :  { %940 = vmatmul.mubr.bf16.gmra.mrb[40].mxu0 %v2508_v38 }
  0x73   :  { %947 = vmatprep.mubr.bf16.mxu0 %v2514_v39 }
  0x77   :  { %1263 = vmatmul.mubr.bf16.gmra.mrb[40].mxu1 %v2533_v48 }
  0x78   :  { %1270 = vmatprep.mubr.bf16.mxu1 %v2537_v49 }
  0x7a   :  { %948 = vmatmul.mubr.bf16.gmra.mrb[44].mxu0 %v2516_v42 }
  0x7b   :  { %955 = vmatprep.mubr.bf16.mxu0 %v2522_v43 }
  0x7f   :  { %1271 = vmatmul.mubr.bf16.gmra.mrb[44].mxu1 %v2539_v52 }
  0x80   :  { %1278 = vmatprep.mubr.bf16.mxu1 %v2543_v53 }
  0x82   :  { %956 = vmatmul.mubr.bf16.gmra.mrb[48].mxu0 %v2524_v46 }
  0x83   :  { %963 = vmatprep.mubr.bf16.mxu0 %v2528_v47 }
  0x87   :  { %1279 = vmatmul.mubr.bf16.gmra.mrb[48].mxu1 %v2545_v56 }
  0x88   :  { %1286 = vmatprep.mubr.bf16.mxu1 %v2546_v57 }
  0x8a   :  { %964 = vmatmul.mubr.bf16.gmra.mrb[52].mxu0 %v2530_v50 }
  0x8b   :  { %971 = vmatprep.mubr.bf16.mxu0 %v2534_v51 }
  0x8f   :  { %1287 = vmatmul.mubr.bf16.gmra.mrb[52].mxu1 %v2548_v59 }
  0x90   :  { %1294 = vmatprep.mubr.bf16.mxu1 %v2549_v60 }
  0x92   :  { %972 = vmatmul.mubr.bf16.gmra.mrb[56].mxu0 %v2536_v54 }
  0x93   :  { %979 = vmatprep.mubr.bf16.mxu0 %v2540_v55 }
  0x97   :  { %1295 = vmatmul.mubr.bf16.gmra.mrb[56].mxu1 %v2551_v61 }
  0x98   :  { %1302 = vmatprep.mubr.bf16.mxu1 %v2552_v62 }
  0x9a   :  { %980 = vmatmul.mubr.bf16.gmra.mrb[60].mxu0 %v2542_v58 }
  0x9f   :  { %1303 = vmatmul.mubr.bf16.gmra.mrb[60].mxu1 %v2554_v63 }
  0xf5   :  { %v2155_v0 = vpop.f32.mrb[0].mxu0 }
  0xf6   :  { %v2156_v1 = vpop.f32.mrb[1].mxu0 }
  0xf7   :  { %v2157_v2 = vadd.f32 %v2156_v1, %v2155_v0  ;;  %v2158_v3 = vpop.f32.mrb[2].mxu0 }
  0xf8   :  { %v2159_v4 = vpop.f32.mrb[3].mxu0 }
  0xf9   :  { %v2160_v5 = vadd.f32 %v2159_v4, %v2158_v3  ;;  %v2980_v19 = vadd.f32 %v2157_v2, %v2974_v12 }
  0xfa   :  { %v2219_v18 = vpop.f32.mrb[0].mxu1 }
  0xfb   :  { %v2977_v14 = vadd.f32 %v2160_v5, %v2974_v12  ;;  %v2220_v22 = vpop.f32.mrb[1].mxu1  ;;  %v1451_v28 = vmul.f32 %v2980_v19, %v2980_v19 }
  0xfc   :  { %v2985_v24 = vadd.f32 %v2220_v22, %v2219_v18  ;;  %v2222_v25 = vpop.f32.mrb[2].mxu1 }
  0xfd   :  { %v2161_v6 = vpop.f32.mrb[4].mxu0  ;;  %v1452_v26 = vmul.f32 %v2977_v14, %v2977_v14  ;;  %v2223_v27 = vpop.f32.mrb[3].mxu1  ;;  %v1382_v32 = vadd.f32 %v2977_v14, %v2980_v19 }
  0xfe   :  { %v2162_v7 = vpop.f32.mrb[5].mxu0  ;;  %v2996_v31 = vadd.f32 %v2223_v27, %v2222_v25 }
  0xff   :  { %v2163_v8 = vadd.f32 %v2162_v7, %v2161_v6  ;;  %v2164_v9 = vpop.f32.mrb[6].mxu0  ;;  %v1515_v34 = vadd.f32 %v1452_v26, %v1451_v28 }
 0x100   :  { %v2165_v10 = vpop.f32.mrb[7].mxu0 }
 0x101   :  { %v2166_v11 = vadd.f32 %v2165_v10, %v2164_v9  ;;  %v2983_v20 = vadd.f32 %v2163_v8, %v2974_v12 }
 0x102   :  { %v2225_v40 = vpop.f32.mrb[4].mxu1 }
 0x103   :  { %v1453_v29 = vmul.f32 %v2983_v20, %v2983_v20  ;;  %v2994_v30 = vadd.f32 %v2166_v11, %v2974_v12  ;;  %v1383_v37 = vadd.f32 %v1382_v32, %v2983_v20  ;;  %v2226_v44 = vpop.f32.mrb[5].mxu1 }
 0x104   :  { %v3006_v46 = vadd.f32 %v2226_v44, %v2225_v40  ;;  %v2228_v47 = vpop.f32.mrb[6].mxu1 }
 0x105   :  { %v2167_v13 = vpop.f32.mrb[8].mxu0  ;;  %v1516_v41 = vadd.f32 %v1515_v34, %v1453_v29  ;;  %v1454_v42 = vmul.f32 %v2994_v30, %v2994_v30  ;;  %v2229_v50 = vpop.f32.mrb[7].mxu1  ;;  %v1384_v51 = vadd.f32 %v1383_v37, %v2994_v30 }
 0x106   :  { %v2168_v15 = vpop.f32.mrb[9].mxu0  ;;  %v3017_v54 = vadd.f32 %v2229_v50, %v2228_v47 }
 0x107   :  { %v2169_v16 = vadd.f32 %v2168_v15, %v2167_v13  ;;  %v2170_v17 = vpop.f32.mrb[10].mxu0  ;;  %v1517_v52 = vadd.f32 %v1516_v41, %v1454_v42 }
 0x108   :  { %v2171_v21 = vpop.f32.mrb[11].mxu0 }
 0x109   :  { %v2172_v23 = vadd.f32 %v2171_v21, %v2170_v17  ;;  %v3001_v35 = vadd.f32 %v2169_v16, %v2974_v12 }
 0x10a   :  { %v2231_v62 = vpop.f32.mrb[8].mxu1 }
 0x10b   :  { %v1455_v48 = vmul.f32 %v3001_v35, %v3001_v35  ;;  %v3011_v49 = vadd.f32 %v2172_v23, %v2974_v12  ;;  %v1385_v55 = vadd.f32 %v1384_v51, %v3001_v35  ;;  %v2232_v2 = vpop.f32.mrb[9].mxu1 }
 0x10c   :  { %v3028_v5 = vadd.f32 %v2232_v2, %v2231_v62  ;;  %v2234_v6 = vpop.f32.mrb[10].mxu1 }
 0x10d   :  { %v2173_v33 = vpop.f32.mrb[12].mxu0  ;;  %v1518_v57 = vadd.f32 %v1517_v52, %v1455_v48  ;;  %v1456_v58 = vmul.f32 %v3011_v49, %v3011_v49  ;;  %v1386_v3 = vadd.f32 %v1385_v55, %v3011_v49  ;;  %v2235_v9 = vpop.f32.mrb[11].mxu1 }
 0x10e   :  { %v2174_v36 = vpop.f32.mrb[13].mxu0  ;;  %v3036_v15 = vadd.f32 %v2235_v9, %v2234_v6 }
 0x10f   :  { %v2175_v38 = vadd.f32 %v2174_v36, %v2173_v33  ;;  %v2176_v39 = vpop.f32.mrb[14].mxu0  ;;  %v1519_v7 = vadd.f32 %v1518_v57, %v1456_v58 }
 0x110   :  { %v2177_v43 = vpop.f32.mrb[15].mxu0 }
 0x111   :  { %v2178_v45 = vadd.f32 %v2177_v43, %v2176_v39  ;;  %v3015_v53 = vadd.f32 %v2175_v38, %v2974_v12 }
 0x112   :  { %v2237_v26 = vpop.f32.mrb[12].mxu1 }
 0x113   :  { %v1457_v63 = vmul.f32 %v3015_v53, %v3015_v53  ;;  %v3025_v0 = vadd.f32 %v2178_v45, %v2974_v12  ;;  %v1387_v10 = vadd.f32 %v1386_v3, %v3015_v53  ;;  %v2238_v29 = vpop.f32.mrb[13].mxu1 }
 0x114   :  { %v3048_v36 = vadd.f32 %v2238_v29, %v2237_v26  ;;  %v2240_v37 = vpop.f32.mrb[14].mxu1 }
 0x115   :  { %v2179_v56 = vpop.f32.mrb[16].mxu0  ;;  %v1520_v11 = vadd.f32 %v1519_v7, %v1457_v63  ;;  %v1458_v13 = vmul.f32 %v3025_v0, %v3025_v0  ;;  %v1388_v22 = vadd.f32 %v1387_v10, %v3025_v0  ;;  %v2241_v40 = vpop.f32.mrb[15].mxu1 }
 0x116   :  { %v2180_v59 = vpop.f32.mrb[17].mxu0  ;;  %v3054_v42 = vadd.f32 %v2241_v40, %v2240_v37 }
 0x117   :  { %v2181_v60 = vadd.f32 %v2180_v59, %v2179_v56  ;;  %v2182_v61 = vpop.f32.mrb[18].mxu0  ;;  %v1521_v27 = vadd.f32 %v1520_v11, %v1458_v13 }
 0x118   :  { %v2183_v1 = vpop.f32.mrb[19].mxu0 }
 0x119   :  { %v2184_v4 = vadd.f32 %v2183_v1, %v2182_v61  ;;  %v3031_v8 = vadd.f32 %v2181_v60, %v2974_v12 }
 0x11a   :  { %v2243_v55 = vpop.f32.mrb[16].mxu1 }
 0x11b   :  { %v1459_v17 = vmul.f32 %v3031_v8, %v3031_v8  ;;  %v3041_v18 = vadd.f32 %v2184_v4, %v2974_v12  ;;  %v1389_v32 = vadd.f32 %v1388_v22, %v3031_v8  ;;  %v2244_v58 = vpop.f32.mrb[17].mxu1 }
 0x11c   :  { %v3066_v62 = vadd.f32 %v2244_v58, %v2243_v55  ;;  %v2246_v63 = vpop.f32.mrb[18].mxu1  ;;  %v3108_v55 = vadd.f32 %v3006_v46, %v2974_v12 }
 0x11d   :  { %v2185_v16 = vpop.f32.mrb[20].mxu0  ;;  %v1522_v38 = vadd.f32 %v1521_v27, %v1459_v17  ;;  %v1460_v39 = vmul.f32 %v3041_v18, %v3041_v18  ;;  %v1390_v43 = vadd.f32 %v1389_v32, %v3041_v18  ;;  %v2247_v1 = vpop.f32.mrb[19].mxu1 }
 0x11e   :  { %v2186_v21 = vpop.f32.mrb[21].mxu0  ;;  %v3074_v6 = vadd.f32 %v2247_v1, %v2246_v63 }
 0x11f   :  { %v2187_v23 = vadd.f32 %v2186_v21, %v2185_v16  ;;  %v2188_v25 = vpop.f32.mrb[22].mxu0  ;;  %v1523_v47 = vadd.f32 %v1522_v38, %v1460_v39 }
 0x120   :  { %v2189_v28 = vpop.f32.mrb[23].mxu0 }
 0x121   :  { %v3046_v33 = vadd.f32 %v2187_v23, %v2974_v12  ;;  %v2190_v34 = vadd.f32 %v2189_v28, %v2188_v25 }
 0x122   :  { %v2249_v22 = vpop.f32.mrb[20].mxu1 }
 0x123   :  { %v1461_v41 = vmul.f32 %v3046_v33, %v3046_v33  ;;  %v3058_v44 = vadd.f32 %v2190_v34, %v2974_v12  ;;  %v1391_v50 = vadd.f32 %v1390_v43, %v3046_v33  ;;  %v2250_v25 = vpop.f32.mrb[21].mxu1  ;;  %v3087_v34 = vadd.f32 %v2985_v24, %v2974_v12 }
 0x124   :  { %v3083_v29 = vadd.f32 %v2250_v25, %v2249_v22  ;;  %v2252_v32 = vpop.f32.mrb[22].mxu1  ;;  %v3097_v43 = vadd.f32 %v2996_v31, %v2974_v12 }
 0x125   :  { %v2191_v45 = vpop.f32.mrb[24].mxu0  ;;  %v1524_v56 = vadd.f32 %v1523_v47, %v1461_v41  ;;  %v1462_v59 = vmul.f32 %v3058_v44, %v3058_v44  ;;  %v1392_v2 = vadd.f32 %v1391_v50, %v3058_v44  ;;  %v2253_v37 = vpop.f32.mrb[23].mxu1 }
 0x126   :  { %v2192_v48 = vpop.f32.mrb[25].mxu0 }
 0x127   :  { %v2193_v51 = vadd.f32 %v2192_v48, %v2191_v45  ;;  %v2194_v52 = vpop.f32.mrb[26].mxu0  ;;  %v1525_v7 = vadd.f32 %v1524_v56, %v1462_v59  ;;  %v3099_v45 = vadd.f32 %v2253_v37, %v2252_v32  ;;  %v3140_v37 = vadd.f32 %v3048_v36, %v2974_v12 }
 0x128   :  { %v2195_v57 = vpop.f32.mrb[27].mxu0 }
 0x129   :  { %v3064_v60 = vadd.f32 %v2193_v51, %v2974_v12  ;;  %v2196_v61 = vadd.f32 %v2195_v57, %v2194_v52  ;;  %v1467_v51 = vmul.f32 %v3087_v34, %v3087_v34 }
 0x12a   :  { %v2255_v59 = vpop.f32.mrb[24].mxu1 }
 0x12b   :  { %v1463_v3 = vmul.f32 %v3064_v60, %v3064_v60  ;;  %v3072_v4 = vadd.f32 %v2196_v61, %v2974_v12  ;;  %v1393_v9 = vadd.f32 %v1392_v2, %v3064_v60  ;;  %v1468_v61 = vmul.f32 %v3097_v43, %v3097_v43  ;;  %v2256_v1 = vpop.f32.mrb[25].mxu1 }
 0x12c   :  { %v3117_v2 = vadd.f32 %v3017_v54, %v2974_v12  ;;  %v3131_v54 = vadd.f32 %v3036_v15, %v2974_v12 }
 0x12d   :  { %v2197_v10 = vpop.f32.mrb[28].mxu0  ;;  %v1526_v13 = vadd.f32 %v1525_v7, %v1463_v3  ;;  %v1464_v16 = vmul.f32 %v3072_v4, %v3072_v4  ;;  %v1394_v26 = vadd.f32 %v1393_v9, %v3072_v4  ;;  %v2258_v9 = vpop.f32.mrb[26].mxu1 }
 0x12e   :  { %v2198_v11 = vpop.f32.mrb[29].mxu0 }
 0x12f   :  { %v2199_v17 = vadd.f32 %v2198_v11, %v2197_v10  ;;  %v2200_v21 = vpop.f32.mrb[30].mxu0  ;;  %v1527_v38 = vadd.f32 %v1526_v13, %v1464_v16  ;;  %v3124_v10 = vadd.f32 %v3028_v5, %v2974_v12  ;;  %v2257_v11 = vadd.f32 %v2256_v1, %v2255_v59  ;;  %v2259_v13 = vpop.f32.mrb[27].mxu1 }
 0x130   :  { %v2201_v23 = vpop.f32.mrb[31].mxu0  ;;  %v1469_v16 = vmul.f32 %v3108_v55, %v3108_v55  ;;  %v2260_v22 = vadd.f32 %v2259_v13, %v2258_v9 }
 0x131   :  { %v3081_v27 = vadd.f32 %v2199_v17, %v2974_v12  ;;  %v2202_v28 = vadd.f32 %v2201_v23, %v2200_v21  ;;  %v1470_v23 = vmul.f32 %v3117_v2, %v3117_v2 }
 0x133   :  { %v1395_v39 = vadd.f32 %v1394_v26, %v3081_v27  ;;  %v1465_v40 = vmul.f32 %v3081_v27, %v3081_v27  ;;  %v3093_v41 = vadd.f32 %v2202_v28, %v2974_v12  ;;  %v1471_v28 = vmul.f32 %v3124_v10, %v3124_v10 }
 0x135   :  { %v1528_v47 = vadd.f32 %v1527_v38, %v1465_v40  ;;  %v1396_v24 = vadd.f32 %v1395_v39, %v3093_v41  ;;  %v1466_v48 = vmul.f32 %v3093_v41, %v3093_v41  ;;  %v2283_v50 = vpop.f32.mrb[32].mxu0 }
 0x136   :  { %v2284_v52 = vpop.f32.mrb[33].mxu0 }
 0x137   :  { %v1397_v31 = vadd.f32 %v1396_v24, %v3087_v34  ;;  %v1529_v56 = vadd.f32 %v1528_v47, %v1466_v48  ;;  %v3111_v57 = vadd.f32 %v2284_v52, %v2283_v50  ;;  %v2286_v58 = vpop.f32.mrb[34].mxu0  ;;  %v2261_v47 = vpop.f32.mrb[28].mxu1  ;;  %v1472_v24 = vmul.f32 %v3131_v54, %v3131_v54 }
 0x138   :  { %v2287_v63 = vpop.f32.mrb[35].mxu0  ;;  %v2262_v50 = vpop.f32.mrb[29].mxu1 }
 0x139   :  { %v1398_v3 = vadd.f32 %v1397_v31, %v3097_v43  ;;  %v1530_v46 = vadd.f32 %v1529_v56, %v1467_v51  ;;  %v3120_v7 = vadd.f32 %v2287_v63, %v2286_v58  ;;  %v3149_v51 = vadd.f32 %v3054_v42, %v2974_v12  ;;  %v2264_v56 = vpop.f32.mrb[30].mxu1 }
 0x13a   :  { %v3156_v58 = vadd.f32 %v3066_v62, %v2974_v12  ;;  %v2263_v59 = vadd.f32 %v2262_v50, %v2261_v47  ;;  %v1473_v63 = vmul.f32 %v3140_v37, %v3140_v37  ;;  %v3163_v42 = vadd.f32 %v3074_v6, %v2974_v12 }
 0x13b   :  { %v1399_v17 = vadd.f32 %v1398_v3, %v3108_v55  ;;  %v1531_v21 = vadd.f32 %v1530_v46, %v1468_v61  ;;  %v2265_v61 = vpop.f32.mrb[31].mxu1  ;;  %v1474_v9 = vmul.f32 %v3149_v51, %v3149_v51 }
 0x13c   :  { %v2266_v46 = vadd.f32 %v2265_v61, %v2264_v56 }
 0x13d   :  { %v1400_v25 = vadd.f32 %v1399_v17, %v3117_v2  ;;  %v1532_v5 = vadd.f32 %v1531_v21, %v1469_v16  ;;  %v2289_v26 = vpop.f32.mrb[36].mxu0  ;;  %v1475_v17 = vmul.f32 %v3156_v58, %v3156_v58 }
 0x13e   :  { %v2290_v32 = vpop.f32.mrb[37].mxu0 }
 0x13f   :  { %v1533_v38 = vadd.f32 %v1532_v5, %v1470_v23  ;;  %v1401_v15 = vadd.f32 %v1400_v25, %v3124_v10  ;;  %v3143_v39 = vadd.f32 %v2290_v32, %v2289_v26  ;;  %v2292_v40 = vpop.f32.mrb[38].mxu0  ;;  %v3173_v5 = vadd.f32 %v3083_v29, %v2974_v12 }
 0x140   :  { %v2293_v48 = vpop.f32.mrb[39].mxu0  ;;  %v1476_v32 = vmul.f32 %v3163_v42, %v3163_v42 }
 0x141   :  { %v1402_v52 = vadd.f32 %v1401_v15, %v3131_v54  ;;  %v1534_v36 = vadd.f32 %v1533_v38, %v1471_v28  ;;  %v3152_v31 = vadd.f32 %v2293_v48, %v2292_v40  ;;  %v2347_v28 = vpop.f32.mrb[32].mxu1  ;;  %v1477_v61 = vmul.f32 %v3173_v5, %v3173_v5 }
 0x142   :  { %v2348_v15 = vpop.f32.mrb[33].mxu1 }
 0x143   :  { %v1403_v1 = vadd.f32 %v1402_v52, %v3140_v37  ;;  %v1535_v3 = vadd.f32 %v1534_v36, %v1472_v24  ;;  %v3182_v24 = vadd.f32 %v3099_v45, %v2974_v12  ;;  %v2350_v29 = vpop.f32.mrb[34].mxu1  ;;  %v3186_v50 = vadd.f32 %v2348_v15, %v2347_v28 }
 0x144   :  { %v2351_v52 = vpop.f32.mrb[35].mxu1  ;;  %v3198_v45 = vadd.f32 %v2263_v59, %v2974_v12 }
 0x145   :  { %v1404_v13 = vadd.f32 %v1403_v1, %v3149_v51  ;;  %v1536_v62 = vadd.f32 %v1535_v3, %v1473_v63  ;;  %v2295_v16 = vpop.f32.mrb[40].mxu0  ;;  %v3192_v63 = vadd.f32 %v2257_v11, %v2974_v12  ;;  %v3195_v1 = vadd.f32 %v2260_v22, %v2974_v12  ;;  %v2353_v59 = vpop.f32.mrb[36].mxu1 }
 0x146   :  { %v2296_v21 = vpop.f32.mrb[41].mxu0  ;;  %v3200_v3 = vadd.f32 %v2351_v52, %v2350_v29  ;;  %v1481_v28 = vmul.f32 %v3198_v45, %v3198_v45 }
 0x147   :  { %v1405_v23 = vadd.f32 %v1404_v13, %v3156_v58  ;;  %v1537_v25 = vadd.f32 %v1536_v62, %v1474_v9  ;;  %v3175_v6 = vadd.f32 %v2296_v21, %v2295_v16  ;;  %v2298_v26 = vpop.f32.mrb[42].mxu0  ;;  %v1478_v62 = vmul.f32 %v3182_v24, %v3182_v24 }
 0x148   :  { %v2299_v38 = vpop.f32.mrb[43].mxu0  ;;  %v1479_v22 = vmul.f32 %v3192_v63, %v3192_v63 }
 0x149   :  { %v1538_v40 = vadd.f32 %v1537_v25, %v1475_v17  ;;  %v1406_v47 = vadd.f32 %v1405_v23, %v3163_v42  ;;  %v3184_v48 = vadd.f32 %v2299_v38, %v2298_v26  ;;  %v1480_v26 = vmul.f32 %v3195_v1, %v3195_v1  ;;  %v2354_v38 = vpop.f32.mrb[37].mxu1 }
 0x14a   :  { %v2356_v52 = vpop.f32.mrb[38].mxu1 }
 0x14b   :  { %v1539_v36 = vadd.f32 %v1538_v40, %v1476_v32  ;;  %v1407_v56 = vadd.f32 %v1406_v47, %v3173_v5  ;;  %v3214_v47 = vadd.f32 %v2266_v46, %v2974_v12 }
 0x14d   :  { %v1540_v9 = vadd.f32 %v1539_v36, %v1477_v61  ;;  %v1408_v13 = vadd.f32 %v1407_v56, %v3182_v24  ;;  %v2301_v16 = vpop.f32.mrb[44].mxu0  ;;  %4247 = vst [vmem:[#allocation2_spill] sm:$0xff] %v3214_v47  ;;  %v3218_v36 = vadd.f32 %v3111_v57, %v2974_v12  ;;  %v3220_v56 = vadd.f32 %v2354_v38, %v2353_v59  ;;  %v2357_v61 = vpop.f32.mrb[39].mxu1 }
 0x14e   :  { %v2302_v17 = vpop.f32.mrb[45].mxu0 }
 0x14f   :  { %v1541_v21 = vadd.f32 %v1540_v9, %v1478_v62  ;;  %v1409_v11 = vadd.f32 %v1408_v13, %v3192_v63  ;;  %v2303_v23 = vadd.f32 %v2302_v17, %v2301_v16  ;;  %v2304_v25 = vpop.f32.mrb[46].mxu0  ;;  %4248 = vst [vmem:[#allocation3_spill] sm:$0xff] %v3218_v36  ;;  %v3225_v62 = vadd.f32 %v3120_v7, %v2974_v12 }
 0x150   :  { %v2305_v32 = vpop.f32.mrb[47].mxu0  ;;  %v3227_v16 = vadd.f32 %v2357_v61, %v2356_v52  ;;  %v3243_v52 = vadd.f32 %v3152_v31, %v2974_v12  ;;  %v3257_v31 = vadd.f32 %v3184_v48, %v2974_v12 }
 0x151   :  { %v1542_v15 = vadd.f32 %v1541_v21, %v1479_v22  ;;  %v1410_v40 = vadd.f32 %v1409_v11, %v3195_v1  ;;  %v2306_v29 = vadd.f32 %v2305_v32, %v2304_v25  ;;  %4249 = vst [vmem:[#allocation4_spill] sm:$0xff] %v3225_v62  ;;  %v1482_v21 = vmul.f32 %v3214_v47, %v3214_v47 }
 0x152   :  { %v1483_v11 = vmul.f32 %v3218_v36, %v3218_v36  ;;  %v3236_v25 = vadd.f32 %v3143_v39, %v2974_v12  ;;  %v1484_v38 = vmul.f32 %v3225_v62, %v3225_v62  ;;  %4251 = vst [vmem:[#allocation6_spill] sm:$0xff] %v3243_v52  ;;  %4252 = vst [vmem:[#allocation7_spill] sm:$0xff] %v3257_v31 }
 0x153   :  { %v1543_v9 = vadd.f32 %v1542_v15, %v1480_v26  ;;  %v1411_v13 = vadd.f32 %v1410_v40, %v3198_v45 }
 0x154   :  { %4250 = vst [vmem:[#allocation5_spill] sm:$0xff] %v3236_v25 }
 0x155   :  { %v1544_v46 = vadd.f32 %v1543_v9, %v1481_v28  ;;  %v1412_v17 = vadd.f32 %v1411_v13, %v3214_v47  ;;  %v2307_v57 = vpop.f32.mrb[48].mxu0  ;;  %v2359_v28 = vpop.f32.mrb[40].mxu1 }
 0x156   :  { %v2308_v22 = vpop.f32.mrb[49].mxu0  ;;  %v2360_v40 = vpop.f32.mrb[41].mxu1 }
 0x157   :  { %v1413_v7 = vadd.f32 %v1412_v17, %v3218_v36  ;;  %v1545_v59 = vadd.f32 %v1544_v46, %v1482_v21  ;;  %v2309_v26 = vadd.f32 %v2308_v22, %v2307_v57  ;;  %v2310_v32 = vpop.f32.mrb[50].mxu0  ;;  %v2362_v13 = vpop.f32.mrb[42].mxu1  ;;  %v3248_v46 = vadd.f32 %v3175_v6, %v2974_v12 }
 0x158   :  { %v2311_v15 = vpop.f32.mrb[51].mxu0  ;;  %v3250_v17 = vadd.f32 %v2360_v40, %v2359_v28  ;;  %v2363_v21 = vpop.f32.mrb[43].mxu1  ;;  %v1485_v57 = vmul.f32 %v3236_v25, %v3236_v25  ;;  %v3267_v40 = vadd.f32 %v2303_v23, %v2974_v12 }
 0x159   :  { %v1414_v61 = vadd.f32 %v1413_v7, %v3225_v62  ;;  %v1546_v9 = vadd.f32 %v1545_v59, %v1483_v11  ;;  %v2312_v39 = vadd.f32 %v2311_v15, %v2310_v32  ;;  %v3259_v11 = vadd.f32 %v2363_v21, %v2362_v13  ;;  %v2365_v13 = vpop.f32.mrb[44].mxu1 }
 0x15a   :  { %v1486_v7 = vmul.f32 %v3243_v52, %v3243_v52  ;;  %v1487_v28 = vmul.f32 %v3248_v46, %v3248_v46  ;;  %4253 = vst [vmem:[#allocation8_spill] sm:$0xff] %v3267_v40  ;;  %v1488_v21 = vmul.f32 %v3257_v31, %v3257_v31  ;;  %v3277_v47 = vadd.f32 %v2309_v26, %v2974_v12 }
 0x15b   :  { %v1415_v22 = vadd.f32 %v1414_v61, %v3236_v25  ;;  %v1547_v36 = vadd.f32 %v1546_v9, %v1484_v38  ;;  %v3274_v25 = vadd.f32 %v2306_v29, %v2974_v12 }
 0x15c   :  { %4255 = vst [vmem:[#allocation10_spill] sm:$0xff] %v3277_v47 }
 0x15d   :  { %v1548_v6 = vadd.f32 %v1547_v36, %v1485_v57  ;;  %v1416_v59 = vadd.f32 %v1415_v22, %v3243_v52  ;;  %v2313_v32 = vpop.f32.mrb[52].mxu0  ;;  %v2366_v57 = vpop.f32.mrb[45].mxu1  ;;  %4254 = vst [vmem:[#allocation9_spill] sm:$0xff] %v3274_v25  ;;  %v1490_v26 = vmul.f32 %v3274_v25, %v3274_v25 }
 0x15e   :  { %v2314_v15 = vpop.f32.mrb[53].mxu0  ;;  %v2368_v23 = vpop.f32.mrb[46].mxu1 }
 0x15f   :  { %v1417_v38 = vadd.f32 %v1416_v59, %v3248_v46  ;;  %v1549_v48 = vadd.f32 %v1548_v6, %v1486_v7  ;;  %v2315_v61 = vadd.f32 %v2314_v15, %v2313_v32  ;;  %v2316_v9 = vpop.f32.mrb[54].mxu0  ;;  %v3279_v7 = vadd.f32 %v2366_v57, %v2365_v13  ;;  %v2369_v6 = vpop.f32.mrb[47].mxu1 }
 0x160   :  { %v2317_v36 = vpop.f32.mrb[55].mxu0  ;;  %v1489_v32 = vmul.f32 %v3267_v40, %v3267_v40  ;;  %v1491_v13 = vmul.f32 %v3277_v47, %v3277_v47 }
 0x161   :  { %v1418_v22 = vadd.f32 %v1417_v38, %v3257_v31  ;;  %v1550_v52 = vadd.f32 %v1549_v48, %v1487_v28  ;;  %v2318_v62 = vadd.f32 %v2317_v36, %v2316_v9  ;;  %v3285_v38 = vadd.f32 %v2312_v39, %v2974_v12 }
 0x162   :  { %v3287_v28 = vadd.f32 %v2369_v6, %v2368_v23  ;;  %v2371_v23 = vpop.f32.mrb[48].mxu1 }
 0x163   :  { %v1419_v59 = vadd.f32 %v1418_v22, %v3267_v40  ;;  %v1551_v15 = vadd.f32 %v1550_v52, %v1488_v21  ;;  %4256 = vst [vmem:[#allocation11_spill] sm:$0xff] %v3285_v38  ;;  %v3296_v52 = vadd.f32 %v2315_v61, %v2974_v12  ;;  %v1492_v6 = vmul.f32 %v3285_v38, %v3285_v38 }
 0x164   :  { %v3302_v40 = vadd.f32 %v2318_v62, %v2974_v12 }
 0x165   :  { %v1552_v29 = vadd.f32 %v1551_v15, %v1489_v32  ;;  %v1420_v48 = vadd.f32 %v1419_v59, %v3274_v25  ;;  %v2319_v9 = vpop.f32.mrb[56].mxu0  ;;  %4257 = vst [vmem:[#allocation12_spill] sm:$0xff] %v3296_v52  ;;  %v2372_v32 = vpop.f32.mrb[49].mxu1 }
 0x166   :  { %v2320_v36 = vpop.f32.mrb[57].mxu0  ;;  %4258 = vst [vmem:[#allocation13_spill] sm:$0xff] %v3302_v40 }
 0x167   :  { %v1553_v57 = vadd.f32 %v1552_v29, %v1490_v26  ;;  %v1421_v22 = vadd.f32 %v1420_v48, %v3277_v47  ;;  %v2321_v39 = vadd.f32 %v2320_v36, %v2319_v9  ;;  %v2322_v21 = vpop.f32.mrb[58].mxu0  ;;  %v2374_v26 = vpop.f32.mrb[50].mxu1  ;;  %v3304_v48 = vadd.f32 %v2372_v32, %v2371_v23 }
 0x168   :  { %v2323_v59 = vpop.f32.mrb[59].mxu0  ;;  %v2375_v61 = vpop.f32.mrb[51].mxu1  ;;  %v1493_v36 = vmul.f32 %v3296_v52, %v3296_v52 }
 0x169   :  { %v1554_v15 = vadd.f32 %v1553_v57, %v1491_v13  ;;  %v1422_v25 = vadd.f32 %v1421_v22, %v3285_v38  ;;  %v2324_v29 = vadd.f32 %v2323_v59, %v2322_v21  ;;  %v3310_v31 = vadd.f32 %v2321_v39, %v2974_v12 }
 0x16a   :  { %v3315_v57 = vadd.f32 %v2375_v61, %v2374_v26  ;;  %v1494_v21 = vmul.f32 %v3302_v40, %v3302_v40 }
 0x16b   :  { %v1555_v47 = vadd.f32 %v1554_v15, %v1492_v6  ;;  %v1423_v9 = vadd.f32 %v1422_v25, %v3296_v52  ;;  %4259 = vst [vmem:[#allocation14_spill] sm:$0xff] %v3310_v31  ;;  %v3313_v13 = vadd.f32 %v2324_v29, %v2974_v12  ;;  %v1495_v39 = vmul.f32 %v3310_v31, %v3310_v31  ;;  %v2377_v29 = vpop.f32.mrb[52].mxu1 }
 0x16c   :  { %v2378_v61 = vpop.f32.mrb[53].mxu1 }
 0x16d   :  { %v1556_v62 = vadd.f32 %v1555_v47, %v1493_v36  ;;  %v1424_v22 = vadd.f32 %v1423_v9, %v3302_v40  ;;  %v2325_v23 = vpop.f32.mrb[60].mxu0  ;;  %v1496_v26 = vmul.f32 %v3313_v13, %v3313_v13 }
 0x16e   :  { %v2326_v6 = vpop.f32.mrb[61].mxu0 }
 0x16f   :  { %v1557_v25 = vadd.f32 %v1556_v62, %v1494_v21  ;;  %v1425_v59 = vadd.f32 %v1424_v22, %v3310_v31  ;;  %v2327_v32 = vadd.f32 %v2326_v6, %v2325_v23  ;;  %v2328_v15 = vpop.f32.mrb[62].mxu0  ;;  %v2380_v21 = vpop.f32.mrb[54].mxu1  ;;  %v3331_v22 = vadd.f32 %v3186_v50, %v2974_v12 }
 0x170   :  { %v2329_v47 = vpop.f32.mrb[63].mxu0  ;;  %v2379_v23 = vadd.f32 %v2378_v61, %v2377_v29  ;;  %v2381_v6 = vpop.f32.mrb[55].mxu1  ;;  %v3348_v29 = vadd.f32 %v3220_v56, %v2974_v12 }
 0x171   :  { %v1558_v9 = vadd.f32 %v1557_v25, %v1495_v39  ;;  %v1426_v36 = vadd.f32 %v1425_v59, %v3313_v13  ;;  %v3327_v40 = vadd.f32 %v2327_v32, %v2974_v12  ;;  %v2330_v62 = vadd.f32 %v2329_v47, %v2328_v15  ;;  %4260 = vst [vmem:[#allocation15_spill] sm:$0xff] %v3331_v22 }
 0x172   :  { %v3341_v59 = vadd.f32 %v3200_v3, %v2974_v12  ;;  %v2382_v39 = vadd.f32 %v2381_v6, %v2380_v21  ;;  %v1501_v21 = vmul.f32 %v3348_v29, %v3348_v29 }
 0x173   :  { %v1559_v31 = vadd.f32 %v1558_v9, %v1496_v26  ;;  %v1427_v52 = vadd.f32 %v1426_v36, %v3327_v40  ;;  %v1497_v38 = vmul.f32 %v3327_v40, %v3327_v40  ;;  %v3337_v25 = vadd.f32 %v2330_v62, %v2974_v12  ;;  %v2383_v9 = vpop.f32.mrb[56].mxu1 }
 0x174   :  { %v1499_v26 = vmul.f32 %v3331_v22, %v3331_v22  ;;  %v1500_v3 = vmul.f32 %v3341_v59, %v3341_v59 }
 0x175   :  { %v1560_v32 = vadd.f32 %v1559_v31, %v1497_v38  ;;  %v1428_v50 = vadd.f32 %v1427_v52, %v3337_v25  ;;  %v1498_v15 = vmul.f32 %v3337_v25, %v3337_v25  ;;  %v2384_v31 = vpop.f32.mrb[57].mxu1  ;;  %v3357_v38 = vadd.f32 %v3227_v16, %v2974_v12 }
 0x176   :  { %v2385_v56 = vadd.f32 %v2384_v31, %v2383_v9  ;;  %v2386_v62 = vpop.f32.mrb[58].mxu1  ;;  %v3369_v16 = vadd.f32 %v3259_v11, %v2974_v12  ;;  %v3376_v9 = vadd.f32 %v3279_v7, %v2974_v12 }
 0x177   :  { %v1429_v47 = vadd.f32 %v1428_v50, %v3331_v22  ;;  %v1561_v61 = vadd.f32 %v1560_v32, %v1498_v15  ;;  %4261 = vst [vmem:[#allocation16_spill] sm:$0xff] %v3357_v38  ;;  %v2387_v6 = vpop.f32.mrb[59].mxu1  ;;  %v3364_v32 = vadd.f32 %v3250_v17, %v2974_v12 }
 0x178   :  { %v2388_v22 = vadd.f32 %v2387_v6, %v2386_v62  ;;  %4263 = vst [vmem:[#allocation18_spill] sm:$0xff] %v3369_v16  ;;  %4264 = vst [vmem:[#allocation19_spill] sm:$0xff] %v3376_v9  ;;  %v1504_v11 = vmul.f32 %v3369_v16, %v3369_v16  ;;  %v3385_v62 = vadd.f32 %v3287_v28, %v2974_v12 }
 0x179   :  { %v1430_v52 = vadd.f32 %v1429_v47, %v3341_v59  ;;  %v1562_v36 = vadd.f32 %v1561_v61, %v1499_v26  ;;  %4262 = vst [vmem:[#allocation17_spill] sm:$0xff] %v3364_v32  ;;  %v1502_v26 = vmul.f32 %v3357_v38, %v3357_v38  ;;  %v1503_v17 = vmul.f32 %v3364_v32, %v3364_v32 }
 0x17a   :  { %4265 = vst [vmem:[#allocation20_spill] sm:$0xff] %v3385_v62  ;;  %v1506_v28 = vmul.f32 %v3385_v62, %v3385_v62 }
 0x17b   :  { %v1431_v50 = vadd.f32 %v1430_v52, %v3348_v29  ;;  %v1563_v15 = vadd.f32 %v1562_v36, %v1500_v3  ;;  %v2389_v52 = vpop.f32.mrb[60].mxu1 }
 0x17c   :  { %v2390_v36 = vpop.f32.mrb[61].mxu1 }
 0x17d   :  { %v1432_v47 = vadd.f32 %v1431_v50, %v3357_v38  ;;  %v1564_v61 = vadd.f32 %v1563_v15, %v1501_v21  ;;  %v2391_v7 = vadd.f32 %v2390_v36, %v2389_v52  ;;  %v2392_v50 = vpop.f32.mrb[62].mxu1  ;;  %v1505_v15 = vmul.f32 %v3376_v9, %v3376_v9 }
 0x17f   :  { %v1565_v31 = vadd.f32 %v1564_v61, %v1502_v26  ;;  %v1433_v3 = vadd.f32 %v1432_v47, %v3364_v32  ;;  %v2393_v26 = vpop.f32.mrb[63].mxu1  ;;  %v3392_v47 = vadd.f32 %v3304_v48, %v2974_v12 }
 0x180   :  { %v2394_v38 = vadd.f32 %v2393_v26, %v2392_v50 }
 0x181   :  { %v1434_v21 = vadd.f32 %v1433_v3, %v3369_v16  ;;  %v1566_v6 = vadd.f32 %v1565_v31, %v1503_v17  ;;  %4266 = vst [vmem:[#allocation21_spill] sm:$0xff] %v3392_v47  ;;  %v3400_v31 = vadd.f32 %v3315_v57, %v2974_v12  ;;  %v1507_v48 = vmul.f32 %v3392_v47, %v3392_v47 }
 0x183   :  { %v1435_v61 = vadd.f32 %v1434_v21, %v3376_v9  ;;  %v1567_v32 = vadd.f32 %v1566_v6, %v1504_v11  ;;  %4267 = vst [vmem:[#allocation22_spill] sm:$0xff] %v3400_v31  ;;  %v3406_v21 = vadd.f32 %v2379_v23, %v2974_v12  ;;  %v1508_v50 = vmul.f32 %v3400_v31, %v3400_v31 }
 0x184   :  { %v3421_v23 = vadd.f32 %v2388_v22, %v2974_v12 }
 0x185   :  { %v1436_v3 = vadd.f32 %v1435_v61, %v3385_v62  ;;  %v1568_v17 = vadd.f32 %v1567_v32, %v1505_v15  ;;  %4268 = vst [vmem:[#allocation23_spill] sm:$0xff] %v3406_v21  ;;  %v3412_v32 = vadd.f32 %v2382_v39, %v2974_v12  ;;  %v1509_v26 = vmul.f32 %v3406_v21, %v3406_v21 }
 0x186   :  { %v3418_v61 = vadd.f32 %v2385_v56, %v2974_v12  ;;  %v3427_v39 = vadd.f32 %v2391_v7, %v2974_v12  ;;  %v1512_v56 = vmul.f32 %v3421_v23, %v3421_v23 }
 0x187   :  { %v1437_v52 = vadd.f32 %v1436_v3, %v3392_v47  ;;  %v1569_v36 = vadd.f32 %v1568_v17, %v1506_v28  ;;  %v1510_v17 = vmul.f32 %v3412_v32, %v3412_v32 }
 0x189   :  { %v1570_v11 = vadd.f32 %v1569_v36, %v1507_v48  ;;  %v1438_v6 = vadd.f32 %v1437_v52, %v3400_v31  ;;  %v1511_v36 = vmul.f32 %v3418_v61, %v3418_v61 }
 0x18b   :  { %v1571_v57 = vadd.f32 %v1570_v11, %v1508_v50  ;;  %v1439_v15 = vadd.f32 %v1438_v6, %v3406_v21  ;;  %v1513_v6 = vmul.f32 %v3427_v39, %v3427_v39  ;;  %v3438_v50 = vadd.f32 %v2394_v38, %v2974_v12 }
 0x18d   :  { %v1572_v28 = vadd.f32 %v1571_v57, %v1509_v26  ;;  %v1440_v3 = vadd.f32 %v1439_v15, %v3412_v32  ;;  %4269 = vst [vmem:[#allocation24_spill] sm:$0xff] %v3438_v50 }
 0x18f   :  { %v1573_v52 = vadd.f32 %v1572_v28, %v1510_v17  ;;  %v1441_v48 = vadd.f32 %v1440_v3, %v3418_v61  ;;  %v1514_v28 = vmul.f32 %v3438_v50, %v3438_v50 }
 0x191   :  { %v1574_v22 = vadd.f32 %v1573_v52, %v1511_v36  ;;  %v1442_v11 = vadd.f32 %v1441_v48, %v3421_v23 }
 0x193   :  { %v1575_v7 = vadd.f32 %v1574_v22, %v1512_v56  ;;  %v1443_v57 = vadd.f32 %v1442_v11, %v3427_v39 }
 0x195   :  { %v1576_v15 = vadd.f32 %v1575_v7, %v1513_v6  ;;  %v1444_v26 = vadd.f32 %v1443_v57, %v3438_v50  ;;  %v1596_v50 = vlaneseq }
 0x197   :  { %v1445_v3 = vrot.slane %v1444_v26, 4  ;;  %v1577_v17 = vadd.f32 %v1576_v15, %v1514_v28  ;;  %v3444_v15 = vshrl.u32 %v1596_v50, 7 }
 0x199   :  { %v1446_v52 = vadd.f32 %v1445_v3, %v1444_v26  ;;  %v1578_v36 = vrot.slane %v1577_v17, 4  ;;  %v1591_v26 = vld [vmem:[%s4220_s3] sm:$0x1]  ;;  %v4246_v28 = vsub.s32 0, %v3444_v15 }
 0x19b   :  { %v1447_v48 = vrot.slane %v1446_v52, 2  ;;  %v1579_v21 = vadd.f32 %v1578_v36, %v1577_v17 }
 0x19d   :  { %v1448_v31 = vadd.f32 %v1447_v48, %v1446_v52  ;;  %v1580_v47 = vrot.slane %v1579_v21, 2  ;;  %v4270_v48 = vld [vmem:[#allocation2_spill] sm:$0xff] }
 0x19f   :  { %v1449_v62 = vrot.slane %v1448_v31, 1  ;;  %v1581_v12 = vadd.f32 %v1580_v47, %v1579_v21 }
 0x1a1   :  { %v1450_v38 = vadd.f32 %v1449_v62, %v1448_v31  ;;  %v1582_v56 = vrot.slane %v1581_v12, 1  ;;  %v3453_v31 = vld [vmem:[%s4221_s4] sm:$0x1] }
 0x1a3   :  { %v1583_v22 = vadd.f32 %v1582_v56, %v1581_v12  ;;  %v1584_v11 = vmul.f32 0.001953125, %v1450_v38  ;;  %v4271_v12 = vld [vmem:[#allocation3_spill] sm:$0xff]  ;;  %v4272_v38 = vld [vmem:[#allocation4_spill] sm:$0xff]  ;;  %v4273_v56 = vld [vmem:[#allocation5_spill] sm:$0xff] }
 0x1a5   :  { %v1585_v6 = vmul.f32 0.001953125, %v1583_v22  ;;  %v1586_v7 = vmul.f32 %v1584_v11, %v1584_v11  ;;  %v4274_v22 = vld [vmem:[#allocation6_spill] sm:$0xff] }
 0x1a7   :  { %v1587_v57 = vsub.f32 %v1585_v6, %v1586_v7  ;;  %v4275_v6 = vld [vmem:[#allocation7_spill] sm:$0xff] }
 0x1a9   :  { %v1588_v9 = vmax.f32 %v1587_v57, 0.0  ;;  %v4276_v57 = vld [vmem:[#allocation8_spill] sm:$0xff] }
 0x1ab   :  { %v1589_v16 = vadd.f32 1e-05, %v1588_v9 }
 0x1ad   :  { %2555 = vrsqrt.f32 %v1589_v16 }
 0x1b7   :  { %v2556_v47 = vpop.eup %2555 }
 0x1b8   :  { %v1592_v62 = vmul.f32 %v2556_v47, %v1591_v26  ;;  %v4277_v47 = vld [vmem:[#allocation9_spill] sm:$0xff] }
 0x1ba   :  { %v3455_v21 = vmul.f32 %v1592_v62, %v1584_v11  ;;  %v3459_v16 = vrot.slane %v1592_v62, %v4246_v28  ;;  %v4288_v28 = vld [vmem:[#allocation16_spill] sm:$0xff] }
 0x1bc   :  { %v1595_v9 = vsub.f32 %v3453_v31, %v3455_v21  ;;  %v3465_v50 = vmul.f32 %v3459_v16, %v2980_v19  ;;  %v3469_v3 = vmul.f32 %v3459_v16, %v2977_v14  ;;  %v3473_v17 = vmul.f32 %v3459_v16, %v2983_v20  ;;  %v4278_v31 = vld [vmem:[#allocation10_spill] sm:$0xff] }
 0x1bd   :  { %v3477_v52 = vmul.f32 %v3459_v16, %v2994_v30  ;;  %v3481_v36 = vmul.f32 %v3459_v16, %v3001_v35  ;;  %v3485_v19 = vmul.f32 %v3459_v16, %v3011_v49  ;;  %v3489_v14 = vmul.f32 %v3459_v16, %v3015_v53 }
 0x1be   :  { %v3493_v20 = vmul.f32 %v3459_v16, %v3025_v0  ;;  %v3497_v30 = vmul.f32 %v3459_v16, %v3031_v8  ;;  %v3501_v35 = vmul.f32 %v3459_v16, %v3041_v18  ;;  %v3505_v49 = vmul.f32 %v3459_v16, %v3046_v33 }
 0x1bf   :  { %v3509_v53 = vmul.f32 %v3459_v16, %v3058_v44  ;;  %v3513_v0 = vmul.f32 %v3459_v16, %v3064_v60  ;;  %v3517_v8 = vmul.f32 %v3459_v16, %v3072_v4  ;;  %v3521_v18 = vmul.f32 %v3459_v16, %v3081_v27 }
 0x1c0   :  { %v3525_v33 = vmul.f32 %v3459_v16, %v3093_v41  ;;  %v3529_v44 = vmul.f32 %v3459_v16, %v3087_v34  ;;  %v3533_v60 = vmul.f32 %v3459_v16, %v3097_v43  ;;  %v3537_v4 = vmul.f32 %v3459_v16, %v3108_v55 }
 0x1c1   :  { %v3541_v27 = vmul.f32 %v3459_v16, %v3117_v2  ;;  %v3545_v41 = vmul.f32 %v3459_v16, %v3124_v10  ;;  %v3549_v34 = vmul.f32 %v3459_v16, %v3131_v54  ;;  %v3553_v43 = vmul.f32 %v3459_v16, %v3140_v37 }
 0x1c2   :  { %v3557_v55 = vmul.f32 %v3459_v16, %v3149_v51  ;;  %v3561_v2 = vmul.f32 %v3459_v16, %v3156_v58  ;;  %v3565_v10 = vmul.f32 %v3459_v16, %v3163_v42  ;;  %v3569_v54 = vmul.f32 %v3459_v16, %v3173_v5 }
 0x1c3   :  { %v3573_v37 = vmul.f32 %v3459_v16, %v3182_v24  ;;  %v3577_v51 = vmul.f32 %v3459_v16, %v3192_v63  ;;  %v3581_v58 = vmul.f32 %v3459_v16, %v3195_v1  ;;  %v3585_v42 = vmul.f32 %v3459_v16, %v3198_v45 }
 0x1c4   :  { %v3589_v5 = vmul.f32 %v3459_v16, %v4270_v48  ;;  %v3593_v24 = vmul.f32 %v3459_v16, %v4271_v12  ;;  %v3597_v63 = vmul.f32 %v3459_v16, %v4272_v38  ;;  %v3601_v1 = vmul.f32 %v3459_v16, %v4273_v56  ;;  %v4279_v48 = vld [vmem:[#allocation11_spill] sm:$0xff]  ;;  %v4280_v12 = vld [vmem:[#allocation12_spill] sm:$0xff]  ;;  %v4281_v56 = vld [vmem:[#allocation13_spill] sm:$0xff] }
 0x1c5   :  { %v3605_v45 = vmul.f32 %v3459_v16, %v4274_v22  ;;  %v3609_v11 = vmul.f32 %v3459_v16, %v3248_v46  ;;  %v3613_v7 = vmul.f32 %v3459_v16, %v4275_v6  ;;  %v3617_v26 = vmul.f32 %v3459_v16, %v4276_v57  ;;  %v4282_v6 = vld [vmem:[#allocation14_spill] sm:$0xff] }
 0x1c6   :  { %v3621_v62 = vmul.f32 %v3459_v16, %v4277_v47  ;;  %v3625_v21 = vmul.f32 %v3459_v16, %v4278_v31  ;;  %v3629_v46 = vmul.f32 %v3459_v16, %v4279_v48  ;;  %v3633_v38 = vmul.f32 %v3459_v16, %v4280_v12  ;;  %v4284_v12 = vld [vmem:[#allocation15_spill] sm:$0xff] }
 0x1c7   :  { %v3637_v22 = vmul.f32 %v3459_v16, %v4281_v56  ;;  %v3641_v57 = vmul.f32 %v3459_v16, %v4282_v6  ;;  %v3645_v47 = vmul.f32 %v3459_v16, %v3313_v13  ;;  %v3649_v31 = vmul.f32 %v3459_v16, %v3327_v40 }
 0x1c8   :  { %v3653_v48 = vmul.f32 %v3459_v16, %v3337_v25  ;;  %v3657_v56 = vmul.f32 %v3459_v16, %v4284_v12  ;;  %v3661_v6 = vmul.f32 %v3459_v16, %v3341_v59  ;;  %v3665_v13 = vmul.f32 %v3459_v16, %v3348_v29 }
 0x1c9   :  { %4283 = vst [vmem:[#allocation2_spill] sm:$0xff] %v3649_v31  ;;  %v3669_v40 = vmul.f32 %v3459_v16, %v4288_v28  ;;  %v4290_v31 = vld [vmem:[#allocation17_spill] sm:$0xff]  ;;  %v3677_v12 = vmul.f32 %v3459_v16, %v3412_v32  ;;  %v3681_v59 = vmul.f32 %v3459_v16, %v3418_v61  ;;  %v3685_v29 = vmul.f32 %v3459_v16, %v3421_v23  ;;  %v4298_v32 = vld [vmem:[#allocation24_spill] sm:$0xff] }
 0x1ca   :  { %4285 = vst [vmem:[#allocation3_spill] sm:$0xff] %v3657_v56  ;;  %4286 = vst [vmem:[#allocation4_spill] sm:$0xff] %v3661_v6  ;;  %v3673_v25 = vmul.f32 %v3459_v16, %v4290_v31  ;;  %v3689_v28 = vmul.f32 %v3459_v16, %v3427_v39  ;;  %v4299_v61 = vsub.s32 0, %v3444_v15  ;;  %v4300_v23 = vld [vmem:[#allocation20_spill] sm:$0xff]  ;;  %v4301_v6 = vld [vmem:[#allocation21_spill] sm:$0xff] }
 0x1cb   :  { %4287 = vst [vmem:[#allocation5_spill] sm:$0xff] %v3665_v13  ;;  %4289 = vst [vmem:[#allocation6_spill] sm:$0xff] %v3669_v40  ;;  %v4296_v40 = vld [vmem:[#allocation18_spill] sm:$0xff]  ;;  %v1656_v39 = vmul.f32 %v3459_v16, %v4301_v6  ;;  %v4303_v56 = vld [vmem:[#allocation23_spill] sm:$0xff] }
 0x1cc   :  { %4291 = vst [vmem:[#allocation7_spill] sm:$0xff] %v3673_v25  ;;  %4292 = vst [vmem:[#allocation8_spill] sm:$0xff] %v3677_v12  ;;  %v1653_v31 = vmul.f32 %v3459_v16, %v4296_v40  ;;  %v4297_v25 = vld [vmem:[#allocation19_spill] sm:$0xff]  ;;  %v3697_v12 = vmul.f32 %v3459_v16, %v4298_v32 }
 0x1cd   :  { %4293 = vst [vmem:[#allocation9_spill] sm:$0xff] %v3681_v59  ;;  %4294 = vst [vmem:[#allocation10_spill] sm:$0xff] %v3685_v29  ;;  %v1654_v13 = vmul.f32 %v3459_v16, %v4297_v25  ;;  %v3701_v59 = vrot.slane %v1595_v9, %v4299_v61  ;;  %v1655_v29 = vmul.f32 %v3459_v16, %v4300_v23 }
 0x1ce   :  { %4295 = vst [vmem:[#allocation11_spill] sm:$0xff] %v3689_v28  ;;  %v4302_v28 = vld [vmem:[#allocation22_spill] sm:$0xff]  ;;  %v1658_v25 = vmul.f32 %v3459_v16, %v4303_v56 }
 0x1cf   :  { %v1657_v40 = vmul.f32 %v3459_v16, %v4302_v28  ;;  %v3713_v32 = vadd.f32 %v3701_v59, %v3465_v50  ;;  %v3717_v15 = vadd.f32 %v3701_v59, %v3469_v3  ;;  %v3721_v9 = vadd.f32 %v3701_v59, %v3473_v17 }
 0x1d0   :  { %v3725_v6 = vadd.f32 %v3701_v59, %v3477_v52  ;;  %v3729_v28 = vadd.f32 %v3701_v59, %v3481_v36  ;;  %v3733_v16 = vadd.f32 %v3701_v59, %v3485_v19  ;;  %v3737_v50 = vadd.f32 %v3701_v59, %v3489_v14 }
 0x1d1   :  { %v3741_v3 = vadd.f32 %v3701_v59, %v3493_v20  ;;  %v3745_v17 = vadd.f32 %v3701_v59, %v3497_v30  ;;  %v3749_v52 = vadd.f32 %v3701_v59, %v3501_v35  ;;  %v3753_v36 = vadd.f32 %v3701_v59, %v3505_v49  ;;  %v4308_v56 = vld [vmem:[#allocation3_spill] sm:$0xff]  ;;  %v4309_v61 = vld [vmem:[#allocation4_spill] sm:$0xff] }
 0x1d2   :  { %v3757_v19 = vadd.f32 %v3701_v59, %v3509_v53  ;;  %v3761_v14 = vadd.f32 %v3701_v59, %v3513_v0  ;;  %v3765_v20 = vadd.f32 %v3701_v59, %v3517_v8  ;;  %v3769_v30 = vadd.f32 %v3701_v59, %v3521_v18  ;;  %v4310_v23 = vld [vmem:[#allocation5_spill] sm:$0xff] }
 0x1d3   :  { %v3773_v35 = vadd.f32 %v3701_v59, %v3525_v33  ;;  %v3777_v49 = vadd.f32 %v3701_v59, %v3529_v44  ;;  %v3781_v53 = vadd.f32 %v3701_v59, %v3533_v60  ;;  %v3785_v0 = vadd.f32 %v3701_v59, %v3537_v4 }
 0x1d4   :  { %v3789_v8 = vadd.f32 %v3701_v59, %v3541_v27  ;;  %v3793_v18 = vadd.f32 %v3701_v59, %v3545_v41  ;;  %v3797_v33 = vadd.f32 %v3701_v59, %v3549_v34  ;;  %v3801_v44 = vadd.f32 %v3701_v59, %v3553_v43 }
 0x1d5   :  { %v3805_v60 = vadd.f32 %v3701_v59, %v3557_v55  ;;  %v3809_v4 = vadd.f32 %v3701_v59, %v3561_v2  ;;  %v3813_v27 = vadd.f32 %v3701_v59, %v3565_v10  ;;  %v3817_v41 = vadd.f32 %v3701_v59, %v3569_v54 }
 0x1d6   :  { %v3821_v34 = vadd.f32 %v3701_v59, %v3573_v37  ;;  %v3825_v43 = vadd.f32 %v3701_v59, %v3577_v51  ;;  %v3829_v55 = vadd.f32 %v3701_v59, %v3581_v58  ;;  %v3833_v2 = vadd.f32 %v3701_v59, %v3585_v42 }
 0x1d7   :  { %v3837_v10 = vadd.f32 %v3701_v59, %v3589_v5  ;;  %v3841_v54 = vadd.f32 %v3701_v59, %v3593_v24  ;;  %v3845_v37 = vadd.f32 %v3701_v59, %v3597_v63  ;;  %v3849_v51 = vadd.f32 %v3701_v59, %v3601_v1 }
 0x1d8   :  { %v3853_v58 = vadd.f32 %v3701_v59, %v3605_v45  ;;  %v3857_v42 = vadd.f32 %v3701_v59, %v3609_v11  ;;  %v3861_v5 = vadd.f32 %v3701_v59, %v3613_v7  ;;  %v3865_v24 = vadd.f32 %v3701_v59, %v3617_v26 }
 0x1d9   :  { %v3869_v63 = vadd.f32 %v3701_v59, %v3621_v62  ;;  %v3873_v1 = vadd.f32 %v3701_v59, %v3625_v21  ;;  %v3877_v45 = vadd.f32 %v3701_v59, %v3629_v46  ;;  %v3881_v11 = vadd.f32 %v3701_v59, %v3633_v38  ;;  %v4305_v21 = vld [vmem:[#allocation2_spill] sm:$0xff] }
 0x1da   :  { %v3885_v7 = vadd.f32 %v3701_v59, %v3637_v22  ;;  %v3889_v26 = vadd.f32 %v3701_v59, %v3641_v57  ;;  %v3893_v62 = vadd.f32 %v3701_v59, %v3645_v47  ;;  %v3897_v46 = vadd.f32 %v3701_v59, %v4305_v21 }
 0x1db   :  { %v3901_v38 = vadd.f32 %v3701_v59, %v3653_v48  ;;  %v3905_v22 = vadd.f32 %v3701_v59, %v4308_v56  ;;  %v3909_v57 = vadd.f32 %v3701_v59, %v4309_v61  ;;  %v3913_v47 = vadd.f32 %v3701_v59, %v4310_v23 }
 0x1dc   :  { %4304 = vst [vmem:[#allocation12_spill] sm:$0xff] %v3893_v62  ;;  %4306 = vst [vmem:[#allocation13_spill] sm:$0xff] %v3897_v46  ;;  %v4312_v62 = vld [vmem:[#allocation6_spill] sm:$0xff]  ;;  %v4313_v46 = vld [vmem:[#allocation7_spill] sm:$0xff]  ;;  %v3927_v56 = vadd.f32 %v3701_v59, %v1654_v13  ;;  %v3930_v61 = vadd.f32 %v3701_v59, %v1655_v29  ;;  %v3933_v23 = vadd.f32 %v3701_v59, %v1656_v39 }
 0x1dd   :  { %4307 = vst [vmem:[#allocation14_spill] sm:$0xff] %v3901_v38  ;;  %4311 = vst [vmem:[#allocation15_spill] sm:$0xff] %v3913_v47  ;;  %v3917_v21 = vadd.f32 %v3701_v59, %v4312_v62  ;;  %v3921_v48 = vadd.f32 %v3701_v59, %v4313_v46  ;;  %v3924_v38 = vadd.f32 %v3701_v59, %v1653_v31  ;;  %v4317_v46 = vld [vmem:[#allocation8_spill] sm:$0xff]  ;;  %v4319_v31 = vld [vmem:[#allocation9_spill] sm:$0xff] }
 0x1de   :  { %4315 = vst [vmem:[#allocation17_spill] sm:$0xff] %v3927_v56  ;;  %4316 = vst [vmem:[#allocation18_spill] sm:$0xff] %v3933_v23  ;;  %v3936_v47 = vadd.f32 %v3701_v59, %v1657_v40  ;;  %v3939_v62 = vadd.f32 %v3701_v59, %v1658_v25  ;;  %v3947_v13 = vadd.f32 %v3701_v59, %v4319_v31  ;;  %v4321_v56 = vld [vmem:[#allocation10_spill] sm:$0xff]  ;;  %v4323_v39 = vld [vmem:[#allocation11_spill] sm:$0xff]  ;;  %v1734_v25 = vmax.f32 %v3713_v32, 0.0 }
 0x1df   :  { %4314 = vst [vmem:[#allocation16_spill] sm:$0xff] %v3921_v48  ;;  %v3943_v48 = vadd.f32 %v3701_v59, %v4317_v46  ;;  %v3951_v29 = vadd.f32 %v3701_v59, %v4321_v56  ;;  %v3955_v23 = vadd.f32 %v3701_v59, %v4323_v39  ;;  %v3959_v40 = vadd.f32 %v3701_v59, %v3697_v12 }
 0x1e0   :  { %4320 = vst [vmem:[#allocation24_spill] sm:$0xff] %v3947_v13  ;;  %v1735_v46 = vmax.f32 %v3717_v15, 0.0  ;;  %v1737_v31 = vmax.f32 %v3725_v6, 0.0  ;;  %v1738_v13 = vmax.f32 %v3729_v28, 0.0  ;;  %v1739_v56 = vmax.f32 %v3733_v16, 0.0  ;;  %1798 = vst [vmem:[%s4222_s5] sm:$0xff] %v1734_v25 }
 0x1e1   :  { %4318 = vst [vmem:[#allocation19_spill] sm:$0xff] %v3943_v48  ;;  %4322 = vst [vmem:[#allocation20_spill] sm:$0xff] %v3951_v29  ;;  %v1736_v48 = vmax.f32 %v3721_v9, 0.0  ;;  %v1740_v29 = vmax.f32 %v3737_v50, 0.0  ;;  %v1741_v39 = vmax.f32 %v3741_v3, 0.0  ;;  %v1743_v12 = vmax.f32 %v3749_v52, 0.0 }
 0x1e2   :  { %4324 = vst [vmem:[#allocation21_spill] sm:$0xff] %v3955_v23  ;;  %v1742_v23 = vmax.f32 %v3745_v17, 0.0  ;;  %v1744_v59 = vmax.f32 %v3753_v36, 0.0  ;;  %v1745_v32 = vmax.f32 %v3757_v19, 0.0  ;;  %1799 = vst [vmem:[%s4222_s5 + $0x8] sm:$0xff] %v1735_v46  ;;  %v1746_v15 = vmax.f32 %v3761_v14, 0.0 }
 0x1e3   :  { %1800 = vst [vmem:[%s4222_s5 + $0x10] sm:$0xff] %v1736_v48  ;;  %1801 = vst [vmem:[%s4222_s5 + $0x18] sm:$0xff] %v1737_v31  ;;  %v1747_v9 = vmax.f32 %v3765_v20, 0.0  ;;  %v1748_v6 = vmax.f32 %v3769_v30, 0.0  ;;  %v1749_v28 = vmax.f32 %v3773_v35, 0.0  ;;  %v1750_v16 = vmax.f32 %v3777_v49, 0.0 }
 0x1e4   :  { %1802 = vst [vmem:[%s4222_s5 + $0x20] sm:$0xff] %v1738_v13  ;;  %1803 = vst [vmem:[%s4222_s5 + $0x28] sm:$0xff] %v1739_v56  ;;  %v1751_v50 = vmax.f32 %v3781_v53, 0.0  ;;  %v1752_v3 = vmax.f32 %v3785_v0, 0.0  ;;  %v1753_v17 = vmax.f32 %v3789_v8, 0.0  ;;  %v1754_v52 = vmax.f32 %v3793_v18, 0.0 }
 0x1e5   :  { %1804 = vst [vmem:[%s4222_s5 + $0x30] sm:$0xff] %v1740_v29  ;;  %1805 = vst [vmem:[%s4222_s5 + $0x38] sm:$0xff] %v1741_v39  ;;  %v1755_v36 = vmax.f32 %v3797_v33, 0.0  ;;  %v1756_v19 = vmax.f32 %v3801_v44, 0.0  ;;  %v1757_v14 = vmax.f32 %v3805_v60, 0.0  ;;  %v1758_v20 = vmax.f32 %v3809_v4, 0.0 }
 0x1e6   :  { %1806 = vst [vmem:[%s4222_s5 + $0x40] sm:$0xff] %v1742_v23  ;;  %1807 = vst [vmem:[%s4222_s5 + $0x48] sm:$0xff] %v1743_v12  ;;  %v1759_v30 = vmax.f32 %v3813_v27, 0.0  ;;  %v1760_v35 = vmax.f32 %v3817_v41, 0.0  ;;  %v1761_v49 = vmax.f32 %v3821_v34, 0.0  ;;  %v1762_v53 = vmax.f32 %v3825_v43, 0.0 }
 0x1e7   :  { %1808 = vst [vmem:[%s4222_s5 + $0x50] sm:$0xff] %v1744_v59  ;;  %1809 = vst [vmem:[%s4222_s5 + $0x58] sm:$0xff] %v1745_v32  ;;  %v1763_v0 = vmax.f32 %v3829_v55, 0.0  ;;  %v1764_v8 = vmax.f32 %v3833_v2, 0.0  ;;  %v1765_v18 = vmax.f32 %v3837_v10, 0.0  ;;  %v1766_v33 = vmax.f32 %v3841_v54, 0.0 }
 0x1e8   :  { %1810 = vst [vmem:[%s4222_s5 + $0x60] sm:$0xff] %v1746_v15  ;;  %1811 = vst [vmem:[%s4222_s5 + $0x68] sm:$0xff] %v1747_v9  ;;  %v1767_v44 = vmax.f32 %v3845_v37, 0.0  ;;  %v1768_v60 = vmax.f32 %v3849_v51, 0.0  ;;  %v1769_v4 = vmax.f32 %v3853_v58, 0.0  ;;  %v1770_v27 = vmax.f32 %v3857_v42, 0.0 }
 0x1e9   :  { %1812 = vst [vmem:[%s4222_s5 + $0x70] sm:$0xff] %v1748_v6  ;;  %1813 = vst [vmem:[%s4222_s5 + $0x78] sm:$0xff] %v1749_v28  ;;  %v1771_v41 = vmax.f32 %v3861_v5, 0.0  ;;  %v1772_v34 = vmax.f32 %v3865_v24, 0.0  ;;  %v1773_v43 = vmax.f32 %v3869_v63, 0.0  ;;  %v1774_v55 = vmax.f32 %v3873_v1, 0.0 }
 0x1ea   :  { %1814 = vst [vmem:[%s4222_s5 + $0x80] sm:$0xff] %v1750_v16  ;;  %1815 = vst [vmem:[%s4222_s5 + $0x88] sm:$0xff] %v1751_v50  ;;  %v1775_v2 = vmax.f32 %v3877_v45, 0.0  ;;  %v1776_v10 = vmax.f32 %v3881_v11, 0.0  ;;  %v1777_v54 = vmax.f32 %v3885_v7, 0.0  ;;  %v1778_v37 = vmax.f32 %v3889_v26, 0.0 }
 0x1eb   :  { %1816 = vst [vmem:[%s4222_s5 + $0x90] sm:$0xff] %v1752_v3  ;;  %1817 = vst [vmem:[%s4222_s5 + $0x98] sm:$0xff] %v1753_v17  ;;  %v4325_v51 = vld [vmem:[#allocation12_spill] sm:$0xff]  ;;  %v4326_v42 = vld [vmem:[#allocation13_spill] sm:$0xff]  ;;  %v1782_v1 = vmax.f32 %v3905_v22, 0.0  ;;  %v1783_v45 = vmax.f32 %v3909_v57, 0.0 }
 0x1ec   :  { %1818 = vst [vmem:[%s4222_s5 + $0xa0] sm:$0xff] %v1754_v52  ;;  %1819 = vst [vmem:[%s4222_s5 + $0xa8] sm:$0xff] %v1755_v36  ;;  %v1779_v58 = vmax.f32 %v4325_v51, 0.0  ;;  %v1780_v5 = vmax.f32 %v4326_v42, 0.0  ;;  %v4327_v24 = vld [vmem:[#allocation14_spill] sm:$0xff]  ;;  %v4328_v11 = vld [vmem:[#allocation15_spill] sm:$0xff] }
 0x1ed   :  { %1820 = vst [vmem:[%s4222_s5 + $0xb0] sm:$0xff] %v1756_v19  ;;  %1821 = vst [vmem:[%s4222_s5 + $0xb8] sm:$0xff] %v1757_v14  ;;  %v1781_v63 = vmax.f32 %v4327_v24, 0.0  ;;  %v1784_v7 = vmax.f32 %v4328_v11, 0.0  ;;  %v1785_v26 = vmax.f32 %v3917_v21, 0.0  ;;  %v4329_v22 = vld [vmem:[#allocation16_spill] sm:$0xff] }
 0x1ee   :  { %1822 = vst [vmem:[%s4222_s5 + $0xc0] sm:$0xff] %v1758_v20  ;;  %1823 = vst [vmem:[%s4222_s5 + $0xc8] sm:$0xff] %v1759_v30  ;;  %v1786_v57 = vmax.f32 %v4329_v22, 0.0  ;;  %v1787_v21 = vmax.f32 %v3924_v38, 0.0  ;;  %v4330_v48 = vld [vmem:[#allocation17_spill] sm:$0xff]  ;;  %v1789_v13 = vmax.f32 %v3930_v61, 0.0 }
 0x1ef   :  { %1824 = vst [vmem:[%s4222_s5 + $0xd0] sm:$0xff] %v1760_v35  ;;  %1825 = vst [vmem:[%s4222_s5 + $0xd8] sm:$0xff] %v1761_v49  ;;  %v1788_v23 = vmax.f32 %v4330_v48, 0.0  ;;  %v4331_v38 = vld [vmem:[#allocation18_spill] sm:$0xff]  ;;  %v1791_v61 = vmax.f32 %v3936_v47, 0.0  ;;  %v1792_v25 = vmax.f32 %v3939_v62, 0.0 }
 0x1f0   :  { %1826 = vst [vmem:[%s4222_s5 + $0xe0] sm:$0xff] %v1762_v53  ;;  %1827 = vst [vmem:[%s4222_s5 + $0xe8] sm:$0xff] %v1763_v0  ;;  %v1790_v29 = vmax.f32 %v4331_v38, 0.0  ;;  %v4332_v46 = vld [vmem:[#allocation19_spill] sm:$0xff]  ;;  %v4333_v47 = vld [vmem:[#allocation24_spill] sm:$0xff]  ;;  %v1797_v32 = vmax.f32 %v3959_v40, 0.0 }
 0x1f1   :  { %1828 = vst [vmem:[%s4222_s5 + $0xf0] sm:$0xff] %v1764_v8  ;;  %1829 = vst [vmem:[%s4222_s5 + $0xf8] sm:$0xff] %v1765_v18  ;;  %v1793_v31 = vmax.f32 %v4332_v46, 0.0  ;;  %v1794_v62 = vmax.f32 %v4333_v47, 0.0  ;;  %v4334_v56 = vld [vmem:[#allocation20_spill] sm:$0xff]  ;;  %v4335_v12 = vld [vmem:[#allocation21_spill] sm:$0xff] }
 0x1f2   :  { %1830 = vst [vmem:[%s4222_s5 + $0x100] sm:$0xff] %v1766_v33  ;;  %1831 = vst [vmem:[%s4222_s5 + $0x108] sm:$0xff] %v1767_v44  ;;  %v1795_v39 = vmax.f32 %v4334_v56, 0.0  ;;  %v1796_v59 = vmax.f32 %v4335_v12, 0.0 }
 0x1f3   :  { %1832 = vst [vmem:[%s4222_s5 + $0x110] sm:$0xff] %v1768_v60  ;;  %1833 = vst [vmem:[%s4222_s5 + $0x118] sm:$0xff] %v1769_v4 }
 0x1f4   :  { %1834 = vst [vmem:[%s4222_s5 + $0x120] sm:$0xff] %v1770_v27  ;;  %1835 = vst [vmem:[%s4222_s5 + $0x128] sm:$0xff] %v1771_v41 }
 0x1f5   :  { %1836 = vst [vmem:[%s4222_s5 + $0x130] sm:$0xff] %v1772_v34  ;;  %1837 = vst [vmem:[%s4222_s5 + $0x138] sm:$0xff] %v1773_v43 }
 0x1f6   :  { %1838 = vst [vmem:[%s4222_s5 + $0x140] sm:$0xff] %v1774_v55  ;;  %1839 = vst [vmem:[%s4222_s5 + $0x148] sm:$0xff] %v1775_v2 }
 0x1f7   :  { %1840 = vst [vmem:[%s4222_s5 + $0x150] sm:$0xff] %v1776_v10  ;;  %1841 = vst [vmem:[%s4222_s5 + $0x158] sm:$0xff] %v1777_v54 }
 0x1f8   :  { %1842 = vst [vmem:[%s4222_s5 + $0x160] sm:$0xff] %v1778_v37  ;;  %1843 = vst [vmem:[%s4222_s5 + $0x168] sm:$0xff] %v1779_v58 }
 0x1f9   :  { %1844 = vst [vmem:[%s4222_s5 + $0x170] sm:$0xff] %v1780_v5  ;;  %1845 = vst [vmem:[%s4222_s5 + $0x178] sm:$0xff] %v1781_v63 }
 0x1fa   :  { %1846 = vst [vmem:[%s4222_s5 + $0x180] sm:$0xff] %v1782_v1  ;;  %1847 = vst [vmem:[%s4222_s5 + $0x188] sm:$0xff] %v1783_v45 }
 0x1fb   :  { %1848 = vst [vmem:[%s4222_s5 + $0x190] sm:$0xff] %v1784_v7  ;;  %1849 = vst [vmem:[%s4222_s5 + $0x198] sm:$0xff] %v1785_v26 }
 0x1fc   :  { %1850 = vst [vmem:[%s4222_s5 + $0x1a0] sm:$0xff] %v1786_v57  ;;  %1851 = vst [vmem:[%s4222_s5 + $0x1a8] sm:$0xff] %v1787_v21 }
 0x1fd   :  { %1852 = vst [vmem:[%s4222_s5 + $0x1b0] sm:$0xff] %v1788_v23  ;;  %1853 = vst [vmem:[%s4222_s5 + $0x1b8] sm:$0xff] %v1789_v13 }
 0x1fe   :  { %1854 = vst [vmem:[%s4222_s5 + $0x1c0] sm:$0xff] %v1790_v29  ;;  %1855 = vst [vmem:[%s4222_s5 + $0x1c8] sm:$0xff] %v1791_v61 }
 0x1ff   :  { %1856 = vst [vmem:[%s4222_s5 + $0x1d0] sm:$0xff] %v1792_v25  ;;  %1857 = vst [vmem:[%s4222_s5 + $0x1d8] sm:$0xff] %v1793_v31 }
 0x200   :  { %1858 = vst [vmem:[%s4222_s5 + $0x1e0] sm:$0xff] %v1794_v62  ;;  %1859 = vst [vmem:[%s4222_s5 + $0x1e8] sm:$0xff] %v1795_v39 }
 0x201   :  { %1860 = vst [vmem:[%s4222_s5 + $0x1f0] sm:$0xff] %v1796_v59  ;;  %1861 = vst [vmem:[%s4222_s5 + $0x1f8] sm:$0xff] %v1797_v32 }

// kernel: decoder_forward.7
= control target key start
LH: loop header
LB: loop body
LE: loop exit
PB: predicated region body
PF: predicated region fallthrough
CT: control target
= control target key end

     0   :  { %s6330_s1 = inlined_call_operand.vmem [shape: bf16[4,128,128], index: 1, kind: input, shape index: {}]   ;;  %s6331_s0 = inlined_call_operand.vmem [shape: bf16[4,512,128], index: 0, kind: input, shape index: {}]   ;;  %s6332_s2 = inlined_call_operand.vmem [shape: f32[1,128], index: 2, kind: input, shape index: {}]   ;;  %s6333_s3 = inlined_call_operand.vmem [shape: f32[2048,128], index: 3, kind: output, shape index: {}]  }
   0x1   :  { %v4117_v0 = vld [vmem:[%s6330_s1] sm:$0xff]   ;;  %v4119_v2 = vld [vmem:[%s6330_s1 + $0x8] sm:$0xff]   ;;  %v4121_v4 = vld [vmem:[%s6330_s1 + $0x10] sm:$0xff]  }
   0x2   :  { %v4118_v1 = vld [vmem:[%s6330_s1 + $0x40] sm:$0xff]   ;;  %3797 = vmatprep.subr.bf16.mxu0 %v4117_v0  ;;  %v4120_v3 = vld [vmem:[%s6330_s1 + $0x48] sm:$0xff]   ;;  %v4122_v5 = vld [vmem:[%s6330_s1 + $0x50] sm:$0xff]  }
   0x3   :  { %3877 = vmatprep.subr.bf16.mxu1 %v4118_v1  ;;  %3798 = vmatpush3.bf16.msra.mxu0 %v4117_v0  ;;  %v4123_v6 = vld [vmem:[%s6330_s1 + $0x18] sm:$0xff]   ;;  %v4125_v8 = vld [vmem:[%s6330_s1 + $0x20] sm:$0xff]   ;;  %v4127_v10 = vld [vmem:[%s6330_s1 + $0x28] sm:$0xff]  }
   0x4   :  { %3878 = vmatpush3.bf16.msra.mxu1 %v4118_v1  ;;  %3799 = vmatprep.subr.bf16.mxu0 %v4119_v2  ;;  %v4124_v7 = vld [vmem:[%s6330_s1 + $0x58] sm:$0xff]   ;;  %v4126_v9 = vld [vmem:[%s6330_s1 + $0x60] sm:$0xff]   ;;  %v4128_v11 = vld [vmem:[%s6330_s1 + $0x68] sm:$0xff]  }
   0x5   :  { %3879 = vmatprep.subr.bf16.mxu1 %v4120_v3  ;;  %v4133_v12 = vld [vmem:[%s6331_s0] sm:$0xff]   ;;  %v4129_v14 = vld [vmem:[%s6330_s1 + $0x30] sm:$0xff]   ;;  %v4131_v16 = vld [vmem:[%s6330_s1 + $0x38] sm:$0xff]  }
   0x6   :  { %v4134_v13 = vld [vmem:[%s6331_s0 + $0x100] sm:$0xff]   ;;  %3813 = vmatprep.mubr.bf16.mxu0 %v4133_v12  ;;  %v4130_v15 = vld [vmem:[%s6330_s1 + $0x70] sm:$0xff]   ;;  %v4132_v17 = vld [vmem:[%s6330_s1 + $0x78] sm:$0xff]  }
   0x7   :  { %3800 = vmatpush3.bf16.msra.mxu0 %v4119_v2  ;;  %3893 = vmatprep.mubr.bf16.mxu1 %v4134_v13  ;;  %v4135_v18 = vld [vmem:[%s6331_s0 + $0x8] sm:$0xff]   ;;  %v4137_v19 = vld [vmem:[%s6330_s1 + $0x80] sm:$0xff]   ;;  %v4139_v22 = vld [vmem:[%s6331_s0 + $0x10] sm:$0xff]  }
   0x8   :  { %3880 = vmatpush3.bf16.msra.mxu1 %v4120_v3  ;;  %3801 = vmatprep.subr.bf16.mxu0 %v4121_v4  ;;  %v4138_v20 = vld [vmem:[%s6330_s1 + $0xc0] sm:$0xff]   ;;  %v4136_v21 = vld [vmem:[%s6331_s0 + $0x108] sm:$0xff]   ;;  %v4140_v23 = vld [vmem:[%s6331_s0 + $0x110] sm:$0xff]  }
   0x9   :  { %3881 = vmatprep.subr.bf16.mxu1 %v4122_v5  ;;  %v4147_v24 = vld [vmem:[%s6330_s1 + $0x88] sm:$0xff]   ;;  %v4141_v26 = vld [vmem:[%s6331_s0 + $0x18] sm:$0xff]   ;;  %v4143_v28 = vld [vmem:[%s6331_s0 + $0x20] sm:$0xff]  }
   0xa   :  { %v4148_v25 = vld [vmem:[%s6330_s1 + $0xc8] sm:$0xff]   ;;  %v4142_v27 = vld [vmem:[%s6331_s0 + $0x118] sm:$0xff]   ;;  %v4144_v29 = vld [vmem:[%s6331_s0 + $0x120] sm:$0xff]  }
   0xb   :  { %3802 = vmatpush3.bf16.msra.mxu0 %v4121_v4  ;;  %v4157_v30 = vld [vmem:[%s6330_s1 + $0x90] sm:$0xff]   ;;  %v4145_v32 = vld [vmem:[%s6331_s0 + $0x28] sm:$0xff]   ;;  %v4167_v36 = vld [vmem:[%s6330_s1 + $0x98] sm:$0xff]  }
   0xc   :  { %3882 = vmatpush3.bf16.msra.mxu1 %v4122_v5  ;;  %3803 = vmatprep.subr.bf16.mxu0 %v4123_v6  ;;  %v4158_v31 = vld [vmem:[%s6330_s1 + $0xd0] sm:$0xff]   ;;  %v4146_v33 = vld [vmem:[%s6331_s0 + $0x128] sm:$0xff]   ;;  %v4168_v37 = vld [vmem:[%s6330_s1 + $0xd8] sm:$0xff]  }
   0xd   :  { %3883 = vmatprep.subr.bf16.mxu1 %v4124_v7  ;;  %v4149_v34 = vld [vmem:[%s6331_s0 + $0x30] sm:$0xff]   ;;  %v4151_v38 = vld [vmem:[%s6331_s0 + $0x38] sm:$0xff]   ;;  %v4153_v40 = vld [vmem:[%s6331_s0 + $0x40] sm:$0xff]  }
   0xe   :  { %v4150_v35 = vld [vmem:[%s6331_s0 + $0x130] sm:$0xff]   ;;  %v4152_v39 = vld [vmem:[%s6331_s0 + $0x138] sm:$0xff]   ;;  %v4154_v41 = vld [vmem:[%s6331_s0 + $0x140] sm:$0xff]  }
   0xf   :  { %3804 = vmatpush3.bf16.msra.mxu0 %v4123_v6  ;;  %v4155_v42 = vld [vmem:[%s6331_s0 + $0x48] sm:$0xff]   ;;  %v4177_v43 = vld [vmem:[%s6330_s1 + $0xa0] sm:$0xff]   ;;  %v4159_v46 = vld [vmem:[%s6331_s0 + $0x50] sm:$0xff]  }
  0x10   :  { %3884 = vmatpush3.bf16.msra.mxu1 %v4124_v7  ;;  %3805 = vmatprep.subr.bf16.mxu0 %v4125_v8  ;;  %v4178_v44 = vld [vmem:[%s6330_s1 + $0xe0] sm:$0xff]   ;;  %v4156_v45 = vld [vmem:[%s6331_s0 + $0x148] sm:$0xff]   ;;  %v4160_v47 = vld [vmem:[%s6331_s0 + $0x150] sm:$0xff]  }
  0x11   :  { %3885 = vmatprep.subr.bf16.mxu1 %v4126_v9  ;;  %v4161_v48 = vld [vmem:[%s6331_s0 + $0x58] sm:$0xff]   ;;  %v4163_v50 = vld [vmem:[%s6331_s0 + $0x60] sm:$0xff]   ;;  %v4187_v51 = vld [vmem:[%s6330_s1 + $0xa8] sm:$0xff]  }
  0x12   :  { %v4162_v49 = vld [vmem:[%s6331_s0 + $0x158] sm:$0xff]   ;;  %v4188_v52 = vld [vmem:[%s6330_s1 + $0xe8] sm:$0xff]   ;;  %v4164_v53 = vld [vmem:[%s6331_s0 + $0x160] sm:$0xff]  }
  0x13   :  { %3806 = vmatpush3.bf16.msra.mxu0 %v4125_v8  ;;  %v4165_v54 = vld [vmem:[%s6331_s0 + $0x68] sm:$0xff]   ;;  %v4169_v56 = vld [vmem:[%s6331_s0 + $0x70] sm:$0xff]   ;;  %v4171_v60 = vld [vmem:[%s6331_s0 + $0x78] sm:$0xff]  }
  0x14   :  { %3886 = vmatpush3.bf16.msra.mxu1 %v4126_v9  ;;  %3807 = vmatprep.subr.bf16.mxu0 %v4127_v10  ;;  %v4166_v55 = vld [vmem:[%s6331_s0 + $0x168] sm:$0xff]   ;;  %v4170_v57 = vld [vmem:[%s6331_s0 + $0x170] sm:$0xff]   ;;  %v4172_v61 = vld [vmem:[%s6331_s0 + $0x178] sm:$0xff]  }
  0x15   :  { %3887 = vmatprep.subr.bf16.mxu1 %v4128_v11  ;;  %v4197_v58 = vld [vmem:[%s6330_s1 + $0xb0] sm:$0xff]   ;;  %v4173_v62 = vld [vmem:[%s6331_s0 + $0x80] sm:$0xff]   ;;  %v4207_v0 = vld [vmem:[%s6330_s1 + $0xb8] sm:$0xff]  }
  0x16   :  { %v4198_v59 = vld [vmem:[%s6330_s1 + $0xf0] sm:$0xff]   ;;  %v4174_v63 = vld [vmem:[%s6331_s0 + $0x180] sm:$0xff]   ;;  %v4208_v1 = vld [vmem:[%s6330_s1 + $0xf8] sm:$0xff]  }
  0x17   :  { %3808 = vmatpush3.bf16.msra.mxu0 %v4127_v10  ;;  %v4175_v2 = vld [vmem:[%s6331_s0 + $0x88] sm:$0xff]   ;;  %v4179_v4 = vld [vmem:[%s6331_s0 + $0x90] sm:$0xff]   ;;  %v4181_v6 = vld [vmem:[%s6331_s0 + $0x98] sm:$0xff]  }
  0x18   :  { %3888 = vmatpush3.bf16.msra.mxu1 %v4128_v11  ;;  %3809 = vmatprep.subr.bf16.mxu0 %v4129_v14  ;;  %v4176_v3 = vld [vmem:[%s6331_s0 + $0x188] sm:$0xff]   ;;  %v4180_v5 = vld [vmem:[%s6331_s0 + $0x190] sm:$0xff]   ;;  %v4182_v7 = vld [vmem:[%s6331_s0 + $0x198] sm:$0xff]  }
  0x19   :  { %3889 = vmatprep.subr.bf16.mxu1 %v4130_v15  ;;  %v4183_v8 = vld [vmem:[%s6331_s0 + $0xa0] sm:$0xff]   ;;  %v4185_v10 = vld [vmem:[%s6331_s0 + $0xa8] sm:$0xff]   ;;  %v4189_v12 = vld [vmem:[%s6331_s0 + $0xb0] sm:$0xff]  }
  0x1a   :  { %v4184_v9 = vld [vmem:[%s6331_s0 + $0x1a0] sm:$0xff]   ;;  %v4186_v11 = vld [vmem:[%s6331_s0 + $0x1a8] sm:$0xff]   ;;  %v4190_v13 = vld [vmem:[%s6331_s0 + $0x1b0] sm:$0xff]  }
  0x1b   :  { %3810 = vmatpush3.bf16.msra.mxu0 %v4129_v14  ;;  %v4191_v14 = vld [vmem:[%s6331_s0 + $0xb8] sm:$0xff]  }
  0x1c   :  { %3890 = vmatpush3.bf16.msra.mxu1 %v4130_v15  ;;  %3811 = vmatprep.subr.bf16.mxu0 %v4131_v16  ;;  %v4192_v15 = vld [vmem:[%s6331_s0 + $0x1b8] sm:$0xff]  }
  0x1d   :  { %3891 = vmatprep.subr.bf16.mxu1 %v4132_v17 }
  0x1f   :  { %3812 = vmatpush3.bf16.msra.mxu0 %v4131_v16  ;;  %v4193_v16 = vld [vmem:[%s6331_s0 + $0xc0] sm:$0xff]  }
  0x20   :  { %3892 = vmatpush3.bf16.msra.mxu1 %v4132_v17  ;;  %3957 = vmatprep.subr.bf16.mxu0 %v4137_v19  ;;  %v4194_v17 = vld [vmem:[%s6331_s0 + $0x1c0] sm:$0xff]  }
  0x21   :  { %4037 = vmatprep.subr.bf16.mxu1 %v4138_v20 }
  0x22   :  { %3814 = vmatmul.mubr.bf16.vlgmr.msra.gmra.mrb[0].mxu0 %v4135_v18  ;;  %v4195_v18 = vld [vmem:[%s6331_s0 + $0xc8] sm:$0xff]  }
  0x23   :  { %3894 = vmatmul.mubr.bf16.vlgmr.msra.gmra.mrb[0].mxu1 %v4136_v21  ;;  %3958 = vmatpush3.bf16.msra.mxu0 %v4137_v19  ;;  %v4196_v19 = vld [vmem:[%s6331_s0 + $0x1c8] sm:$0xff]   ;;  %v4200_v21 = vld [vmem:[%s6331_s0 + $0x1d0] sm:$0xff]  }
  0x24   :  { %4038 = vmatpush3.bf16.msra.mxu1 %v4138_v20  ;;  %3817 = vmatprep.mubr.bf16.mxu0 %v4139_v22  ;;  %v4199_v20 = vld [vmem:[%s6331_s0 + $0xd0] sm:$0xff]   ;;  %v4201_v22 = vld [vmem:[%s6331_s0 + $0xd8] sm:$0xff]  }
  0x25   :  { %3897 = vmatprep.mubr.bf16.mxu1 %v4140_v23  ;;  %3959 = vmatprep.subr.bf16.mxu0 %v4147_v24  ;;  %v4202_v23 = vld [vmem:[%s6331_s0 + $0x1d8] sm:$0xff]  }
  0x26   :  { %4039 = vmatprep.subr.bf16.mxu1 %v4148_v25 }
  0x27   :  { %3960 = vmatpush3.bf16.msra.mxu0 %v4147_v24  ;;  %v4203_v24 = vld [vmem:[%s6331_s0 + $0xe0] sm:$0xff]  }
  0x28   :  { %4040 = vmatpush3.bf16.msra.mxu1 %v4148_v25  ;;  %3961 = vmatprep.subr.bf16.mxu0 %v4157_v30  ;;  %v4204_v25 = vld [vmem:[%s6331_s0 + $0x1e0] sm:$0xff]  }
  0x29   :  { %4041 = vmatprep.subr.bf16.mxu1 %v4158_v31 }
  0x2a   :  { %3818 = vmatmul.mubr.bf16.gmra.mrb[4].mxu0 %v4141_v26  ;;  %v4205_v26 = vld [vmem:[%s6331_s0 + $0xe8] sm:$0xff]  }
  0x2b   :  { %3898 = vmatmul.mubr.bf16.gmra.mrb[4].mxu1 %v4142_v27  ;;  %3821 = vmatprep.mubr.bf16.mxu0 %v4143_v28  ;;  %v4206_v27 = vld [vmem:[%s6331_s0 + $0x1e8] sm:$0xff]   ;;  %v4209_v28 = vld [vmem:[%s6331_s0 + $0xf0] sm:$0xff]  }
  0x2c   :  { %3901 = vmatprep.mubr.bf16.mxu1 %v4144_v29  ;;  %3962 = vmatpush3.bf16.msra.mxu0 %v4157_v30  ;;  %v4210_v29 = vld [vmem:[%s6331_s0 + $0x1f0] sm:$0xff]   ;;  %v4211_v30 = vld [vmem:[%s6331_s0 + $0xf8] sm:$0xff]  }
  0x2d   :  { %4042 = vmatpush3.bf16.msra.mxu1 %v4158_v31  ;;  %3963 = vmatprep.subr.bf16.mxu0 %v4167_v36  ;;  %v4212_v31 = vld [vmem:[%s6331_s0 + $0x1f8] sm:$0xff]  }
  0x2e   :  { %4043 = vmatprep.subr.bf16.mxu1 %v4168_v37 }
  0x30   :  { %3964 = vmatpush3.bf16.msra.mxu0 %v4167_v36  ;;  %v4217_v36 = vld [vmem:[%s6331_s0 + $0x210] sm:$0xff]  }
  0x31   :  { %4044 = vmatpush3.bf16.msra.mxu1 %v4168_v37  ;;  %3965 = vmatprep.subr.bf16.mxu0 %v4177_v43  ;;  %v4218_v37 = vld [vmem:[%s6331_s0 + $0x310] sm:$0xff]  }
  0x32   :  { %3822 = vmatmul.mubr.bf16.gmra.mrb[8].mxu0 %v4145_v32  ;;  %4045 = vmatprep.subr.bf16.mxu1 %v4178_v44  ;;  %v4213_v32 = vld [vmem:[%s6331_s0 + $0x200] sm:$0xff]  }
  0x33   :  { %3902 = vmatmul.mubr.bf16.gmra.mrb[8].mxu1 %v4146_v33  ;;  %3825 = vmatprep.mubr.bf16.mxu0 %v4149_v34  ;;  %v4214_v33 = vld [vmem:[%s6331_s0 + $0x300] sm:$0xff]   ;;  %v4215_v34 = vld [vmem:[%s6331_s0 + $0x208] sm:$0xff]  }
  0x34   :  { %3905 = vmatprep.mubr.bf16.mxu1 %v4150_v35  ;;  %3966 = vmatpush3.bf16.msra.mxu0 %v4177_v43  ;;  %v4216_v35 = vld [vmem:[%s6331_s0 + $0x308] sm:$0xff]  }
  0x35   :  { %4046 = vmatpush3.bf16.msra.mxu1 %v4178_v44  ;;  %3967 = vmatprep.subr.bf16.mxu0 %v4187_v51  ;;  %v4224_v43 = vld [vmem:[%s6331_s0 + $0x328] sm:$0xff]   ;;  %v4225_v44 = vld [vmem:[%s6331_s0 + $0x230] sm:$0xff]  }
  0x36   :  { %4047 = vmatprep.subr.bf16.mxu1 %v4188_v52 }
  0x38   :  { %3968 = vmatpush3.bf16.msra.mxu0 %v4187_v51  ;;  %v4232_v51 = vld [vmem:[%s6331_s0 + $0x348] sm:$0xff]  }
  0x39   :  { %4048 = vmatpush3.bf16.msra.mxu1 %v4188_v52  ;;  %3969 = vmatprep.subr.bf16.mxu0 %v4197_v58  ;;  %v4233_v52 = vld [vmem:[%s6331_s0 + $0x250] sm:$0xff]  }
  0x3a   :  { %3826 = vmatmul.mubr.bf16.gmra.mrb[12].mxu0 %v4151_v38  ;;  %4049 = vmatprep.subr.bf16.mxu1 %v4198_v59  ;;  %v4219_v38 = vld [vmem:[%s6331_s0 + $0x218] sm:$0xff]  }
  0x3b   :  { %3906 = vmatmul.mubr.bf16.gmra.mrb[12].mxu1 %v4152_v39  ;;  %3829 = vmatprep.mubr.bf16.mxu0 %v4153_v40  ;;  %v4220_v39 = vld [vmem:[%s6331_s0 + $0x318] sm:$0xff]   ;;  %v4221_v40 = vld [vmem:[%s6331_s0 + $0x220] sm:$0xff]  }
  0x3c   :  { %3909 = vmatprep.mubr.bf16.mxu1 %v4154_v41  ;;  %3970 = vmatpush3.bf16.msra.mxu0 %v4197_v58  ;;  %v4222_v41 = vld [vmem:[%s6331_s0 + $0x320] sm:$0xff]   ;;  %v4239_v58 = vld [vmem:[%s6331_s0 + $0x268] sm:$0xff]  }
  0x3d   :  { %4050 = vmatpush3.bf16.msra.mxu1 %v4198_v59  ;;  %3971 = vmatprep.subr.bf16.mxu0 %v4207_v0  ;;  %v4240_v59 = vld [vmem:[%s6331_s0 + $0x368] sm:$0xff]  }
  0x3e   :  { %4051 = vmatprep.subr.bf16.mxu1 %v4208_v1 }
  0x40   :  { %3972 = vmatpush3.bf16.msra.mxu0 %v4207_v0  ;;  %v4245_v0 = vld [vmem:[%s6331_s0 + $0x280] sm:$0xff]  }
  0x41   :  { %4052 = vmatpush3.bf16.msra.mxu1 %v4208_v1  ;;  %v4246_v1 = vld [vmem:[%s6331_s0 + $0x380] sm:$0xff]  }
  0x42   :  { %3830 = vmatmul.mubr.bf16.gmra.mrb[16].mxu0 %v4155_v42  ;;  %v4223_v42 = vld [vmem:[%s6331_s0 + $0x228] sm:$0xff]  }
  0x43   :  { %3910 = vmatmul.mubr.bf16.gmra.mrb[16].mxu1 %v4156_v45  ;;  %3833 = vmatprep.mubr.bf16.mxu0 %v4159_v46  ;;  %v4226_v45 = vld [vmem:[%s6331_s0 + $0x330] sm:$0xff]   ;;  %v4227_v46 = vld [vmem:[%s6331_s0 + $0x238] sm:$0xff]  }
  0x44   :  { %3913 = vmatprep.mubr.bf16.mxu1 %v4160_v47  ;;  %v4228_v47 = vld [vmem:[%s6331_s0 + $0x338] sm:$0xff]  }
  0x4a   :  { %3834 = vmatmul.mubr.bf16.gmra.mrb[20].mxu0 %v4161_v48  ;;  %v4229_v48 = vld [vmem:[%s6331_s0 + $0x240] sm:$0xff]  }
  0x4b   :  { %3914 = vmatmul.mubr.bf16.gmra.mrb[20].mxu1 %v4162_v49  ;;  %3837 = vmatprep.mubr.bf16.mxu0 %v4163_v50  ;;  %v4230_v49 = vld [vmem:[%s6331_s0 + $0x340] sm:$0xff]   ;;  %v4231_v50 = vld [vmem:[%s6331_s0 + $0x248] sm:$0xff]  }
  0x4c   :  { %3917 = vmatprep.mubr.bf16.mxu1 %v4164_v53  ;;  %v4234_v53 = vld [vmem:[%s6331_s0 + $0x350] sm:$0xff]  }
  0x52   :  { %3838 = vmatmul.mubr.bf16.gmra.mrb[24].mxu0 %v4165_v54  ;;  %v4235_v54 = vld [vmem:[%s6331_s0 + $0x258] sm:$0xff]  }
  0x53   :  { %3918 = vmatmul.mubr.bf16.gmra.mrb[24].mxu1 %v4166_v55  ;;  %3841 = vmatprep.mubr.bf16.mxu0 %v4169_v56  ;;  %v4236_v55 = vld [vmem:[%s6331_s0 + $0x358] sm:$0xff]   ;;  %v4237_v56 = vld [vmem:[%s6331_s0 + $0x260] sm:$0xff]  }
  0x54   :  { %3921 = vmatprep.mubr.bf16.mxu1 %v4170_v57  ;;  %v4238_v57 = vld [vmem:[%s6331_s0 + $0x360] sm:$0xff]  }
  0x5a   :  { %3842 = vmatmul.mubr.bf16.gmra.mrb[28].mxu0 %v4171_v60  ;;  %v4241_v60 = vld [vmem:[%s6331_s0 + $0x270] sm:$0xff]  }
  0x5b   :  { %3922 = vmatmul.mubr.bf16.gmra.mrb[28].mxu1 %v4172_v61  ;;  %3845 = vmatprep.mubr.bf16.mxu0 %v4173_v62  ;;  %v4242_v61 = vld [vmem:[%s6331_s0 + $0x370] sm:$0xff]   ;;  %v4243_v62 = vld [vmem:[%s6331_s0 + $0x278] sm:$0xff]  }
  0x5c   :  { %3925 = vmatprep.mubr.bf16.mxu1 %v4174_v63  ;;  %v4244_v63 = vld [vmem:[%s6331_s0 + $0x378] sm:$0xff]  }
  0x62   :  { %3846 = vmatmul.mubr.bf16.gmra.mrb[32].mxu0 %v4175_v2  ;;  %v4247_v2 = vld [vmem:[%s6331_s0 + $0x288] sm:$0xff]  }
  0x63   :  { %3926 = vmatmul.mubr.bf16.gmra.mrb[32].mxu1 %v4176_v3  ;;  %3849 = vmatprep.mubr.bf16.mxu0 %v4179_v4  ;;  %v4248_v3 = vld [vmem:[%s6331_s0 + $0x388] sm:$0xff]   ;;  %v4249_v4 = vld [vmem:[%s6331_s0 + $0x290] sm:$0xff]  }
  0x64   :  { %3929 = vmatprep.mubr.bf16.mxu1 %v4180_v5  ;;  %v4250_v5 = vld [vmem:[%s6331_s0 + $0x390] sm:$0xff]  }
  0x6a   :  { %3850 = vmatmul.mubr.bf16.gmra.mrb[36].mxu0 %v4181_v6  ;;  %v4251_v6 = vld [vmem:[%s6331_s0 + $0x298] sm:$0xff]  }
  0x6b   :  { %3930 = vmatmul.mubr.bf16.gmra.mrb[36].mxu1 %v4182_v7  ;;  %3853 = vmatprep.mubr.bf16.mxu0 %v4183_v8  ;;  %v4252_v7 = vld [vmem:[%s6331_s0 + $0x398] sm:$0xff]   ;;  %v4253_v8 = vld [vmem:[%s6331_s0 + $0x2a0] sm:$0xff]  }
  0x6c   :  { %3933 = vmatprep.mubr.bf16.mxu1 %v4184_v9  ;;  %v4254_v9 = vld [vmem:[%s6331_s0 + $0x3a0] sm:$0xff]  }
  0x72   :  { %3854 = vmatmul.mubr.bf16.gmra.mrb[40].mxu0 %v4185_v10  ;;  %v4255_v10 = vld [vmem:[%s6331_s0 + $0x2a8] sm:$0xff]  }
  0x73   :  { %3934 = vmatmul.mubr.bf16.gmra.mrb[40].mxu1 %v4186_v11  ;;  %3857 = vmatprep.mubr.bf16.mxu0 %v4189_v12  ;;  %v4256_v11 = vld [vmem:[%s6331_s0 + $0x3a8] sm:$0xff]   ;;  %v4257_v12 = vld [vmem:[%s6331_s0 + $0x2b0] sm:$0xff]  }
  0x74   :  { %3937 = vmatprep.mubr.bf16.mxu1 %v4190_v13  ;;  %v4258_v13 = vld [vmem:[%s6331_s0 + $0x3b0] sm:$0xff]  }
  0x7a   :  { %3858 = vmatmul.mubr.bf16.gmra.mrb[44].mxu0 %v4191_v14  ;;  %v5240_v14 = vld [vmem:[%s6332_s2] ss:$0 sm:$0xff] }
  0x7b   :  { %3938 = vmatmul.mubr.bf16.gmra.mrb[44].mxu1 %v4192_v15  ;;  %3861 = vmatprep.mubr.bf16.mxu0 %v4193_v16 }
  0x7c   :  { %3941 = vmatprep.mubr.bf16.mxu1 %v4194_v17 }
  0x82   :  { %3862 = vmatmul.mubr.bf16.gmra.mrb[48].mxu0 %v4195_v18 }
  0x83   :  { %3942 = vmatmul.mubr.bf16.gmra.mrb[48].mxu1 %v4196_v19  ;;  %3865 = vmatprep.mubr.bf16.mxu0 %v4199_v20  ;;  %v4259_v19 = vld [vmem:[%s6331_s0 + $0x2b8] sm:$0xff]  }
  0x84   :  { %3945 = vmatprep.mubr.bf16.mxu1 %v4200_v21 }
  0x8a   :  { %3866 = vmatmul.mubr.bf16.gmra.mrb[52].mxu0 %v4201_v22 }
  0x8b   :  { %3946 = vmatmul.mubr.bf16.gmra.mrb[52].mxu1 %v4202_v23  ;;  %3869 = vmatprep.mubr.bf16.mxu0 %v4203_v24  ;;  %v4260_v24 = vld [vmem:[%s6331_s0 + $0x3b8] sm:$0xff]  }
  0x8c   :  { %3949 = vmatprep.mubr.bf16.mxu1 %v4204_v25  ;;  %v4261_v25 = vld [vmem:[%s6331_s0 + $0x2c0] sm:$0xff]  }
  0x92   :  { %3870 = vmatmul.mubr.bf16.gmra.mrb[56].mxu0 %v4205_v26 }
  0x93   :  { %3950 = vmatmul.mubr.bf16.gmra.mrb[56].mxu1 %v4206_v27  ;;  %3873 = vmatprep.mubr.bf16.mxu0 %v4209_v28 }
  0x94   :  { %3953 = vmatprep.mubr.bf16.mxu1 %v4210_v29 }
  0x9a   :  { %3874 = vmatmul.mubr.bf16.gmra.mrb[60].mxu0 %v4211_v30  ;;  %v4262_v30 = vld [vmem:[%s6331_s0 + $0x3c0] sm:$0xff]  }
  0x9b   :  { %3954 = vmatmul.mubr.bf16.gmra.mrb[60].mxu1 %v4212_v31  ;;  %3973 = vmatprep.mubr.bf16.mxu0 %v4213_v32 }
  0x9c   :  { %4053 = vmatprep.mubr.bf16.mxu1 %v4214_v33 }
  0xa2   :  { %3974 = vmatmul.mubr.bf16.vlgmr.msra.gmra.mrb[64].mxu0 %v4215_v34 }
  0xa3   :  { %4054 = vmatmul.mubr.bf16.vlgmr.msra.gmra.mrb[64].mxu1 %v4216_v35  ;;  %3977 = vmatprep.mubr.bf16.mxu0 %v4217_v36 }
  0xa4   :  { %4057 = vmatprep.mubr.bf16.mxu1 %v4218_v37 }
  0xaa   :  { %3978 = vmatmul.mubr.bf16.gmra.mrb[68].mxu0 %v4219_v38 }
  0xab   :  { %4058 = vmatmul.mubr.bf16.gmra.mrb[68].mxu1 %v4220_v39  ;;  %3981 = vmatprep.mubr.bf16.mxu0 %v4221_v40  ;;  %v4263_v39 = vld [vmem:[%s6331_s0 + $0x2c8] sm:$0xff]  }
  0xac   :  { %4061 = vmatprep.mubr.bf16.mxu1 %v4222_v41 }
  0xb2   :  { %3982 = vmatmul.mubr.bf16.gmra.mrb[72].mxu0 %v4223_v42 }
  0xb3   :  { %4062 = vmatmul.mubr.bf16.gmra.mrb[72].mxu1 %v4224_v43  ;;  %3985 = vmatprep.mubr.bf16.mxu0 %v4225_v44  ;;  %v4264_v44 = vld [vmem:[%s6331_s0 + $0x3c8] sm:$0xff]  }
  0xb4   :  { %4065 = vmatprep.mubr.bf16.mxu1 %v4226_v45  ;;  %v4265_v45 = vld [vmem:[%s6331_s0 + $0x2d0] sm:$0xff]  }
  0xba   :  { %3986 = vmatmul.mubr.bf16.gmra.mrb[76].mxu0 %v4227_v46 }
  0xbb   :  { %4066 = vmatmul.mubr.bf16.gmra.mrb[76].mxu1 %v4228_v47  ;;  %3989 = vmatprep.mubr.bf16.mxu0 %v4229_v48 }
  0xbc   :  { %4069 = vmatprep.mubr.bf16.mxu1 %v4230_v49 }
  0xc2   :  { %3990 = vmatmul.mubr.bf16.gmra.mrb[80].mxu0 %v4231_v50  ;;  %v4266_v50 = vld [vmem:[%s6331_s0 + $0x3d0] sm:$0xff]  }
  0xc3   :  { %4070 = vmatmul.mubr.bf16.gmra.mrb[80].mxu1 %v4232_v51  ;;  %3993 = vmatprep.mubr.bf16.mxu0 %v4233_v52 }
  0xc4   :  { %4073 = vmatprep.mubr.bf16.mxu1 %v4234_v53 }
  0xca   :  { %3994 = vmatmul.mubr.bf16.gmra.mrb[84].mxu0 %v4235_v54 }
  0xcb   :  { %4074 = vmatmul.mubr.bf16.gmra.mrb[84].mxu1 %v4236_v55  ;;  %3997 = vmatprep.mubr.bf16.mxu0 %v4237_v56 }
  0xcc   :  { %4077 = vmatprep.mubr.bf16.mxu1 %v4238_v57 }
  0xd2   :  { %3998 = vmatmul.mubr.bf16.gmra.mrb[88].mxu0 %v4239_v58 }
  0xd3   :  { %4078 = vmatmul.mubr.bf16.gmra.mrb[88].mxu1 %v4240_v59  ;;  %4001 = vmatprep.mubr.bf16.mxu0 %v4241_v60 }
  0xd4   :  { %4081 = vmatprep.mubr.bf16.mxu1 %v4242_v61 }
  0xda   :  { %4002 = vmatmul.mubr.bf16.gmra.mrb[92].mxu0 %v4243_v62 }
  0xdb   :  { %4082 = vmatmul.mubr.bf16.gmra.mrb[92].mxu1 %v4244_v63  ;;  %4005 = vmatprep.mubr.bf16.mxu0 %v4245_v0  ;;  %v4267_v0 = vld [vmem:[%s6331_s0 + $0x2d8] sm:$0xff]  }
  0xdc   :  { %4085 = vmatprep.mubr.bf16.mxu1 %v4246_v1 }
  0xe2   :  { %4006 = vmatmul.mubr.bf16.gmra.mrb[96].mxu0 %v4247_v2 }
  0xe3   :  { %4086 = vmatmul.mubr.bf16.gmra.mrb[96].mxu1 %v4248_v3  ;;  %4009 = vmatprep.mubr.bf16.mxu0 %v4249_v4 }
  0xe4   :  { %4089 = vmatprep.mubr.bf16.mxu1 %v4250_v5 }
  0xea   :  { %4010 = vmatmul.mubr.bf16.gmra.mrb[100].mxu0 %v4251_v6  ;;  %v4268_v6 = vld [vmem:[%s6331_s0 + $0x3d8] sm:$0xff]  }
  0xeb   :  { %4090 = vmatmul.mubr.bf16.gmra.mrb[100].mxu1 %v4252_v7  ;;  %4013 = vmatprep.mubr.bf16.mxu0 %v4253_v8  ;;  %v4269_v7 = vld [vmem:[%s6331_s0 + $0x2e0] sm:$0xff]  }
  0xec   :  { %4093 = vmatprep.mubr.bf16.mxu1 %v4254_v9 }
  0xf2   :  { %4014 = vmatmul.mubr.bf16.gmra.mrb[104].mxu0 %v4255_v10 }
  0xf3   :  { %4094 = vmatmul.mubr.bf16.gmra.mrb[104].mxu1 %v4256_v11  ;;  %4017 = vmatprep.mubr.bf16.mxu0 %v4257_v12 }
  0xf4   :  { %4097 = vmatprep.mubr.bf16.mxu1 %v4258_v13  ;;  %v4270_v13 = vld [vmem:[%s6331_s0 + $0x3e0] sm:$0xff]  }
  0xf5   :  { %v3815_v15 = vpop.f32.mrb[0].mxu0 }
  0xf6   :  { %v2466_v16 = vadd.f32 %v3815_v15, %v5240_v14  ;;  %v3895_v17 = vpop.f32.mrb[0].mxu1  ;;  %v369_v18 = vpop.f32.mrb[1].mxu0 }
  0xf7   :  { %v2530_v20 = vadd.f32 %v3895_v17, %v5240_v14  ;;  %v2464_v21 = vadd.f32 %v5240_v14, %v369_v18  ;;  %v980_v22 = vpop.f32.mrb[1].mxu1  ;;  %v3816_v23 = vpop.f32.mrb[2].mxu0 }
  0xf8   :  { %4277 = vtanh.f32 %v2466_v16  ;;  %v2528_v26 = vadd.f32 %v5240_v14, %v980_v22  ;;  %v2467_v27 = vadd.f32 %v3816_v23, %v5240_v14  ;;  %v3896_v28 = vpop.f32.mrb[2].mxu1  ;;  %v372_v29 = vpop.f32.mrb[3].mxu0 }
  0xf9   :  { %4279 = vtanh.f32 %v2530_v20  ;;  %v2531_v31 = vadd.f32 %v3896_v28, %v5240_v14  ;;  %v983_v32 = vpop.f32.mrb[3].mxu1  ;;  %v2465_v33 = vadd.f32 %v5240_v14, %v372_v29  ;;  %v4271_v29 = vld [vmem:[%s6331_s0 + $0x2e8] sm:$0xff]  }
  0xfa   :  { %4281 = vtanh.f32 %v2464_v21  ;;  %4018 = vmatmul.mubr.bf16.gmra.mrb[108].mxu0 %v4259_v19  ;;  %v2529_v34 = vadd.f32 %v5240_v14, %v983_v32 }
  0xfb   :  { %4283 = vtanh.f32 %v2528_v26  ;;  %4098 = vmatmul.mubr.bf16.gmra.mrb[108].mxu1 %v4260_v24  ;;  %4021 = vmatprep.mubr.bf16.mxu0 %v4261_v25 }
  0xfc   :  { %4285 = vtanh.f32 %v2467_v27  ;;  %4101 = vmatprep.mubr.bf16.mxu1 %v4262_v30 }
  0xfd   :  { %4287 = vtanh.f32 %v2531_v31  ;;  %v3819_v35 = vpop.f32.mrb[4].mxu0 }
  0xfe   :  { %4289 = vtanh.f32 %v2465_v33  ;;  %v2470_v36 = vadd.f32 %v3819_v35, %v5240_v14  ;;  %v3899_v37 = vpop.f32.mrb[4].mxu1  ;;  %v385_v38 = vpop.f32.mrb[5].mxu0  ;;  %v4272_v35 = vld [vmem:[%s6331_s0 + $0x3e8] sm:$0xff]  }
  0xff   :  { %4291 = vtanh.f32 %v2529_v34  ;;  %v2534_v40 = vadd.f32 %v3899_v37, %v5240_v14  ;;  %v2468_v41 = vadd.f32 %v5240_v14, %v385_v38  ;;  %v996_v42 = vpop.f32.mrb[5].mxu1  ;;  %v3820_v43 = vpop.f32.mrb[6].mxu0 }
 0x100   :  { %4293 = vtanh.f32 %v2470_v36  ;;  %v2532_v46 = vadd.f32 %v5240_v14, %v996_v42  ;;  %v2471_v47 = vadd.f32 %v3820_v43, %v5240_v14  ;;  %v3900_v48 = vpop.f32.mrb[6].mxu1  ;;  %v388_v49 = vpop.f32.mrb[7].mxu0  ;;  %v4273_v36 = vld [vmem:[%s6331_s0 + $0x2f0] sm:$0xff]  }
 0x101   :  { %4295 = vtanh.f32 %v2534_v40  ;;  %v2535_v51 = vadd.f32 %v3900_v48, %v5240_v14  ;;  %v999_v52 = vpop.f32.mrb[7].mxu1  ;;  %v2469_v54 = vadd.f32 %v5240_v14, %v388_v49  ;;  %v4274_v42 = vld [vmem:[%s6331_s0 + $0x3f0] sm:$0xff]  }
 0x102   :  { %v4278_v53 = vpop.eup %4277  ;;  %4297 = vtanh.f32 %v2468_v41  ;;  %4022 = vmatmul.mubr.bf16.gmra.mrb[112].mxu0 %v4263_v39  ;;  %v2533_v56 = vadd.f32 %v5240_v14, %v999_v52 }
 0x103   :  { %v4280_v55 = vpop.eup %4279  ;;  %2978 = vst [vmem:[%s6333_s3 + $0x10] sm:$0xff] %v4278_v53  ;;  %4299 = vtanh.f32 %v2532_v46  ;;  %4102 = vmatmul.mubr.bf16.gmra.mrb[112].mxu1 %v4264_v44  ;;  %4025 = vmatprep.mubr.bf16.mxu0 %v4265_v45 }
 0x104   :  { %v4282_v57 = vpop.eup %4281  ;;  %3042 = vst [vmem:[%s6333_s3 + $0x210] sm:$0xff] %v4280_v55  ;;  %4301 = vtanh.f32 %v2471_v47  ;;  %4105 = vmatprep.mubr.bf16.mxu1 %v4266_v50 }
 0x105   :  { %v4284_v58 = vpop.eup %4283  ;;  %2976 = vst [vmem:[%s6333_s3] sm:$0xff] %v4282_v57  ;;  %4303 = vtanh.f32 %v2535_v51  ;;  %v3823_v59 = vpop.f32.mrb[8].mxu0  ;;  %v4275_v57 = vld [vmem:[%s6331_s0 + $0x2f8] sm:$0xff]  }
 0x106   :  { %v4286_v60 = vpop.eup %4285  ;;  %3040 = vst [vmem:[%s6333_s3 + $0x200] sm:$0xff] %v4284_v58  ;;  %4305 = vtanh.f32 %v2469_v54  ;;  %v2474_v61 = vadd.f32 %v3823_v59, %v5240_v14  ;;  %v3903_v62 = vpop.f32.mrb[8].mxu1 }
 0x107   :  { %v401_v63 = vpop.f32.mrb[9].mxu0  ;;  %v4288_v1 = vpop.eup %4287  ;;  %2979 = vst [vmem:[%s6333_s3 + $0x18] sm:$0xff] %v4286_v60  ;;  %4307 = vtanh.f32 %v2533_v56  ;;  %v2538_v2 = vadd.f32 %v3903_v62, %v5240_v14 }
 0x108   :  { %v2472_v3 = vadd.f32 %v5240_v14, %v401_v63  ;;  %v1012_v4 = vpop.f32.mrb[9].mxu1  ;;  %v3824_v5 = vpop.f32.mrb[10].mxu0  ;;  %3043 = vst [vmem:[%s6333_s3 + $0x218] sm:$0xff] %v4288_v1  ;;  %4309 = vtanh.f32 %v2474_v61  ;;  %v4276_v63 = vld [vmem:[%s6331_s0 + $0x3f8] sm:$0xff]  }
 0x109   :  { %v4290_v8 = vpop.eup %4289  ;;  %v2536_v9 = vadd.f32 %v5240_v14, %v1012_v4  ;;  %v2475_v10 = vadd.f32 %v3824_v5, %v5240_v14  ;;  %v3904_v11 = vpop.f32.mrb[10].mxu1  ;;  %4311 = vtanh.f32 %v2538_v2 }
 0x10a   :  { %v404_v12 = vpop.f32.mrb[11].mxu0  ;;  %v4292_v15 = vpop.eup %4291  ;;  %2977 = vst [vmem:[%s6333_s3 + $0x8] sm:$0xff] %v4290_v8  ;;  %v2539_v16 = vadd.f32 %v3904_v11, %v5240_v14  ;;  %4313 = vtanh.f32 %v2472_v3  ;;  %4026 = vmatmul.mubr.bf16.gmra.mrb[116].mxu0 %v4267_v0 }
 0x10b   :  { %v1015_v17 = vpop.f32.mrb[11].mxu1  ;;  %v4294_v18 = vpop.eup %4293  ;;  %3041 = vst [vmem:[%s6333_s3 + $0x208] sm:$0xff] %v4292_v15  ;;  %v2473_v19 = vadd.f32 %v5240_v14, %v404_v12  ;;  %4315 = vtanh.f32 %v2536_v9  ;;  %4106 = vmatmul.mubr.bf16.gmra.mrb[116].mxu1 %v4268_v6  ;;  %4029 = vmatprep.mubr.bf16.mxu0 %v4269_v7 }
 0x10c   :  { %v4296_v20 = vpop.eup %4295  ;;  %2982 = vst [vmem:[%s6333_s3 + $0x30] sm:$0xff] %v4294_v18  ;;  %v2537_v21 = vadd.f32 %v5240_v14, %v1015_v17  ;;  %4317 = vtanh.f32 %v2475_v10  ;;  %4109 = vmatprep.mubr.bf16.mxu1 %v4270_v13 }
 0x10d   :  { %v4298_v22 = vpop.eup %4297  ;;  %3046 = vst [vmem:[%s6333_s3 + $0x230] sm:$0xff] %v4296_v20  ;;  %4319 = vtanh.f32 %v2539_v16  ;;  %v3827_v24 = vpop.f32.mrb[12].mxu0 }
 0x10e   :  { %v4300_v23 = vpop.eup %4299  ;;  %2980 = vst [vmem:[%s6333_s3 + $0x20] sm:$0xff] %v4298_v22  ;;  %4321 = vtanh.f32 %v2473_v19  ;;  %v2478_v26 = vadd.f32 %v3827_v24, %v5240_v14  ;;  %v3907_v27 = vpop.f32.mrb[12].mxu1 }
 0x10f   :  { %v4302_v25 = vpop.eup %4301  ;;  %3044 = vst [vmem:[%s6333_s3 + $0x220] sm:$0xff] %v4300_v23  ;;  %v417_v28 = vpop.f32.mrb[13].mxu0  ;;  %4323 = vtanh.f32 %v2537_v21  ;;  %v2542_v31 = vadd.f32 %v3907_v27, %v5240_v14 }
 0x110   :  { %v4304_v30 = vpop.eup %4303  ;;  %2983 = vst [vmem:[%s6333_s3 + $0x38] sm:$0xff] %v4302_v25  ;;  %v2476_v32 = vadd.f32 %v5240_v14, %v417_v28  ;;  %v1028_v33 = vpop.f32.mrb[13].mxu1  ;;  %4325 = vtanh.f32 %v2478_v26 }
 0x111   :  { %v3828_v34 = vpop.f32.mrb[14].mxu0  ;;  %v4306_v37 = vpop.eup %4305  ;;  %3047 = vst [vmem:[%s6333_s3 + $0x238] sm:$0xff] %v4304_v30  ;;  %v2540_v38 = vadd.f32 %v5240_v14, %v1028_v33  ;;  %4327 = vtanh.f32 %v2542_v31 }
 0x112   :  { %v2479_v39 = vadd.f32 %v3828_v34, %v5240_v14  ;;  %v3908_v40 = vpop.f32.mrb[14].mxu1  ;;  %v420_v41 = vpop.f32.mrb[15].mxu0  ;;  %2981 = vst [vmem:[%s6333_s3 + $0x28] sm:$0xff] %v4306_v37  ;;  %4329 = vtanh.f32 %v2476_v32  ;;  %4030 = vmatmul.mubr.bf16.gmra.mrb[120].mxu0 %v4271_v29 }
 0x113   :  { %v4308_v43 = vpop.eup %4307  ;;  %v2543_v44 = vadd.f32 %v3908_v40, %v5240_v14  ;;  %v1031_v45 = vpop.f32.mrb[15].mxu1  ;;  %v2477_v47 = vadd.f32 %v5240_v14, %v420_v41  ;;  %4331 = vtanh.f32 %v2540_v38  ;;  %4110 = vmatmul.mubr.bf16.gmra.mrb[120].mxu1 %v4272_v35  ;;  %4033 = vmatprep.mubr.bf16.mxu0 %v4273_v36 }
 0x114   :  { %v4310_v46 = vpop.eup %4309  ;;  %3045 = vst [vmem:[%s6333_s3 + $0x228] sm:$0xff] %v4308_v43  ;;  %v2541_v49 = vadd.f32 %v5240_v14, %v1031_v45  ;;  %4333 = vtanh.f32 %v2479_v39  ;;  %4113 = vmatprep.mubr.bf16.mxu1 %v4274_v42 }
 0x115   :  { %v4312_v48 = vpop.eup %4311  ;;  %2986 = vst [vmem:[%s6333_s3 + $0x50] sm:$0xff] %v4310_v46  ;;  %4335 = vtanh.f32 %v2543_v44  ;;  %v3831_v52 = vpop.f32.mrb[16].mxu0 }
 0x116   :  { %v4314_v50 = vpop.eup %4313  ;;  %3050 = vst [vmem:[%s6333_s3 + $0x250] sm:$0xff] %v4312_v48  ;;  %4337 = vtanh.f32 %v2477_v47  ;;  %v2482_v54 = vadd.f32 %v3831_v52, %v5240_v14  ;;  %v3911_v55 = vpop.f32.mrb[16].mxu1 }
 0x117   :  { %v4316_v51 = vpop.eup %4315  ;;  %2984 = vst [vmem:[%s6333_s3 + $0x40] sm:$0xff] %v4314_v50  ;;  %v433_v56 = vpop.f32.mrb[17].mxu0  ;;  %4339 = vtanh.f32 %v2541_v49  ;;  %v2546_v59 = vadd.f32 %v3911_v55, %v5240_v14 }
 0x118   :  { %v4318_v53 = vpop.eup %4317  ;;  %3048 = vst [vmem:[%s6333_s3 + $0x240] sm:$0xff] %v4316_v51  ;;  %v2480_v60 = vadd.f32 %v5240_v14, %v433_v56  ;;  %v1044_v61 = vpop.f32.mrb[17].mxu1  ;;  %4341 = vtanh.f32 %v2482_v54 }
 0x119   :  { %v4320_v58 = vpop.eup %4319  ;;  %2987 = vst [vmem:[%s6333_s3 + $0x58] sm:$0xff] %v4318_v53  ;;  %v3832_v62 = vpop.f32.mrb[18].mxu0  ;;  %v2544_v1 = vadd.f32 %v5240_v14, %v1044_v61  ;;  %4343 = vtanh.f32 %v2546_v59 }
 0x11a   :  { %v4322_v0 = vpop.eup %4321  ;;  %3051 = vst [vmem:[%s6333_s3 + $0x258] sm:$0xff] %v4320_v58  ;;  %v2483_v2 = vadd.f32 %v3832_v62, %v5240_v14  ;;  %v3912_v3 = vpop.f32.mrb[18].mxu1  ;;  %4345 = vtanh.f32 %v2480_v60  ;;  %4034 = vmatmul.mubr.bf16.gmra.mrb[124].mxu0 %v4275_v57 }
 0x11b   :  { %v436_v4 = vpop.f32.mrb[19].mxu0  ;;  %v4324_v5 = vpop.eup %4323  ;;  %2985 = vst [vmem:[%s6333_s3 + $0x48] sm:$0xff] %v4322_v0  ;;  %v2547_v6 = vadd.f32 %v3912_v3, %v5240_v14  ;;  %4347 = vtanh.f32 %v2544_v1  ;;  %4114 = vmatmul.mubr.bf16.gmra.mrb[124].mxu1 %v4276_v63 }
 0x11c   :  { %v1047_v7 = vpop.f32.mrb[19].mxu1  ;;  %v4326_v8 = vpop.eup %4325  ;;  %3049 = vst [vmem:[%s6333_s3 + $0x248] sm:$0xff] %v4324_v5  ;;  %v2481_v9 = vadd.f32 %v5240_v14, %v436_v4  ;;  %4349 = vtanh.f32 %v2483_v2 }
 0x11d   :  { %v4328_v10 = vpop.eup %4327  ;;  %2990 = vst [vmem:[%s6333_s3 + $0x70] sm:$0xff] %v4326_v8  ;;  %v2545_v11 = vadd.f32 %v5240_v14, %v1047_v7  ;;  %4351 = vtanh.f32 %v2547_v6  ;;  %v3835_v15 = vpop.f32.mrb[20].mxu0 }
 0x11e   :  { %v4330_v12 = vpop.eup %4329  ;;  %3054 = vst [vmem:[%s6333_s3 + $0x270] sm:$0xff] %v4328_v10  ;;  %4353 = vtanh.f32 %v2481_v9  ;;  %v2486_v17 = vadd.f32 %v3835_v15, %v5240_v14  ;;  %v3915_v18 = vpop.f32.mrb[20].mxu1 }
 0x11f   :  { %v4332_v13 = vpop.eup %4331  ;;  %2988 = vst [vmem:[%s6333_s3 + $0x60] sm:$0xff] %v4330_v12  ;;  %v449_v19 = vpop.f32.mrb[21].mxu0  ;;  %4355 = vtanh.f32 %v2545_v11  ;;  %v2550_v21 = vadd.f32 %v3915_v18, %v5240_v14 }
 0x120   :  { %v4334_v16 = vpop.eup %4333  ;;  %3052 = vst [vmem:[%s6333_s3 + $0x260] sm:$0xff] %v4332_v13  ;;  %v2484_v22 = vadd.f32 %v5240_v14, %v449_v19  ;;  %v1060_v23 = vpop.f32.mrb[21].mxu1  ;;  %4357 = vtanh.f32 %v2486_v17 }
 0x121   :  { %v4336_v20 = vpop.eup %4335  ;;  %2991 = vst [vmem:[%s6333_s3 + $0x78] sm:$0xff] %v4334_v16  ;;  %v3836_v24 = vpop.f32.mrb[22].mxu0  ;;  %v2548_v26 = vadd.f32 %v5240_v14, %v1060_v23  ;;  %4359 = vtanh.f32 %v2550_v21 }
 0x122   :  { %v4338_v25 = vpop.eup %4337  ;;  %3055 = vst [vmem:[%s6333_s3 + $0x278] sm:$0xff] %v4336_v20  ;;  %v2487_v27 = vadd.f32 %v3836_v24, %v5240_v14  ;;  %v3916_v28 = vpop.f32.mrb[22].mxu1  ;;  %4361 = vtanh.f32 %v2484_v22 }
 0x123   :  { %v452_v29 = vpop.f32.mrb[23].mxu0  ;;  %v4340_v30 = vpop.eup %4339  ;;  %2989 = vst [vmem:[%s6333_s3 + $0x68] sm:$0xff] %v4338_v25  ;;  %v2551_v31 = vadd.f32 %v3916_v28, %v5240_v14  ;;  %4363 = vtanh.f32 %v2548_v26 }
 0x124   :  { %v1063_v32 = vpop.f32.mrb[23].mxu1  ;;  %v4342_v33 = vpop.eup %4341  ;;  %3053 = vst [vmem:[%s6333_s3 + $0x268] sm:$0xff] %v4340_v30  ;;  %v2485_v34 = vadd.f32 %v5240_v14, %v452_v29  ;;  %4365 = vtanh.f32 %v2487_v27 }
 0x125   :  { %v4344_v35 = vpop.eup %4343  ;;  %2994 = vst [vmem:[%s6333_s3 + $0x90] sm:$0xff] %v4342_v33  ;;  %v2549_v36 = vadd.f32 %v5240_v14, %v1063_v32  ;;  %4367 = vtanh.f32 %v2551_v31  ;;  %v3839_v39 = vpop.f32.mrb[24].mxu0 }
 0x126   :  { %v4346_v37 = vpop.eup %4345  ;;  %3058 = vst [vmem:[%s6333_s3 + $0x290] sm:$0xff] %v4344_v35  ;;  %4369 = vtanh.f32 %v2485_v34  ;;  %v2490_v41 = vadd.f32 %v3839_v39, %v5240_v14  ;;  %v3919_v42 = vpop.f32.mrb[24].mxu1 }
 0x127   :  { %v4348_v38 = vpop.eup %4347  ;;  %2992 = vst [vmem:[%s6333_s3 + $0x80] sm:$0xff] %v4346_v37  ;;  %v465_v43 = vpop.f32.mrb[25].mxu0  ;;  %4371 = vtanh.f32 %v2549_v36  ;;  %v2554_v45 = vadd.f32 %v3919_v42, %v5240_v14 }
 0x128   :  { %v4350_v40 = vpop.eup %4349  ;;  %3056 = vst [vmem:[%s6333_s3 + $0x280] sm:$0xff] %v4348_v38  ;;  %v2488_v46 = vadd.f32 %v5240_v14, %v465_v43  ;;  %v1076_v47 = vpop.f32.mrb[25].mxu1  ;;  %4373 = vtanh.f32 %v2490_v41 }
 0x129   :  { %v4352_v44 = vpop.eup %4351  ;;  %2995 = vst [vmem:[%s6333_s3 + $0x98] sm:$0xff] %v4350_v40  ;;  %v3840_v48 = vpop.f32.mrb[26].mxu0  ;;  %v2552_v50 = vadd.f32 %v5240_v14, %v1076_v47  ;;  %4375 = vtanh.f32 %v2554_v45 }
 0x12a   :  { %v4354_v49 = vpop.eup %4353  ;;  %3059 = vst [vmem:[%s6333_s3 + $0x298] sm:$0xff] %v4352_v44  ;;  %v2491_v51 = vadd.f32 %v3840_v48, %v5240_v14  ;;  %v3920_v52 = vpop.f32.mrb[26].mxu1  ;;  %4377 = vtanh.f32 %v2488_v46 }
 0x12b   :  { %v468_v53 = vpop.f32.mrb[27].mxu0  ;;  %v4356_v54 = vpop.eup %4355  ;;  %2993 = vst [vmem:[%s6333_s3 + $0x88] sm:$0xff] %v4354_v49  ;;  %v2555_v55 = vadd.f32 %v3920_v52, %v5240_v14  ;;  %4379 = vtanh.f32 %v2552_v50 }
 0x12c   :  { %v1079_v56 = vpop.f32.mrb[27].mxu1  ;;  %v4358_v57 = vpop.eup %4357  ;;  %3057 = vst [vmem:[%s6333_s3 + $0x288] sm:$0xff] %v4356_v54  ;;  %v2489_v58 = vadd.f32 %v5240_v14, %v468_v53  ;;  %4381 = vtanh.f32 %v2491_v51 }
 0x12d   :  { %v4360_v59 = vpop.eup %4359  ;;  %2998 = vst [vmem:[%s6333_s3 + $0xb0] sm:$0xff] %v4358_v57  ;;  %v2553_v60 = vadd.f32 %v5240_v14, %v1079_v56  ;;  %4383 = vtanh.f32 %v2555_v55  ;;  %v3843_v63 = vpop.f32.mrb[28].mxu0 }
 0x12e   :  { %v4362_v61 = vpop.eup %4361  ;;  %3062 = vst [vmem:[%s6333_s3 + $0x2b0] sm:$0xff] %v4360_v59  ;;  %4385 = vtanh.f32 %v2489_v58  ;;  %v2494_v1 = vadd.f32 %v3843_v63, %v5240_v14  ;;  %v3923_v2 = vpop.f32.mrb[28].mxu1 }
 0x12f   :  { %v4364_v62 = vpop.eup %4363  ;;  %2996 = vst [vmem:[%s6333_s3 + $0xa0] sm:$0xff] %v4362_v61  ;;  %v481_v3 = vpop.f32.mrb[29].mxu0  ;;  %4387 = vtanh.f32 %v2553_v60  ;;  %v2558_v5 = vadd.f32 %v3923_v2, %v5240_v14 }
 0x130   :  { %v4366_v0 = vpop.eup %4365  ;;  %3060 = vst [vmem:[%s6333_s3 + $0x2a0] sm:$0xff] %v4364_v62  ;;  %v2492_v6 = vadd.f32 %v5240_v14, %v481_v3  ;;  %v1092_v7 = vpop.f32.mrb[29].mxu1  ;;  %4389 = vtanh.f32 %v2494_v1 }
 0x131   :  { %v4368_v4 = vpop.eup %4367  ;;  %2999 = vst [vmem:[%s6333_s3 + $0xb8] sm:$0xff] %v4366_v0  ;;  %v3844_v8 = vpop.f32.mrb[30].mxu0  ;;  %v2556_v10 = vadd.f32 %v5240_v14, %v1092_v7  ;;  %4391 = vtanh.f32 %v2558_v5 }
 0x132   :  { %v4370_v9 = vpop.eup %4369  ;;  %3063 = vst [vmem:[%s6333_s3 + $0x2b8] sm:$0xff] %v4368_v4  ;;  %v2495_v11 = vadd.f32 %v3844_v8, %v5240_v14  ;;  %v3924_v12 = vpop.f32.mrb[30].mxu1  ;;  %4393 = vtanh.f32 %v2492_v6 }
 0x133   :  { %v484_v13 = vpop.f32.mrb[31].mxu0  ;;  %v4372_v15 = vpop.eup %4371  ;;  %2997 = vst [vmem:[%s6333_s3 + $0xa8] sm:$0xff] %v4370_v9  ;;  %v2559_v16 = vadd.f32 %v3924_v12, %v5240_v14  ;;  %4395 = vtanh.f32 %v2556_v10 }
 0x134   :  { %v1095_v17 = vpop.f32.mrb[31].mxu1  ;;  %v4374_v18 = vpop.eup %4373  ;;  %3061 = vst [vmem:[%s6333_s3 + $0x2a8] sm:$0xff] %v4372_v15  ;;  %v2493_v19 = vadd.f32 %v5240_v14, %v484_v13  ;;  %4397 = vtanh.f32 %v2495_v11 }
 0x135   :  { %v4376_v20 = vpop.eup %4375  ;;  %3002 = vst [vmem:[%s6333_s3 + $0xd0] sm:$0xff] %v4374_v18  ;;  %v2557_v21 = vadd.f32 %v5240_v14, %v1095_v17  ;;  %4399 = vtanh.f32 %v2559_v16  ;;  %v3847_v24 = vpop.f32.mrb[32].mxu0 }
 0x136   :  { %v4378_v22 = vpop.eup %4377  ;;  %3066 = vst [vmem:[%s6333_s3 + $0x2d0] sm:$0xff] %v4376_v20  ;;  %4401 = vtanh.f32 %v2493_v19  ;;  %v2498_v26 = vadd.f32 %v3847_v24, %v5240_v14  ;;  %v3927_v27 = vpop.f32.mrb[32].mxu1 }
 0x137   :  { %v4380_v23 = vpop.eup %4379  ;;  %3000 = vst [vmem:[%s6333_s3 + $0xc0] sm:$0xff] %v4378_v22  ;;  %v497_v28 = vpop.f32.mrb[33].mxu0  ;;  %4403 = vtanh.f32 %v2557_v21  ;;  %v2562_v30 = vadd.f32 %v3927_v27, %v5240_v14 }
 0x138   :  { %v4382_v25 = vpop.eup %4381  ;;  %3064 = vst [vmem:[%s6333_s3 + $0x2c0] sm:$0xff] %v4380_v23  ;;  %v2496_v31 = vadd.f32 %v5240_v14, %v497_v28  ;;  %v1108_v32 = vpop.f32.mrb[33].mxu1  ;;  %4405 = vtanh.f32 %v2498_v26 }
 0x139   :  { %v4384_v29 = vpop.eup %4383  ;;  %3003 = vst [vmem:[%s6333_s3 + $0xd8] sm:$0xff] %v4382_v25  ;;  %v3848_v33 = vpop.f32.mrb[34].mxu0  ;;  %v2560_v35 = vadd.f32 %v5240_v14, %v1108_v32  ;;  %4407 = vtanh.f32 %v2562_v30 }
 0x13a   :  { %v4386_v34 = vpop.eup %4385  ;;  %3067 = vst [vmem:[%s6333_s3 + $0x2d8] sm:$0xff] %v4384_v29  ;;  %v2499_v36 = vadd.f32 %v3848_v33, %v5240_v14  ;;  %v3928_v37 = vpop.f32.mrb[34].mxu1  ;;  %4409 = vtanh.f32 %v2496_v31 }
 0x13b   :  { %v500_v38 = vpop.f32.mrb[35].mxu0  ;;  %v4388_v39 = vpop.eup %4387  ;;  %3001 = vst [vmem:[%s6333_s3 + $0xc8] sm:$0xff] %v4386_v34  ;;  %v2563_v40 = vadd.f32 %v3928_v37, %v5240_v14  ;;  %4411 = vtanh.f32 %v2560_v35 }
 0x13c   :  { %v1111_v41 = vpop.f32.mrb[35].mxu1  ;;  %v4390_v42 = vpop.eup %4389  ;;  %3065 = vst [vmem:[%s6333_s3 + $0x2c8] sm:$0xff] %v4388_v39  ;;  %v2497_v43 = vadd.f32 %v5240_v14, %v500_v38  ;;  %4413 = vtanh.f32 %v2499_v36 }
 0x13d   :  { %v4392_v44 = vpop.eup %4391  ;;  %3006 = vst [vmem:[%s6333_s3 + $0xf0] sm:$0xff] %v4390_v42  ;;  %v2561_v45 = vadd.f32 %v5240_v14, %v1111_v41  ;;  %4415 = vtanh.f32 %v2563_v40  ;;  %v3851_v48 = vpop.f32.mrb[36].mxu0 }
 0x13e   :  { %v4394_v46 = vpop.eup %4393  ;;  %3070 = vst [vmem:[%s6333_s3 + $0x2f0] sm:$0xff] %v4392_v44  ;;  %4417 = vtanh.f32 %v2497_v43  ;;  %v2502_v50 = vadd.f32 %v3851_v48, %v5240_v14  ;;  %v3931_v51 = vpop.f32.mrb[36].mxu1 }
 0x13f   :  { %v4396_v47 = vpop.eup %4395  ;;  %3004 = vst [vmem:[%s6333_s3 + $0xe0] sm:$0xff] %v4394_v46  ;;  %v513_v52 = vpop.f32.mrb[37].mxu0  ;;  %4419 = vtanh.f32 %v2561_v45  ;;  %v2566_v54 = vadd.f32 %v3931_v51, %v5240_v14 }
 0x140   :  { %v4398_v49 = vpop.eup %4397  ;;  %3068 = vst [vmem:[%s6333_s3 + $0x2e0] sm:$0xff] %v4396_v47  ;;  %v2500_v55 = vadd.f32 %v5240_v14, %v513_v52  ;;  %v1124_v56 = vpop.f32.mrb[37].mxu1  ;;  %4421 = vtanh.f32 %v2502_v50 }
 0x141   :  { %v4400_v53 = vpop.eup %4399  ;;  %3007 = vst [vmem:[%s6333_s3 + $0xf8] sm:$0xff] %v4398_v49  ;;  %v3852_v57 = vpop.f32.mrb[38].mxu0  ;;  %v2564_v59 = vadd.f32 %v5240_v14, %v1124_v56  ;;  %4423 = vtanh.f32 %v2566_v54 }
 0x142   :  { %v4402_v58 = vpop.eup %4401  ;;  %3071 = vst [vmem:[%s6333_s3 + $0x2f8] sm:$0xff] %v4400_v53  ;;  %v2503_v60 = vadd.f32 %v3852_v57, %v5240_v14  ;;  %v3932_v61 = vpop.f32.mrb[38].mxu1  ;;  %4425 = vtanh.f32 %v2500_v55 }
 0x143   :  { %v516_v62 = vpop.f32.mrb[39].mxu0  ;;  %v4404_v63 = vpop.eup %4403  ;;  %3005 = vst [vmem:[%s6333_s3 + $0xe8] sm:$0xff] %v4402_v58  ;;  %v2567_v0 = vadd.f32 %v3932_v61, %v5240_v14  ;;  %4427 = vtanh.f32 %v2564_v59 }
 0x144   :  { %v1127_v1 = vpop.f32.mrb[39].mxu1  ;;  %v4406_v2 = vpop.eup %4405  ;;  %3069 = vst [vmem:[%s6333_s3 + $0x2e8] sm:$0xff] %v4404_v63  ;;  %v2501_v3 = vadd.f32 %v5240_v14, %v516_v62  ;;  %4429 = vtanh.f32 %v2503_v60 }
 0x145   :  { %v4408_v4 = vpop.eup %4407  ;;  %3010 = vst [vmem:[%s6333_s3 + $0x110] sm:$0xff] %v4406_v2  ;;  %v2565_v5 = vadd.f32 %v5240_v14, %v1127_v1  ;;  %4431 = vtanh.f32 %v2567_v0  ;;  %v3855_v8 = vpop.f32.mrb[40].mxu0 }
 0x146   :  { %v4410_v6 = vpop.eup %4409  ;;  %3074 = vst [vmem:[%s6333_s3 + $0x310] sm:$0xff] %v4408_v4  ;;  %4433 = vtanh.f32 %v2501_v3  ;;  %v2506_v10 = vadd.f32 %v3855_v8, %v5240_v14  ;;  %v3935_v11 = vpop.f32.mrb[40].mxu1 }
 0x147   :  { %v4412_v7 = vpop.eup %4411  ;;  %3008 = vst [vmem:[%s6333_s3 + $0x100] sm:$0xff] %v4410_v6  ;;  %v529_v12 = vpop.f32.mrb[41].mxu0  ;;  %4435 = vtanh.f32 %v2565_v5  ;;  %v2570_v15 = vadd.f32 %v3935_v11, %v5240_v14 }
 0x148   :  { %v4414_v9 = vpop.eup %4413  ;;  %3072 = vst [vmem:[%s6333_s3 + $0x300] sm:$0xff] %v4412_v7  ;;  %v2504_v16 = vadd.f32 %v5240_v14, %v529_v12  ;;  %v1140_v17 = vpop.f32.mrb[41].mxu1  ;;  %4437 = vtanh.f32 %v2506_v10 }
 0x149   :  { %v4416_v13 = vpop.eup %4415  ;;  %3011 = vst [vmem:[%s6333_s3 + $0x118] sm:$0xff] %v4414_v9  ;;  %v3856_v18 = vpop.f32.mrb[42].mxu0  ;;  %v2568_v20 = vadd.f32 %v5240_v14, %v1140_v17  ;;  %4439 = vtanh.f32 %v2570_v15  ;;  %v5661_v9 = vld [vmem:[%s6332_s2] ss:$0 sm:$0xff] }
 0x14a   :  { %v4418_v19 = vpop.eup %4417  ;;  %3075 = vst [vmem:[%s6333_s3 + $0x318] sm:$0xff] %v4416_v13  ;;  %v2507_v21 = vadd.f32 %v3856_v18, %v5240_v14  ;;  %v3936_v22 = vpop.f32.mrb[42].mxu1  ;;  %4441 = vtanh.f32 %v2504_v16 }
 0x14b   :  { %v532_v23 = vpop.f32.mrb[43].mxu0  ;;  %v4420_v24 = vpop.eup %4419  ;;  %3009 = vst [vmem:[%s6333_s3 + $0x108] sm:$0xff] %v4418_v19  ;;  %v2571_v25 = vadd.f32 %v3936_v22, %v5240_v14  ;;  %4443 = vtanh.f32 %v2568_v20 }
 0x14c   :  { %v1143_v26 = vpop.f32.mrb[43].mxu1  ;;  %v4422_v27 = vpop.eup %4421  ;;  %3073 = vst [vmem:[%s6333_s3 + $0x308] sm:$0xff] %v4420_v24  ;;  %v2505_v28 = vadd.f32 %v5240_v14, %v532_v23  ;;  %4445 = vtanh.f32 %v2507_v21 }
 0x14d   :  { %v4424_v29 = vpop.eup %4423  ;;  %3014 = vst [vmem:[%s6333_s3 + $0x130] sm:$0xff] %v4422_v27  ;;  %v2569_v30 = vadd.f32 %v5240_v14, %v1143_v26  ;;  %4447 = vtanh.f32 %v2571_v25  ;;  %v3859_v33 = vpop.f32.mrb[44].mxu0 }
 0x14e   :  { %v4426_v31 = vpop.eup %4425  ;;  %3078 = vst [vmem:[%s6333_s3 + $0x330] sm:$0xff] %v4424_v29  ;;  %4449 = vtanh.f32 %v2505_v28  ;;  %v2510_v35 = vadd.f32 %v3859_v33, %v5240_v14  ;;  %v3939_v36 = vpop.f32.mrb[44].mxu1 }
 0x14f   :  { %v4428_v32 = vpop.eup %4427  ;;  %3012 = vst [vmem:[%s6333_s3 + $0x120] sm:$0xff] %v4426_v31  ;;  %v545_v37 = vpop.f32.mrb[45].mxu0  ;;  %4451 = vtanh.f32 %v2569_v30  ;;  %v2574_v39 = vadd.f32 %v3939_v36, %v5240_v14 }
 0x150   :  { %v4430_v34 = vpop.eup %4429  ;;  %3076 = vst [vmem:[%s6333_s3 + $0x320] sm:$0xff] %v4428_v32  ;;  %v2508_v40 = vadd.f32 %v5240_v14, %v545_v37  ;;  %v1156_v41 = vpop.f32.mrb[45].mxu1  ;;  %4453 = vtanh.f32 %v2510_v35 }
 0x151   :  { %v4432_v38 = vpop.eup %4431  ;;  %3015 = vst [vmem:[%s6333_s3 + $0x138] sm:$0xff] %v4430_v34  ;;  %v3860_v42 = vpop.f32.mrb[46].mxu0  ;;  %v2572_v44 = vadd.f32 %v5240_v14, %v1156_v41  ;;  %4455 = vtanh.f32 %v2574_v39 }
 0x152   :  { %v4434_v43 = vpop.eup %4433  ;;  %3079 = vst [vmem:[%s6333_s3 + $0x338] sm:$0xff] %v4432_v38  ;;  %v2511_v45 = vadd.f32 %v3860_v42, %v5240_v14  ;;  %v3940_v46 = vpop.f32.mrb[46].mxu1  ;;  %4457 = vtanh.f32 %v2508_v40 }
 0x153   :  { %v548_v47 = vpop.f32.mrb[47].mxu0  ;;  %v4436_v48 = vpop.eup %4435  ;;  %3013 = vst [vmem:[%s6333_s3 + $0x128] sm:$0xff] %v4434_v43  ;;  %v2575_v49 = vadd.f32 %v3940_v46, %v5240_v14  ;;  %4459 = vtanh.f32 %v2572_v44 }
 0x154   :  { %v1159_v50 = vpop.f32.mrb[47].mxu1  ;;  %v4438_v51 = vpop.eup %4437  ;;  %3077 = vst [vmem:[%s6333_s3 + $0x328] sm:$0xff] %v4436_v48  ;;  %v2509_v52 = vadd.f32 %v5240_v14, %v548_v47  ;;  %4461 = vtanh.f32 %v2511_v45 }
 0x155   :  { %v4440_v53 = vpop.eup %4439  ;;  %3018 = vst [vmem:[%s6333_s3 + $0x150] sm:$0xff] %v4438_v51  ;;  %v2573_v54 = vadd.f32 %v5240_v14, %v1159_v50  ;;  %4463 = vtanh.f32 %v2575_v49  ;;  %v3863_v57 = vpop.f32.mrb[48].mxu0 }
 0x156   :  { %v4442_v55 = vpop.eup %4441  ;;  %3082 = vst [vmem:[%s6333_s3 + $0x350] sm:$0xff] %v4440_v53  ;;  %4465 = vtanh.f32 %v2509_v52  ;;  %v2514_v59 = vadd.f32 %v3863_v57, %v5240_v14  ;;  %v3943_v60 = vpop.f32.mrb[48].mxu1 }
 0x157   :  { %v4444_v56 = vpop.eup %4443  ;;  %3016 = vst [vmem:[%s6333_s3 + $0x140] sm:$0xff] %v4442_v55  ;;  %v561_v61 = vpop.f32.mrb[49].mxu0  ;;  %4467 = vtanh.f32 %v2573_v54  ;;  %v2578_v63 = vadd.f32 %v3943_v60, %v5240_v14 }
 0x158   :  { %v4446_v58 = vpop.eup %4445  ;;  %3080 = vst [vmem:[%s6333_s3 + $0x340] sm:$0xff] %v4444_v56  ;;  %v2512_v0 = vadd.f32 %v5240_v14, %v561_v61  ;;  %v1172_v1 = vpop.f32.mrb[49].mxu1  ;;  %4469 = vtanh.f32 %v2514_v59 }
 0x159   :  { %v4448_v62 = vpop.eup %4447  ;;  %3019 = vst [vmem:[%s6333_s3 + $0x158] sm:$0xff] %v4446_v58  ;;  %v3864_v2 = vpop.f32.mrb[50].mxu0  ;;  %v2576_v4 = vadd.f32 %v5240_v14, %v1172_v1  ;;  %4471 = vtanh.f32 %v2578_v63 }
 0x15a   :  { %v4450_v3 = vpop.eup %4449  ;;  %3083 = vst [vmem:[%s6333_s3 + $0x358] sm:$0xff] %v4448_v62  ;;  %v2515_v5 = vadd.f32 %v3864_v2, %v5240_v14  ;;  %v3944_v6 = vpop.f32.mrb[50].mxu1  ;;  %4473 = vtanh.f32 %v2512_v0 }
 0x15b   :  { %v564_v7 = vpop.f32.mrb[51].mxu0  ;;  %v4452_v8 = vpop.eup %4451  ;;  %3017 = vst [vmem:[%s6333_s3 + $0x148] sm:$0xff] %v4450_v3  ;;  %v2579_v10 = vadd.f32 %v5661_v9, %v3944_v6  ;;  %4475 = vtanh.f32 %v2576_v4 }
 0x15c   :  { %v1175_v11 = vpop.f32.mrb[51].mxu1  ;;  %v4454_v12 = vpop.eup %4453  ;;  %3081 = vst [vmem:[%s6333_s3 + $0x348] sm:$0xff] %v4452_v8  ;;  %v2513_v14 = vadd.f32 %v5661_v9, %v564_v7  ;;  %4477 = vtanh.f32 %v2515_v5 }
 0x15d   :  { %v4456_v13 = vpop.eup %4455  ;;  %3022 = vst [vmem:[%s6333_s3 + $0x170] sm:$0xff] %v4454_v12  ;;  %v2577_v15 = vadd.f32 %v5661_v9, %v1175_v11  ;;  %4479 = vtanh.f32 %v2579_v10  ;;  %v3867_v18 = vpop.f32.mrb[52].mxu0 }
 0x15e   :  { %v4458_v16 = vpop.eup %4457  ;;  %3086 = vst [vmem:[%s6333_s3 + $0x370] sm:$0xff] %v4456_v13  ;;  %4481 = vtanh.f32 %v2513_v14  ;;  %v2518_v20 = vadd.f32 %v5661_v9, %v3867_v18  ;;  %v3947_v21 = vpop.f32.mrb[52].mxu1 }
 0x15f   :  { %v4460_v17 = vpop.eup %4459  ;;  %3020 = vst [vmem:[%s6333_s3 + $0x160] sm:$0xff] %v4458_v16  ;;  %v577_v22 = vpop.f32.mrb[53].mxu0  ;;  %4483 = vtanh.f32 %v2577_v15  ;;  %v2582_v24 = vadd.f32 %v5661_v9, %v3947_v21 }
 0x160   :  { %v4462_v19 = vpop.eup %4461  ;;  %3084 = vst [vmem:[%s6333_s3 + $0x360] sm:$0xff] %v4460_v17  ;;  %v2516_v25 = vadd.f32 %v5661_v9, %v577_v22  ;;  %v1188_v26 = vpop.f32.mrb[53].mxu1  ;;  %4485 = vtanh.f32 %v2518_v20 }
 0x161   :  { %v4464_v23 = vpop.eup %4463  ;;  %3023 = vst [vmem:[%s6333_s3 + $0x178] sm:$0xff] %v4462_v19  ;;  %v3868_v27 = vpop.f32.mrb[54].mxu0  ;;  %v2580_v29 = vadd.f32 %v5661_v9, %v1188_v26  ;;  %4487 = vtanh.f32 %v2582_v24 }
 0x162   :  { %v4466_v28 = vpop.eup %4465  ;;  %3087 = vst [vmem:[%s6333_s3 + $0x378] sm:$0xff] %v4464_v23  ;;  %v2519_v30 = vadd.f32 %v5661_v9, %v3868_v27  ;;  %v3948_v31 = vpop.f32.mrb[54].mxu1  ;;  %4489 = vtanh.f32 %v2516_v25 }
 0x163   :  { %v580_v32 = vpop.f32.mrb[55].mxu0  ;;  %v4468_v33 = vpop.eup %4467  ;;  %3021 = vst [vmem:[%s6333_s3 + $0x168] sm:$0xff] %v4466_v28  ;;  %v2583_v34 = vadd.f32 %v5661_v9, %v3948_v31  ;;  %4491 = vtanh.f32 %v2580_v29 }
 0x164   :  { %v1191_v35 = vpop.f32.mrb[55].mxu1  ;;  %v4470_v36 = vpop.eup %4469  ;;  %3085 = vst [vmem:[%s6333_s3 + $0x368] sm:$0xff] %v4468_v33  ;;  %v2517_v37 = vadd.f32 %v5661_v9, %v580_v32  ;;  %4493 = vtanh.f32 %v2519_v30 }
 0x165   :  { %v4472_v38 = vpop.eup %4471  ;;  %3026 = vst [vmem:[%s6333_s3 + $0x190] sm:$0xff] %v4470_v36  ;;  %v2581_v39 = vadd.f32 %v5661_v9, %v1191_v35  ;;  %4495 = vtanh.f32 %v2583_v34  ;;  %v3871_v42 = vpop.f32.mrb[56].mxu0 }
 0x166   :  { %v4474_v40 = vpop.eup %4473  ;;  %3090 = vst [vmem:[%s6333_s3 + $0x390] sm:$0xff] %v4472_v38  ;;  %4497 = vtanh.f32 %v2517_v37  ;;  %v2522_v44 = vadd.f32 %v5661_v9, %v3871_v42  ;;  %v3951_v45 = vpop.f32.mrb[56].mxu1 }
 0x167   :  { %v4476_v41 = vpop.eup %4475  ;;  %3024 = vst [vmem:[%s6333_s3 + $0x180] sm:$0xff] %v4474_v40  ;;  %v593_v46 = vpop.f32.mrb[57].mxu0  ;;  %4499 = vtanh.f32 %v2581_v39  ;;  %v2586_v48 = vadd.f32 %v5661_v9, %v3951_v45 }
 0x168   :  { %v4478_v43 = vpop.eup %4477  ;;  %3088 = vst [vmem:[%s6333_s3 + $0x380] sm:$0xff] %v4476_v41  ;;  %v2520_v49 = vadd.f32 %v5661_v9, %v593_v46  ;;  %v1204_v50 = vpop.f32.mrb[57].mxu1  ;;  %4501 = vtanh.f32 %v2522_v44 }
 0x169   :  { %v4480_v47 = vpop.eup %4479  ;;  %3027 = vst [vmem:[%s6333_s3 + $0x198] sm:$0xff] %v4478_v43  ;;  %v3872_v51 = vpop.f32.mrb[58].mxu0  ;;  %v2584_v53 = vadd.f32 %v5661_v9, %v1204_v50  ;;  %4503 = vtanh.f32 %v2586_v48 }
 0x16a   :  { %v4482_v52 = vpop.eup %4481  ;;  %3091 = vst [vmem:[%s6333_s3 + $0x398] sm:$0xff] %v4480_v47  ;;  %v2523_v54 = vadd.f32 %v5661_v9, %v3872_v51  ;;  %v3952_v55 = vpop.f32.mrb[58].mxu1  ;;  %4505 = vtanh.f32 %v2520_v49 }
 0x16b   :  { %v596_v56 = vpop.f32.mrb[59].mxu0  ;;  %v4484_v57 = vpop.eup %4483  ;;  %3025 = vst [vmem:[%s6333_s3 + $0x188] sm:$0xff] %v4482_v52  ;;  %v2587_v58 = vadd.f32 %v5661_v9, %v3952_v55  ;;  %4507 = vtanh.f32 %v2584_v53 }
 0x16c   :  { %v1207_v59 = vpop.f32.mrb[59].mxu1  ;;  %v4486_v60 = vpop.eup %4485  ;;  %3089 = vst [vmem:[%s6333_s3 + $0x388] sm:$0xff] %v4484_v57  ;;  %v2521_v61 = vadd.f32 %v5661_v9, %v596_v56  ;;  %4509 = vtanh.f32 %v2523_v54 }
 0x16d   :  { %v4488_v62 = vpop.eup %4487  ;;  %3030 = vst [vmem:[%s6333_s3 + $0x1b0] sm:$0xff] %v4486_v60  ;;  %v2585_v63 = vadd.f32 %v5661_v9, %v1207_v59  ;;  %4511 = vtanh.f32 %v2587_v58  ;;  %v3875_v2 = vpop.f32.mrb[60].mxu0 }
 0x16e   :  { %v4490_v0 = vpop.eup %4489  ;;  %3094 = vst [vmem:[%s6333_s3 + $0x3b0] sm:$0xff] %v4488_v62  ;;  %4513 = vtanh.f32 %v2521_v61  ;;  %v2526_v4 = vadd.f32 %v5661_v9, %v3875_v2  ;;  %v3955_v5 = vpop.f32.mrb[60].mxu1 }
 0x16f   :  { %v4492_v1 = vpop.eup %4491  ;;  %3028 = vst [vmem:[%s6333_s3 + $0x1a0] sm:$0xff] %v4490_v0  ;;  %v609_v6 = vpop.f32.mrb[61].mxu0  ;;  %4515 = vtanh.f32 %v2585_v63  ;;  %v2590_v8 = vadd.f32 %v5661_v9, %v3955_v5 }
 0x170   :  { %v4494_v3 = vpop.eup %4493  ;;  %3092 = vst [vmem:[%s6333_s3 + $0x3a0] sm:$0xff] %v4492_v1  ;;  %v2524_v10 = vadd.f32 %v5661_v9, %v609_v6  ;;  %v1220_v11 = vpop.f32.mrb[61].mxu1  ;;  %4517 = vtanh.f32 %v2526_v4 }
 0x171   :  { %v4496_v7 = vpop.eup %4495  ;;  %3031 = vst [vmem:[%s6333_s3 + $0x1b8] sm:$0xff] %v4494_v3  ;;  %v3876_v12 = vpop.f32.mrb[62].mxu0  ;;  %v2588_v13 = vadd.f32 %v5661_v9, %v1220_v11  ;;  %4519 = vtanh.f32 %v2590_v8 }
 0x172   :  { %v4498_v14 = vpop.eup %4497  ;;  %3095 = vst [vmem:[%s6333_s3 + $0x3b8] sm:$0xff] %v4496_v7  ;;  %v2527_v15 = vadd.f32 %v5661_v9, %v3876_v12  ;;  %v3956_v16 = vpop.f32.mrb[62].mxu1  ;;  %4521 = vtanh.f32 %v2524_v10 }
 0x173   :  { %v612_v17 = vpop.f32.mrb[63].mxu0  ;;  %v4500_v18 = vpop.eup %4499  ;;  %3029 = vst [vmem:[%s6333_s3 + $0x1a8] sm:$0xff] %v4498_v14  ;;  %v2591_v19 = vadd.f32 %v5661_v9, %v3956_v16  ;;  %4523 = vtanh.f32 %v2588_v13 }
 0x174   :  { %v1223_v20 = vpop.f32.mrb[63].mxu1  ;;  %v4502_v21 = vpop.eup %4501  ;;  %3093 = vst [vmem:[%s6333_s3 + $0x3a8] sm:$0xff] %v4500_v18  ;;  %v2525_v22 = vadd.f32 %v5661_v9, %v612_v17  ;;  %4525 = vtanh.f32 %v2527_v15 }
 0x175   :  { %v4504_v23 = vpop.eup %4503  ;;  %3034 = vst [vmem:[%s6333_s3 + $0x1d0] sm:$0xff] %v4502_v21  ;;  %v2589_v24 = vadd.f32 %v5661_v9, %v1223_v20  ;;  %4527 = vtanh.f32 %v2591_v19  ;;  %v3975_v27 = vpop.f32.mrb[64].mxu0 }
 0x176   :  { %v4506_v25 = vpop.eup %4505  ;;  %3098 = vst [vmem:[%s6333_s3 + $0x3d0] sm:$0xff] %v4504_v23  ;;  %4529 = vtanh.f32 %v2525_v22  ;;  %v2594_v29 = vadd.f32 %v5661_v9, %v3975_v27  ;;  %v4055_v30 = vpop.f32.mrb[64].mxu1 }
 0x177   :  { %v4508_v26 = vpop.eup %4507  ;;  %3032 = vst [vmem:[%s6333_s3 + $0x1c0] sm:$0xff] %v4506_v25  ;;  %v1591_v31 = vpop.f32.mrb[65].mxu0  ;;  %4531 = vtanh.f32 %v2589_v24  ;;  %v2658_v33 = vadd.f32 %v5661_v9, %v4055_v30 }
 0x178   :  { %v4510_v28 = vpop.eup %4509  ;;  %3096 = vst [vmem:[%s6333_s3 + $0x3c0] sm:$0xff] %v4508_v26  ;;  %v2592_v34 = vadd.f32 %v5661_v9, %v1591_v31  ;;  %v2202_v35 = vpop.f32.mrb[65].mxu1  ;;  %4533 = vtanh.f32 %v2594_v29 }
 0x179   :  { %v4512_v32 = vpop.eup %4511  ;;  %3035 = vst [vmem:[%s6333_s3 + $0x1d8] sm:$0xff] %v4510_v28  ;;  %v3976_v36 = vpop.f32.mrb[66].mxu0  ;;  %v2656_v38 = vadd.f32 %v5661_v9, %v2202_v35  ;;  %4535 = vtanh.f32 %v2658_v33 }
 0x17a   :  { %v4514_v37 = vpop.eup %4513  ;;  %3099 = vst [vmem:[%s6333_s3 + $0x3d8] sm:$0xff] %v4512_v32  ;;  %v2595_v39 = vadd.f32 %v5661_v9, %v3976_v36  ;;  %v4056_v40 = vpop.f32.mrb[66].mxu1  ;;  %4537 = vtanh.f32 %v2592_v34 }
 0x17b   :  { %v1594_v41 = vpop.f32.mrb[67].mxu0  ;;  %v4516_v42 = vpop.eup %4515  ;;  %3033 = vst [vmem:[%s6333_s3 + $0x1c8] sm:$0xff] %v4514_v37  ;;  %v2659_v43 = vadd.f32 %v5661_v9, %v4056_v40  ;;  %4539 = vtanh.f32 %v2656_v38 }
 0x17c   :  { %v2205_v44 = vpop.f32.mrb[67].mxu1  ;;  %v4518_v45 = vpop.eup %4517  ;;  %3097 = vst [vmem:[%s6333_s3 + $0x3c8] sm:$0xff] %v4516_v42  ;;  %v2593_v46 = vadd.f32 %v5661_v9, %v1594_v41  ;;  %4541 = vtanh.f32 %v2595_v39 }
 0x17d   :  { %v4520_v47 = vpop.eup %4519  ;;  %3038 = vst [vmem:[%s6333_s3 + $0x1f0] sm:$0xff] %v4518_v45  ;;  %v2657_v48 = vadd.f32 %v5661_v9, %v2205_v44  ;;  %4543 = vtanh.f32 %v2659_v43  ;;  %v3979_v51 = vpop.f32.mrb[68].mxu0 }
 0x17e   :  { %v4522_v49 = vpop.eup %4521  ;;  %3102 = vst [vmem:[%s6333_s3 + $0x3f0] sm:$0xff] %v4520_v47  ;;  %4545 = vtanh.f32 %v2593_v46  ;;  %v2598_v53 = vadd.f32 %v5661_v9, %v3979_v51  ;;  %v4059_v54 = vpop.f32.mrb[68].mxu1 }
 0x17f   :  { %v4524_v50 = vpop.eup %4523  ;;  %3036 = vst [vmem:[%s6333_s3 + $0x1e0] sm:$0xff] %v4522_v49  ;;  %v1607_v55 = vpop.f32.mrb[69].mxu0  ;;  %4547 = vtanh.f32 %v2657_v48  ;;  %v2662_v57 = vadd.f32 %v5661_v9, %v4059_v54 }
 0x180   :  { %v4526_v52 = vpop.eup %4525  ;;  %3100 = vst [vmem:[%s6333_s3 + $0x3e0] sm:$0xff] %v4524_v50  ;;  %v2596_v58 = vadd.f32 %v5661_v9, %v1607_v55  ;;  %v2218_v59 = vpop.f32.mrb[69].mxu1  ;;  %4549 = vtanh.f32 %v2598_v53 }
 0x181   :  { %v4528_v56 = vpop.eup %4527  ;;  %3039 = vst [vmem:[%s6333_s3 + $0x1f8] sm:$0xff] %v4526_v52  ;;  %v3980_v60 = vpop.f32.mrb[70].mxu0  ;;  %v2660_v62 = vadd.f32 %v5661_v9, %v2218_v59  ;;  %4551 = vtanh.f32 %v2662_v57 }
 0x182   :  { %v4530_v61 = vpop.eup %4529  ;;  %3103 = vst [vmem:[%s6333_s3 + $0x3f8] sm:$0xff] %v4528_v56  ;;  %v2599_v63 = vadd.f32 %v5661_v9, %v3980_v60  ;;  %v4060_v0 = vpop.f32.mrb[70].mxu1  ;;  %4553 = vtanh.f32 %v2596_v58 }
 0x183   :  { %v1610_v1 = vpop.f32.mrb[71].mxu0  ;;  %v4532_v2 = vpop.eup %4531  ;;  %3037 = vst [vmem:[%s6333_s3 + $0x1e8] sm:$0xff] %v4530_v61  ;;  %v2663_v3 = vadd.f32 %v5661_v9, %v4060_v0  ;;  %4555 = vtanh.f32 %v2660_v62 }
 0x184   :  { %v2221_v4 = vpop.f32.mrb[71].mxu1  ;;  %v4534_v5 = vpop.eup %4533  ;;  %3101 = vst [vmem:[%s6333_s3 + $0x3e8] sm:$0xff] %v4532_v2  ;;  %v2597_v6 = vadd.f32 %v5661_v9, %v1610_v1  ;;  %4557 = vtanh.f32 %v2599_v63 }
 0x185   :  { %v4536_v7 = vpop.eup %4535  ;;  %3106 = vst [vmem:[%s6333_s3 + $0x410] sm:$0xff] %v4534_v5  ;;  %v2661_v8 = vadd.f32 %v5661_v9, %v2221_v4  ;;  %4559 = vtanh.f32 %v2663_v3  ;;  %v3983_v12 = vpop.f32.mrb[72].mxu0 }
 0x186   :  { %v4538_v10 = vpop.eup %4537  ;;  %3170 = vst [vmem:[%s6333_s3 + $0x610] sm:$0xff] %v4536_v7  ;;  %4561 = vtanh.f32 %v2597_v6  ;;  %v2602_v13 = vadd.f32 %v5661_v9, %v3983_v12  ;;  %v4063_v15 = vpop.f32.mrb[72].mxu1 }
 0x187   :  { %v4540_v11 = vpop.eup %4539  ;;  %3104 = vst [vmem:[%s6333_s3 + $0x400] sm:$0xff] %v4538_v10  ;;  %v1623_v16 = vpop.f32.mrb[73].mxu0  ;;  %4563 = vtanh.f32 %v2661_v8  ;;  %v2666_v18 = vadd.f32 %v5661_v9, %v4063_v15 }
 0x188   :  { %v4542_v14 = vpop.eup %4541  ;;  %3168 = vst [vmem:[%s6333_s3 + $0x600] sm:$0xff] %v4540_v11  ;;  %v2600_v19 = vadd.f32 %v5661_v9, %v1623_v16  ;;  %v2234_v20 = vpop.f32.mrb[73].mxu1  ;;  %4565 = vtanh.f32 %v2602_v13 }
 0x189   :  { %v4544_v17 = vpop.eup %4543  ;;  %3107 = vst [vmem:[%s6333_s3 + $0x418] sm:$0xff] %v4542_v14  ;;  %v3984_v21 = vpop.f32.mrb[74].mxu0  ;;  %v2664_v23 = vadd.f32 %v5661_v9, %v2234_v20  ;;  %4567 = vtanh.f32 %v2666_v18 }
 0x18a   :  { %v4546_v22 = vpop.eup %4545  ;;  %3171 = vst [vmem:[%s6333_s3 + $0x618] sm:$0xff] %v4544_v17  ;;  %v2603_v24 = vadd.f32 %v5661_v9, %v3984_v21  ;;  %v4064_v25 = vpop.f32.mrb[74].mxu1  ;;  %4569 = vtanh.f32 %v2600_v19 }
 0x18b   :  { %v1626_v26 = vpop.f32.mrb[75].mxu0  ;;  %v4548_v27 = vpop.eup %4547  ;;  %3105 = vst [vmem:[%s6333_s3 + $0x408] sm:$0xff] %v4546_v22  ;;  %v2667_v28 = vadd.f32 %v5661_v9, %v4064_v25  ;;  %4571 = vtanh.f32 %v2664_v23 }
 0x18c   :  { %v2237_v29 = vpop.f32.mrb[75].mxu1  ;;  %v4550_v30 = vpop.eup %4549  ;;  %3169 = vst [vmem:[%s6333_s3 + $0x608] sm:$0xff] %v4548_v27  ;;  %v2601_v31 = vadd.f32 %v5661_v9, %v1626_v26  ;;  %4573 = vtanh.f32 %v2603_v24 }
 0x18d   :  { %v4552_v32 = vpop.eup %4551  ;;  %3110 = vst [vmem:[%s6333_s3 + $0x430] sm:$0xff] %v4550_v30  ;;  %v2665_v33 = vadd.f32 %v5661_v9, %v2237_v29  ;;  %4575 = vtanh.f32 %v2667_v28  ;;  %v3987_v36 = vpop.f32.mrb[76].mxu0 }
 0x18e   :  { %v4554_v34 = vpop.eup %4553  ;;  %3174 = vst [vmem:[%s6333_s3 + $0x630] sm:$0xff] %v4552_v32  ;;  %4577 = vtanh.f32 %v2601_v31  ;;  %v2606_v38 = vadd.f32 %v5661_v9, %v3987_v36  ;;  %v4067_v39 = vpop.f32.mrb[76].mxu1 }
 0x18f   :  { %v4556_v35 = vpop.eup %4555  ;;  %3108 = vst [vmem:[%s6333_s3 + $0x420] sm:$0xff] %v4554_v34  ;;  %v1639_v40 = vpop.f32.mrb[77].mxu0  ;;  %4579 = vtanh.f32 %v2665_v33  ;;  %v2670_v42 = vadd.f32 %v5661_v9, %v4067_v39 }
 0x190   :  { %v4558_v37 = vpop.eup %4557  ;;  %3172 = vst [vmem:[%s6333_s3 + $0x620] sm:$0xff] %v4556_v35  ;;  %v2604_v43 = vadd.f32 %v5661_v9, %v1639_v40  ;;  %v2250_v44 = vpop.f32.mrb[77].mxu1  ;;  %4581 = vtanh.f32 %v2606_v38 }
 0x191   :  { %v4560_v41 = vpop.eup %4559  ;;  %3111 = vst [vmem:[%s6333_s3 + $0x438] sm:$0xff] %v4558_v37  ;;  %v3988_v45 = vpop.f32.mrb[78].mxu0  ;;  %v2668_v47 = vadd.f32 %v5661_v9, %v2250_v44  ;;  %4583 = vtanh.f32 %v2670_v42 }
 0x192   :  { %v4562_v46 = vpop.eup %4561  ;;  %3175 = vst [vmem:[%s6333_s3 + $0x638] sm:$0xff] %v4560_v41  ;;  %v2607_v48 = vadd.f32 %v5661_v9, %v3988_v45  ;;  %v4068_v49 = vpop.f32.mrb[78].mxu1  ;;  %4585 = vtanh.f32 %v2604_v43 }
 0x193   :  { %v1642_v50 = vpop.f32.mrb[79].mxu0  ;;  %v4564_v51 = vpop.eup %4563  ;;  %3109 = vst [vmem:[%s6333_s3 + $0x428] sm:$0xff] %v4562_v46  ;;  %v2671_v52 = vadd.f32 %v5661_v9, %v4068_v49  ;;  %4587 = vtanh.f32 %v2668_v47 }
 0x194   :  { %v2253_v53 = vpop.f32.mrb[79].mxu1  ;;  %v4566_v54 = vpop.eup %4565  ;;  %3173 = vst [vmem:[%s6333_s3 + $0x628] sm:$0xff] %v4564_v51  ;;  %v2605_v55 = vadd.f32 %v5661_v9, %v1642_v50  ;;  %4589 = vtanh.f32 %v2607_v48 }
 0x195   :  { %v4568_v56 = vpop.eup %4567  ;;  %3114 = vst [vmem:[%s6333_s3 + $0x450] sm:$0xff] %v4566_v54  ;;  %v2669_v57 = vadd.f32 %v5661_v9, %v2253_v53  ;;  %4591 = vtanh.f32 %v2671_v52  ;;  %v3991_v60 = vpop.f32.mrb[80].mxu0 }
 0x196   :  { %v4570_v58 = vpop.eup %4569  ;;  %3178 = vst [vmem:[%s6333_s3 + $0x650] sm:$0xff] %v4568_v56  ;;  %4593 = vtanh.f32 %v2605_v55  ;;  %v2610_v62 = vadd.f32 %v5661_v9, %v3991_v60  ;;  %v4071_v63 = vpop.f32.mrb[80].mxu1 }
 0x197   :  { %v4572_v59 = vpop.eup %4571  ;;  %3112 = vst [vmem:[%s6333_s3 + $0x440] sm:$0xff] %v4570_v58  ;;  %v1655_v0 = vpop.f32.mrb[81].mxu0  ;;  %4595 = vtanh.f32 %v2669_v57  ;;  %v2674_v2 = vadd.f32 %v5661_v9, %v4071_v63 }
 0x198   :  { %v4574_v61 = vpop.eup %4573  ;;  %3176 = vst [vmem:[%s6333_s3 + $0x640] sm:$0xff] %v4572_v59  ;;  %v2608_v3 = vadd.f32 %v5661_v9, %v1655_v0  ;;  %v2266_v4 = vpop.f32.mrb[81].mxu1  ;;  %4597 = vtanh.f32 %v2610_v62 }
 0x199   :  { %v4576_v1 = vpop.eup %4575  ;;  %3115 = vst [vmem:[%s6333_s3 + $0x458] sm:$0xff] %v4574_v61  ;;  %v3992_v5 = vpop.f32.mrb[82].mxu0  ;;  %v2672_v7 = vadd.f32 %v5661_v9, %v2266_v4  ;;  %4599 = vtanh.f32 %v2674_v2 }
 0x19a   :  { %v4578_v6 = vpop.eup %4577  ;;  %3179 = vst [vmem:[%s6333_s3 + $0x658] sm:$0xff] %v4576_v1  ;;  %v2611_v8 = vadd.f32 %v5661_v9, %v3992_v5  ;;  %v4072_v10 = vpop.f32.mrb[82].mxu1  ;;  %4601 = vtanh.f32 %v2608_v3 }
 0x19b   :  { %v1658_v11 = vpop.f32.mrb[83].mxu0  ;;  %v4580_v12 = vpop.eup %4579  ;;  %3113 = vst [vmem:[%s6333_s3 + $0x448] sm:$0xff] %v4578_v6  ;;  %v2675_v14 = vadd.f32 %v5661_v9, %v4072_v10  ;;  %4603 = vtanh.f32 %v2672_v7 }
 0x19c   :  { %v2269_v13 = vpop.f32.mrb[83].mxu1  ;;  %v4582_v15 = vpop.eup %4581  ;;  %3177 = vst [vmem:[%s6333_s3 + $0x648] sm:$0xff] %v4580_v12  ;;  %v2609_v16 = vadd.f32 %v5661_v9, %v1658_v11  ;;  %4605 = vtanh.f32 %v2611_v8 }
 0x19d   :  { %v4584_v17 = vpop.eup %4583  ;;  %3118 = vst [vmem:[%s6333_s3 + $0x470] sm:$0xff] %v4582_v15  ;;  %v2673_v18 = vadd.f32 %v5661_v9, %v2269_v13  ;;  %4607 = vtanh.f32 %v2675_v14  ;;  %v3995_v21 = vpop.f32.mrb[84].mxu0 }
 0x19e   :  { %v4586_v19 = vpop.eup %4585  ;;  %3182 = vst [vmem:[%s6333_s3 + $0x670] sm:$0xff] %v4584_v17  ;;  %4609 = vtanh.f32 %v2609_v16  ;;  %v2614_v23 = vadd.f32 %v5661_v9, %v3995_v21  ;;  %v4075_v24 = vpop.f32.mrb[84].mxu1 }
 0x19f   :  { %v4588_v20 = vpop.eup %4587  ;;  %3116 = vst [vmem:[%s6333_s3 + $0x460] sm:$0xff] %v4586_v19  ;;  %v1671_v25 = vpop.f32.mrb[85].mxu0  ;;  %4611 = vtanh.f32 %v2673_v18  ;;  %v2678_v27 = vadd.f32 %v5661_v9, %v4075_v24 }
 0x1a0   :  { %v4590_v22 = vpop.eup %4589  ;;  %3180 = vst [vmem:[%s6333_s3 + $0x660] sm:$0xff] %v4588_v20  ;;  %v2612_v28 = vadd.f32 %v5661_v9, %v1671_v25  ;;  %v2282_v29 = vpop.f32.mrb[85].mxu1  ;;  %4613 = vtanh.f32 %v2614_v23 }
 0x1a1   :  { %v4592_v26 = vpop.eup %4591  ;;  %3119 = vst [vmem:[%s6333_s3 + $0x478] sm:$0xff] %v4590_v22  ;;  %v3996_v30 = vpop.f32.mrb[86].mxu0  ;;  %v2676_v32 = vadd.f32 %v5661_v9, %v2282_v29  ;;  %4615 = vtanh.f32 %v2678_v27 }
 0x1a2   :  { %v4594_v31 = vpop.eup %4593  ;;  %3183 = vst [vmem:[%s6333_s3 + $0x678] sm:$0xff] %v4592_v26  ;;  %v2615_v33 = vadd.f32 %v5661_v9, %v3996_v30  ;;  %v4076_v34 = vpop.f32.mrb[86].mxu1  ;;  %4617 = vtanh.f32 %v2612_v28 }
 0x1a3   :  { %v1674_v35 = vpop.f32.mrb[87].mxu0  ;;  %v4596_v36 = vpop.eup %4595  ;;  %3117 = vst [vmem:[%s6333_s3 + $0x468] sm:$0xff] %v4594_v31  ;;  %v2679_v37 = vadd.f32 %v5661_v9, %v4076_v34  ;;  %4619 = vtanh.f32 %v2676_v32 }
 0x1a4   :  { %v2285_v38 = vpop.f32.mrb[87].mxu1  ;;  %v4598_v39 = vpop.eup %4597  ;;  %3181 = vst [vmem:[%s6333_s3 + $0x668] sm:$0xff] %v4596_v36  ;;  %v2613_v40 = vadd.f32 %v5661_v9, %v1674_v35  ;;  %4621 = vtanh.f32 %v2615_v33 }
 0x1a5   :  { %v4600_v41 = vpop.eup %4599  ;;  %3122 = vst [vmem:[%s6333_s3 + $0x490] sm:$0xff] %v4598_v39  ;;  %v2677_v42 = vadd.f32 %v5661_v9, %v2285_v38  ;;  %4623 = vtanh.f32 %v2679_v37  ;;  %v3999_v45 = vpop.f32.mrb[88].mxu0 }
 0x1a6   :  { %v4602_v43 = vpop.eup %4601  ;;  %3186 = vst [vmem:[%s6333_s3 + $0x690] sm:$0xff] %v4600_v41  ;;  %4625 = vtanh.f32 %v2613_v40  ;;  %v2618_v47 = vadd.f32 %v5661_v9, %v3999_v45  ;;  %v4079_v48 = vpop.f32.mrb[88].mxu1 }
 0x1a7   :  { %v4604_v44 = vpop.eup %4603  ;;  %3120 = vst [vmem:[%s6333_s3 + $0x480] sm:$0xff] %v4602_v43  ;;  %v1687_v49 = vpop.f32.mrb[89].mxu0  ;;  %4627 = vtanh.f32 %v2677_v42  ;;  %v2682_v51 = vadd.f32 %v5661_v9, %v4079_v48 }
 0x1a8   :  { %v4606_v46 = vpop.eup %4605  ;;  %3184 = vst [vmem:[%s6333_s3 + $0x680] sm:$0xff] %v4604_v44  ;;  %v2616_v52 = vadd.f32 %v5661_v9, %v1687_v49  ;;  %v2298_v53 = vpop.f32.mrb[89].mxu1  ;;  %4629 = vtanh.f32 %v2618_v47 }
 0x1a9   :  { %v4608_v50 = vpop.eup %4607  ;;  %3123 = vst [vmem:[%s6333_s3 + $0x498] sm:$0xff] %v4606_v46  ;;  %v4000_v54 = vpop.f32.mrb[90].mxu0  ;;  %v2680_v56 = vadd.f32 %v5661_v9, %v2298_v53  ;;  %4631 = vtanh.f32 %v2682_v51 }
 0x1aa   :  { %v4610_v55 = vpop.eup %4609  ;;  %3187 = vst [vmem:[%s6333_s3 + $0x698] sm:$0xff] %v4608_v50  ;;  %v2619_v57 = vadd.f32 %v5661_v9, %v4000_v54  ;;  %v4080_v58 = vpop.f32.mrb[90].mxu1  ;;  %4633 = vtanh.f32 %v2616_v52 }
 0x1ab   :  { %v1690_v59 = vpop.f32.mrb[91].mxu0  ;;  %v4612_v60 = vpop.eup %4611  ;;  %3121 = vst [vmem:[%s6333_s3 + $0x488] sm:$0xff] %v4610_v55  ;;  %v2683_v61 = vadd.f32 %v5661_v9, %v4080_v58  ;;  %4635 = vtanh.f32 %v2680_v56 }
 0x1ac   :  { %v2301_v62 = vpop.f32.mrb[91].mxu1  ;;  %v4614_v63 = vpop.eup %4613  ;;  %3185 = vst [vmem:[%s6333_s3 + $0x688] sm:$0xff] %v4612_v60  ;;  %v2617_v0 = vadd.f32 %v5661_v9, %v1690_v59  ;;  %4637 = vtanh.f32 %v2619_v57 }
 0x1ad   :  { %v4616_v1 = vpop.eup %4615  ;;  %3126 = vst [vmem:[%s6333_s3 + $0x4b0] sm:$0xff] %v4614_v63  ;;  %v2681_v2 = vadd.f32 %v5661_v9, %v2301_v62  ;;  %4639 = vtanh.f32 %v2683_v61  ;;  %v4003_v5 = vpop.f32.mrb[92].mxu0 }
 0x1ae   :  { %v4618_v3 = vpop.eup %4617  ;;  %3190 = vst [vmem:[%s6333_s3 + $0x6b0] sm:$0xff] %v4616_v1  ;;  %4641 = vtanh.f32 %v2617_v0  ;;  %v2622_v7 = vadd.f32 %v5661_v9, %v4003_v5  ;;  %v4083_v8 = vpop.f32.mrb[92].mxu1  ;;  %v6077_v1 = vld [vmem:[%s6332_s2] ss:$0 sm:$0xff] }
 0x1af   :  { %v4620_v4 = vpop.eup %4619  ;;  %3124 = vst [vmem:[%s6333_s3 + $0x4a0] sm:$0xff] %v4618_v3  ;;  %v1703_v10 = vpop.f32.mrb[93].mxu0  ;;  %4643 = vtanh.f32 %v2681_v2  ;;  %v2686_v12 = vadd.f32 %v5661_v9, %v4083_v8 }
 0x1b0   :  { %v4622_v6 = vpop.eup %4621  ;;  %3188 = vst [vmem:[%s6333_s3 + $0x6a0] sm:$0xff] %v4620_v4  ;;  %v2620_v14 = vadd.f32 %v5661_v9, %v1703_v10  ;;  %v2314_v13 = vpop.f32.mrb[93].mxu1  ;;  %4645 = vtanh.f32 %v2622_v7 }
 0x1b1   :  { %v4624_v11 = vpop.eup %4623  ;;  %3127 = vst [vmem:[%s6333_s3 + $0x4b8] sm:$0xff] %v4622_v6  ;;  %v4004_v15 = vpop.f32.mrb[94].mxu0  ;;  %v2684_v17 = vadd.f32 %v5661_v9, %v2314_v13  ;;  %4647 = vtanh.f32 %v2686_v12 }
 0x1b2   :  { %v4626_v16 = vpop.eup %4625  ;;  %3191 = vst [vmem:[%s6333_s3 + $0x6b8] sm:$0xff] %v4624_v11  ;;  %v2623_v18 = vadd.f32 %v5661_v9, %v4004_v15  ;;  %v4084_v19 = vpop.f32.mrb[94].mxu1  ;;  %4649 = vtanh.f32 %v2620_v14 }
 0x1b3   :  { %v1706_v20 = vpop.f32.mrb[95].mxu0  ;;  %v4628_v21 = vpop.eup %4627  ;;  %3125 = vst [vmem:[%s6333_s3 + $0x4a8] sm:$0xff] %v4626_v16  ;;  %v2687_v22 = vadd.f32 %v5661_v9, %v4084_v19  ;;  %4651 = vtanh.f32 %v2684_v17 }
 0x1b4   :  { %v2317_v23 = vpop.f32.mrb[95].mxu1  ;;  %v4630_v24 = vpop.eup %4629  ;;  %3189 = vst [vmem:[%s6333_s3 + $0x6a8] sm:$0xff] %v4628_v21  ;;  %v2621_v25 = vadd.f32 %v5661_v9, %v1706_v20  ;;  %4653 = vtanh.f32 %v2623_v18 }
 0x1b5   :  { %v4632_v26 = vpop.eup %4631  ;;  %3130 = vst [vmem:[%s6333_s3 + $0x4d0] sm:$0xff] %v4630_v24  ;;  %v2685_v27 = vadd.f32 %v5661_v9, %v2317_v23  ;;  %4655 = vtanh.f32 %v2687_v22  ;;  %v4007_v30 = vpop.f32.mrb[96].mxu0 }
 0x1b6   :  { %v4634_v28 = vpop.eup %4633  ;;  %3194 = vst [vmem:[%s6333_s3 + $0x6d0] sm:$0xff] %v4632_v26  ;;  %4657 = vtanh.f32 %v2621_v25  ;;  %v2626_v32 = vadd.f32 %v5661_v9, %v4007_v30  ;;  %v4087_v33 = vpop.f32.mrb[96].mxu1 }
 0x1b7   :  { %v4636_v29 = vpop.eup %4635  ;;  %3128 = vst [vmem:[%s6333_s3 + $0x4c0] sm:$0xff] %v4634_v28  ;;  %v1719_v34 = vpop.f32.mrb[97].mxu0  ;;  %4659 = vtanh.f32 %v2685_v27  ;;  %v2690_v36 = vadd.f32 %v5661_v9, %v4087_v33 }
 0x1b8   :  { %v4638_v31 = vpop.eup %4637  ;;  %3192 = vst [vmem:[%s6333_s3 + $0x6c0] sm:$0xff] %v4636_v29  ;;  %v2624_v37 = vadd.f32 %v5661_v9, %v1719_v34  ;;  %v2330_v38 = vpop.f32.mrb[97].mxu1  ;;  %4661 = vtanh.f32 %v2626_v32 }
 0x1b9   :  { %v4640_v35 = vpop.eup %4639  ;;  %3131 = vst [vmem:[%s6333_s3 + $0x4d8] sm:$0xff] %v4638_v31  ;;  %v4008_v39 = vpop.f32.mrb[98].mxu0  ;;  %v2688_v41 = vadd.f32 %v5661_v9, %v2330_v38  ;;  %4663 = vtanh.f32 %v2690_v36 }
 0x1ba   :  { %v4642_v40 = vpop.eup %4641  ;;  %3195 = vst [vmem:[%s6333_s3 + $0x6d8] sm:$0xff] %v4640_v35  ;;  %v2627_v42 = vadd.f32 %v5661_v9, %v4008_v39  ;;  %v4088_v43 = vpop.f32.mrb[98].mxu1  ;;  %4665 = vtanh.f32 %v2624_v37 }
 0x1bb   :  { %v1722_v44 = vpop.f32.mrb[99].mxu0  ;;  %v4644_v45 = vpop.eup %4643  ;;  %3129 = vst [vmem:[%s6333_s3 + $0x4c8] sm:$0xff] %v4642_v40  ;;  %v2691_v46 = vadd.f32 %v5661_v9, %v4088_v43  ;;  %4667 = vtanh.f32 %v2688_v41 }
 0x1bc   :  { %v2333_v47 = vpop.f32.mrb[99].mxu1  ;;  %v4646_v48 = vpop.eup %4645  ;;  %3193 = vst [vmem:[%s6333_s3 + $0x6c8] sm:$0xff] %v4644_v45  ;;  %v2625_v49 = vadd.f32 %v5661_v9, %v1722_v44  ;;  %4669 = vtanh.f32 %v2627_v42 }
 0x1bd   :  { %v4648_v50 = vpop.eup %4647  ;;  %3134 = vst [vmem:[%s6333_s3 + $0x4f0] sm:$0xff] %v4646_v48  ;;  %v2689_v51 = vadd.f32 %v5661_v9, %v2333_v47  ;;  %4671 = vtanh.f32 %v2691_v46  ;;  %v4011_v54 = vpop.f32.mrb[100].mxu0 }
 0x1be   :  { %v4650_v52 = vpop.eup %4649  ;;  %3198 = vst [vmem:[%s6333_s3 + $0x6f0] sm:$0xff] %v4648_v50  ;;  %4673 = vtanh.f32 %v2625_v49  ;;  %v2630_v56 = vadd.f32 %v5661_v9, %v4011_v54  ;;  %v4091_v57 = vpop.f32.mrb[100].mxu1 }
 0x1bf   :  { %v4652_v53 = vpop.eup %4651  ;;  %3132 = vst [vmem:[%s6333_s3 + $0x4e0] sm:$0xff] %v4650_v52  ;;  %v1735_v58 = vpop.f32.mrb[101].mxu0  ;;  %4675 = vtanh.f32 %v2689_v51  ;;  %v2694_v60 = vadd.f32 %v5661_v9, %v4091_v57 }
 0x1c0   :  { %v4654_v55 = vpop.eup %4653  ;;  %3196 = vst [vmem:[%s6333_s3 + $0x6e0] sm:$0xff] %v4652_v53  ;;  %v2628_v61 = vadd.f32 %v5661_v9, %v1735_v58  ;;  %v2346_v62 = vpop.f32.mrb[101].mxu1  ;;  %4677 = vtanh.f32 %v2630_v56 }
 0x1c1   :  { %v4656_v59 = vpop.eup %4655  ;;  %3135 = vst [vmem:[%s6333_s3 + $0x4f8] sm:$0xff] %v4654_v55  ;;  %v4012_v63 = vpop.f32.mrb[102].mxu0  ;;  %v2692_v2 = vadd.f32 %v6077_v1, %v2346_v62  ;;  %4679 = vtanh.f32 %v2694_v60 }
 0x1c2   :  { %v4658_v0 = vpop.eup %4657  ;;  %3199 = vst [vmem:[%s6333_s3 + $0x6f8] sm:$0xff] %v4656_v59  ;;  %v2631_v3 = vadd.f32 %v6077_v1, %v4012_v63  ;;  %v4092_v4 = vpop.f32.mrb[102].mxu1  ;;  %4681 = vtanh.f32 %v2628_v61 }
 0x1c3   :  { %v1738_v5 = vpop.f32.mrb[103].mxu0  ;;  %v4660_v9 = vpop.eup %4659  ;;  %3133 = vst [vmem:[%s6333_s3 + $0x4e8] sm:$0xff] %v4658_v0  ;;  %v2695_v6 = vadd.f32 %v6077_v1, %v4092_v4  ;;  %4683 = vtanh.f32 %v2692_v2 }
 0x1c4   :  { %v2349_v7 = vpop.f32.mrb[103].mxu1  ;;  %v4662_v8 = vpop.eup %4661  ;;  %3197 = vst [vmem:[%s6333_s3 + $0x6e8] sm:$0xff] %v4660_v9  ;;  %v2629_v10 = vadd.f32 %v6077_v1, %v1738_v5  ;;  %4685 = vtanh.f32 %v2631_v3 }
 0x1c5   :  { %v4664_v11 = vpop.eup %4663  ;;  %3138 = vst [vmem:[%s6333_s3 + $0x510] sm:$0xff] %v4662_v8  ;;  %v2693_v12 = vadd.f32 %v6077_v1, %v2349_v7  ;;  %4687 = vtanh.f32 %v2695_v6  ;;  %v4015_v15 = vpop.f32.mrb[104].mxu0 }
 0x1c6   :  { %v4666_v14 = vpop.eup %4665  ;;  %3202 = vst [vmem:[%s6333_s3 + $0x710] sm:$0xff] %v4664_v11  ;;  %4689 = vtanh.f32 %v2629_v10  ;;  %v2634_v17 = vadd.f32 %v6077_v1, %v4015_v15  ;;  %v4095_v18 = vpop.f32.mrb[104].mxu1 }
 0x1c7   :  { %v4668_v13 = vpop.eup %4667  ;;  %3136 = vst [vmem:[%s6333_s3 + $0x500] sm:$0xff] %v4666_v14  ;;  %v1751_v19 = vpop.f32.mrb[105].mxu0  ;;  %4691 = vtanh.f32 %v2693_v12  ;;  %v2698_v21 = vadd.f32 %v6077_v1, %v4095_v18 }
 0x1c8   :  { %v4670_v16 = vpop.eup %4669  ;;  %3200 = vst [vmem:[%s6333_s3 + $0x700] sm:$0xff] %v4668_v13  ;;  %v2632_v22 = vadd.f32 %v6077_v1, %v1751_v19  ;;  %v2362_v23 = vpop.f32.mrb[105].mxu1  ;;  %4693 = vtanh.f32 %v2634_v17 }
 0x1c9   :  { %v4672_v20 = vpop.eup %4671  ;;  %3139 = vst [vmem:[%s6333_s3 + $0x518] sm:$0xff] %v4670_v16  ;;  %v4016_v24 = vpop.f32.mrb[106].mxu0  ;;  %v2696_v26 = vadd.f32 %v6077_v1, %v2362_v23  ;;  %4695 = vtanh.f32 %v2698_v21 }
 0x1ca   :  { %v4674_v25 = vpop.eup %4673  ;;  %3203 = vst [vmem:[%s6333_s3 + $0x718] sm:$0xff] %v4672_v20  ;;  %v2635_v27 = vadd.f32 %v6077_v1, %v4016_v24  ;;  %v4096_v28 = vpop.f32.mrb[106].mxu1  ;;  %4697 = vtanh.f32 %v2632_v22 }
 0x1cb   :  { %v1754_v29 = vpop.f32.mrb[107].mxu0  ;;  %v4676_v30 = vpop.eup %4675  ;;  %3137 = vst [vmem:[%s6333_s3 + $0x508] sm:$0xff] %v4674_v25  ;;  %v2699_v31 = vadd.f32 %v6077_v1, %v4096_v28  ;;  %4699 = vtanh.f32 %v2696_v26 }
 0x1cc   :  { %v2365_v32 = vpop.f32.mrb[107].mxu1  ;;  %v4678_v33 = vpop.eup %4677  ;;  %3201 = vst [vmem:[%s6333_s3 + $0x708] sm:$0xff] %v4676_v30  ;;  %v2633_v34 = vadd.f32 %v6077_v1, %v1754_v29  ;;  %4701 = vtanh.f32 %v2635_v27 }
 0x1cd   :  { %v4680_v35 = vpop.eup %4679  ;;  %3142 = vst [vmem:[%s6333_s3 + $0x530] sm:$0xff] %v4678_v33  ;;  %v2697_v36 = vadd.f32 %v6077_v1, %v2365_v32  ;;  %4703 = vtanh.f32 %v2699_v31  ;;  %v4019_v39 = vpop.f32.mrb[108].mxu0 }
 0x1ce   :  { %v4682_v37 = vpop.eup %4681  ;;  %3206 = vst [vmem:[%s6333_s3 + $0x730] sm:$0xff] %v4680_v35  ;;  %4705 = vtanh.f32 %v2633_v34  ;;  %v2638_v41 = vadd.f32 %v6077_v1, %v4019_v39  ;;  %v4099_v42 = vpop.f32.mrb[108].mxu1 }
 0x1cf   :  { %v4684_v38 = vpop.eup %4683  ;;  %3140 = vst [vmem:[%s6333_s3 + $0x520] sm:$0xff] %v4682_v37  ;;  %v1767_v43 = vpop.f32.mrb[109].mxu0  ;;  %4707 = vtanh.f32 %v2697_v36  ;;  %v2702_v45 = vadd.f32 %v6077_v1, %v4099_v42 }
 0x1d0   :  { %v4686_v40 = vpop.eup %4685  ;;  %3204 = vst [vmem:[%s6333_s3 + $0x720] sm:$0xff] %v4684_v38  ;;  %v2636_v46 = vadd.f32 %v6077_v1, %v1767_v43  ;;  %v2378_v47 = vpop.f32.mrb[109].mxu1  ;;  %4709 = vtanh.f32 %v2638_v41 }
 0x1d1   :  { %v4688_v44 = vpop.eup %4687  ;;  %3143 = vst [vmem:[%s6333_s3 + $0x538] sm:$0xff] %v4686_v40  ;;  %v4020_v48 = vpop.f32.mrb[110].mxu0  ;;  %v2700_v50 = vadd.f32 %v6077_v1, %v2378_v47  ;;  %4711 = vtanh.f32 %v2702_v45 }
 0x1d2   :  { %v4690_v49 = vpop.eup %4689  ;;  %3207 = vst [vmem:[%s6333_s3 + $0x738] sm:$0xff] %v4688_v44  ;;  %v2639_v51 = vadd.f32 %v6077_v1, %v4020_v48  ;;  %v4100_v52 = vpop.f32.mrb[110].mxu1  ;;  %4713 = vtanh.f32 %v2636_v46 }
 0x1d3   :  { %v1770_v53 = vpop.f32.mrb[111].mxu0  ;;  %v4692_v54 = vpop.eup %4691  ;;  %3141 = vst [vmem:[%s6333_s3 + $0x528] sm:$0xff] %v4690_v49  ;;  %v2703_v55 = vadd.f32 %v6077_v1, %v4100_v52  ;;  %4715 = vtanh.f32 %v2700_v50 }
 0x1d4   :  { %v2381_v56 = vpop.f32.mrb[111].mxu1  ;;  %v4694_v57 = vpop.eup %4693  ;;  %3205 = vst [vmem:[%s6333_s3 + $0x728] sm:$0xff] %v4692_v54  ;;  %v2637_v58 = vadd.f32 %v6077_v1, %v1770_v53  ;;  %4717 = vtanh.f32 %v2639_v51 }
 0x1d5   :  { %v4696_v59 = vpop.eup %4695  ;;  %3146 = vst [vmem:[%s6333_s3 + $0x550] sm:$0xff] %v4694_v57  ;;  %v2701_v60 = vadd.f32 %v6077_v1, %v2381_v56  ;;  %4719 = vtanh.f32 %v2703_v55  ;;  %v4023_v63 = vpop.f32.mrb[112].mxu0 }
 0x1d6   :  { %v4698_v61 = vpop.eup %4697  ;;  %3210 = vst [vmem:[%s6333_s3 + $0x750] sm:$0xff] %v4696_v59  ;;  %4721 = vtanh.f32 %v2637_v58  ;;  %v2642_v2 = vadd.f32 %v6077_v1, %v4023_v63  ;;  %v4103_v3 = vpop.f32.mrb[112].mxu1 }
 0x1d7   :  { %v4700_v62 = vpop.eup %4699  ;;  %3144 = vst [vmem:[%s6333_s3 + $0x540] sm:$0xff] %v4698_v61  ;;  %v1783_v4 = vpop.f32.mrb[113].mxu0  ;;  %4723 = vtanh.f32 %v2701_v60  ;;  %v2706_v9 = vadd.f32 %v6077_v1, %v4103_v3 }
 0x1d8   :  { %v4702_v0 = vpop.eup %4701  ;;  %3208 = vst [vmem:[%s6333_s3 + $0x740] sm:$0xff] %v4700_v62  ;;  %v2640_v6 = vadd.f32 %v6077_v1, %v1783_v4  ;;  %v2394_v7 = vpop.f32.mrb[113].mxu1  ;;  %4725 = vtanh.f32 %v2642_v2 }
 0x1d9   :  { %v4704_v5 = vpop.eup %4703  ;;  %3147 = vst [vmem:[%s6333_s3 + $0x558] sm:$0xff] %v4702_v0  ;;  %v4024_v8 = vpop.f32.mrb[114].mxu0  ;;  %v2704_v11 = vadd.f32 %v6077_v1, %v2394_v7  ;;  %4727 = vtanh.f32 %v2706_v9 }
 0x1da   :  { %v4706_v10 = vpop.eup %4705  ;;  %3211 = vst [vmem:[%s6333_s3 + $0x758] sm:$0xff] %v4704_v5  ;;  %v2643_v12 = vadd.f32 %v6077_v1, %v4024_v8  ;;  %v4104_v14 = vpop.f32.mrb[114].mxu1  ;;  %4729 = vtanh.f32 %v2640_v6 }
 0x1db   :  { %v1786_v13 = vpop.f32.mrb[115].mxu0  ;;  %v4708_v15 = vpop.eup %4707  ;;  %3145 = vst [vmem:[%s6333_s3 + $0x548] sm:$0xff] %v4706_v10  ;;  %v2707_v16 = vadd.f32 %v6077_v1, %v4104_v14  ;;  %4731 = vtanh.f32 %v2704_v11 }
 0x1dc   :  { %v2397_v17 = vpop.f32.mrb[115].mxu1  ;;  %v4710_v18 = vpop.eup %4709  ;;  %3209 = vst [vmem:[%s6333_s3 + $0x748] sm:$0xff] %v4708_v15  ;;  %v2641_v19 = vadd.f32 %v6077_v1, %v1786_v13  ;;  %4733 = vtanh.f32 %v2643_v12 }
 0x1dd   :  { %v4712_v20 = vpop.eup %4711  ;;  %3150 = vst [vmem:[%s6333_s3 + $0x570] sm:$0xff] %v4710_v18  ;;  %v2705_v21 = vadd.f32 %v6077_v1, %v2397_v17  ;;  %4735 = vtanh.f32 %v2707_v16  ;;  %v4027_v24 = vpop.f32.mrb[116].mxu0 }
 0x1de   :  { %v4714_v22 = vpop.eup %4713  ;;  %3214 = vst [vmem:[%s6333_s3 + $0x770] sm:$0xff] %v4712_v20  ;;  %4737 = vtanh.f32 %v2641_v19  ;;  %v2646_v26 = vadd.f32 %v6077_v1, %v4027_v24  ;;  %v4107_v27 = vpop.f32.mrb[116].mxu1 }
 0x1df   :  { %v4716_v23 = vpop.eup %4715  ;;  %3148 = vst [vmem:[%s6333_s3 + $0x560] sm:$0xff] %v4714_v22  ;;  %v1799_v28 = vpop.f32.mrb[117].mxu0  ;;  %4739 = vtanh.f32 %v2705_v21  ;;  %v2710_v30 = vadd.f32 %v6077_v1, %v4107_v27 }
 0x1e0   :  { %v4718_v25 = vpop.eup %4717  ;;  %3212 = vst [vmem:[%s6333_s3 + $0x760] sm:$0xff] %v4716_v23  ;;  %v2644_v31 = vadd.f32 %v6077_v1, %v1799_v28  ;;  %v2410_v32 = vpop.f32.mrb[117].mxu1  ;;  %4741 = vtanh.f32 %v2646_v26 }
 0x1e1   :  { %v4720_v29 = vpop.eup %4719  ;;  %3151 = vst [vmem:[%s6333_s3 + $0x578] sm:$0xff] %v4718_v25  ;;  %v4028_v33 = vpop.f32.mrb[118].mxu0  ;;  %v2708_v35 = vadd.f32 %v6077_v1, %v2410_v32  ;;  %4743 = vtanh.f32 %v2710_v30 }
 0x1e2   :  { %v4722_v34 = vpop.eup %4721  ;;  %3215 = vst [vmem:[%s6333_s3 + $0x778] sm:$0xff] %v4720_v29  ;;  %v2647_v36 = vadd.f32 %v6077_v1, %v4028_v33  ;;  %v4108_v37 = vpop.f32.mrb[118].mxu1  ;;  %4745 = vtanh.f32 %v2644_v31 }
 0x1e3   :  { %v1802_v38 = vpop.f32.mrb[119].mxu0  ;;  %v4724_v39 = vpop.eup %4723  ;;  %3149 = vst [vmem:[%s6333_s3 + $0x568] sm:$0xff] %v4722_v34  ;;  %v2711_v40 = vadd.f32 %v6077_v1, %v4108_v37  ;;  %4747 = vtanh.f32 %v2708_v35 }
 0x1e4   :  { %v2413_v41 = vpop.f32.mrb[119].mxu1  ;;  %v4726_v42 = vpop.eup %4725  ;;  %3213 = vst [vmem:[%s6333_s3 + $0x768] sm:$0xff] %v4724_v39  ;;  %v2645_v43 = vadd.f32 %v6077_v1, %v1802_v38  ;;  %4749 = vtanh.f32 %v2647_v36 }
 0x1e5   :  { %v4728_v44 = vpop.eup %4727  ;;  %3154 = vst [vmem:[%s6333_s3 + $0x590] sm:$0xff] %v4726_v42  ;;  %v2709_v45 = vadd.f32 %v6077_v1, %v2413_v41  ;;  %4751 = vtanh.f32 %v2711_v40  ;;  %v4031_v48 = vpop.f32.mrb[120].mxu0 }
 0x1e6   :  { %v4730_v46 = vpop.eup %4729  ;;  %3218 = vst [vmem:[%s6333_s3 + $0x790] sm:$0xff] %v4728_v44  ;;  %4753 = vtanh.f32 %v2645_v43  ;;  %v2650_v50 = vadd.f32 %v6077_v1, %v4031_v48  ;;  %v4111_v51 = vpop.f32.mrb[120].mxu1 }
 0x1e7   :  { %v4732_v47 = vpop.eup %4731  ;;  %3152 = vst [vmem:[%s6333_s3 + $0x580] sm:$0xff] %v4730_v46  ;;  %v1815_v52 = vpop.f32.mrb[121].mxu0  ;;  %4755 = vtanh.f32 %v2709_v45  ;;  %v2714_v54 = vadd.f32 %v6077_v1, %v4111_v51 }
 0x1e8   :  { %v4734_v49 = vpop.eup %4733  ;;  %3216 = vst [vmem:[%s6333_s3 + $0x780] sm:$0xff] %v4732_v47  ;;  %v2648_v55 = vadd.f32 %v6077_v1, %v1815_v52  ;;  %v2426_v56 = vpop.f32.mrb[121].mxu1  ;;  %4757 = vtanh.f32 %v2650_v50 }
 0x1e9   :  { %v4736_v53 = vpop.eup %4735  ;;  %3155 = vst [vmem:[%s6333_s3 + $0x598] sm:$0xff] %v4734_v49  ;;  %v4032_v57 = vpop.f32.mrb[122].mxu0  ;;  %v2712_v59 = vadd.f32 %v6077_v1, %v2426_v56  ;;  %4759 = vtanh.f32 %v2714_v54 }
 0x1ea   :  { %v4738_v58 = vpop.eup %4737  ;;  %3219 = vst [vmem:[%s6333_s3 + $0x798] sm:$0xff] %v4736_v53  ;;  %v2651_v60 = vadd.f32 %v6077_v1, %v4032_v57  ;;  %v4112_v61 = vpop.f32.mrb[122].mxu1  ;;  %4761 = vtanh.f32 %v2648_v55 }
 0x1eb   :  { %v1818_v62 = vpop.f32.mrb[123].mxu0  ;;  %v4740_v63 = vpop.eup %4739  ;;  %3153 = vst [vmem:[%s6333_s3 + $0x588] sm:$0xff] %v4738_v58  ;;  %v2715_v0 = vadd.f32 %v6077_v1, %v4112_v61  ;;  %4763 = vtanh.f32 %v2712_v59 }
 0x1ec   :  { %v2429_v2 = vpop.f32.mrb[123].mxu1  ;;  %v4742_v3 = vpop.eup %4741  ;;  %3217 = vst [vmem:[%s6333_s3 + $0x788] sm:$0xff] %v4740_v63  ;;  %v2649_v4 = vadd.f32 %v6077_v1, %v1818_v62  ;;  %4765 = vtanh.f32 %v2651_v60 }
 0x1ed   :  { %v4744_v5 = vpop.eup %4743  ;;  %3158 = vst [vmem:[%s6333_s3 + $0x5b0] sm:$0xff] %v4742_v3  ;;  %v2713_v9 = vadd.f32 %v6077_v1, %v2429_v2  ;;  %4767 = vtanh.f32 %v2715_v0  ;;  %v4035_v8 = vpop.f32.mrb[124].mxu0 }
 0x1ee   :  { %v4746_v6 = vpop.eup %4745  ;;  %3222 = vst [vmem:[%s6333_s3 + $0x7b0] sm:$0xff] %v4744_v5  ;;  %4769 = vtanh.f32 %v2649_v4  ;;  %v2654_v11 = vadd.f32 %v6077_v1, %v4035_v8  ;;  %v4115_v12 = vpop.f32.mrb[124].mxu1 }
 0x1ef   :  { %v4748_v7 = vpop.eup %4747  ;;  %3156 = vst [vmem:[%s6333_s3 + $0x5a0] sm:$0xff] %v4746_v6  ;;  %v1831_v14 = vpop.f32.mrb[125].mxu0  ;;  %4771 = vtanh.f32 %v2713_v9  ;;  %v2718_v15 = vadd.f32 %v6077_v1, %v4115_v12 }
 0x1f0   :  { %v4750_v10 = vpop.eup %4749  ;;  %3220 = vst [vmem:[%s6333_s3 + $0x7a0] sm:$0xff] %v4748_v7  ;;  %v2652_v16 = vadd.f32 %v6077_v1, %v1831_v14  ;;  %v2442_v17 = vpop.f32.mrb[125].mxu1  ;;  %4773 = vtanh.f32 %v2654_v11 }
 0x1f1   :  { %v4752_v13 = vpop.eup %4751  ;;  %3159 = vst [vmem:[%s6333_s3 + $0x5b8] sm:$0xff] %v4750_v10  ;;  %v4036_v18 = vpop.f32.mrb[126].mxu0  ;;  %v2716_v20 = vadd.f32 %v6077_v1, %v2442_v17  ;;  %4775 = vtanh.f32 %v2718_v15 }
 0x1f2   :  { %v4754_v19 = vpop.eup %4753  ;;  %3223 = vst [vmem:[%s6333_s3 + $0x7b8] sm:$0xff] %v4752_v13  ;;  %v2655_v21 = vadd.f32 %v6077_v1, %v4036_v18  ;;  %v4116_v22 = vpop.f32.mrb[126].mxu1  ;;  %4777 = vtanh.f32 %v2652_v16 }
 0x1f3   :  { %v1834_v23 = vpop.f32.mrb[127].mxu0  ;;  %v4756_v24 = vpop.eup %4755  ;;  %3157 = vst [vmem:[%s6333_s3 + $0x5a8] sm:$0xff] %v4754_v19  ;;  %v2719_v25 = vadd.f32 %v6077_v1, %v4116_v22  ;;  %4779 = vtanh.f32 %v2716_v20 }
 0x1f4   :  { %v2445_v26 = vpop.f32.mrb[127].mxu1  ;;  %v4758_v27 = vpop.eup %4757  ;;  %3221 = vst [vmem:[%s6333_s3 + $0x7a8] sm:$0xff] %v4756_v24  ;;  %v2653_v28 = vadd.f32 %v6077_v1, %v1834_v23  ;;  %4781 = vtanh.f32 %v2655_v21 }
 0x1f5   :  { %v4760_v29 = vpop.eup %4759  ;;  %3162 = vst [vmem:[%s6333_s3 + $0x5d0] sm:$0xff] %v4758_v27  ;;  %v2717_v30 = vadd.f32 %v6077_v1, %v2445_v26  ;;  %4783 = vtanh.f32 %v2719_v25 }
 0x1f6   :  { %v4762_v31 = vpop.eup %4761  ;;  %3226 = vst [vmem:[%s6333_s3 + $0x7d0] sm:$0xff] %v4760_v29  ;;  %4785 = vtanh.f32 %v2653_v28 }
 0x1f7   :  { %v4764_v32 = vpop.eup %4763  ;;  %3160 = vst [vmem:[%s6333_s3 + $0x5c0] sm:$0xff] %v4762_v31  ;;  %4787 = vtanh.f32 %v2717_v30 }
 0x1f8   :  { %v4766_v33 = vpop.eup %4765  ;;  %3224 = vst [vmem:[%s6333_s3 + $0x7c0] sm:$0xff] %v4764_v32 }
 0x1f9   :  { %v4768_v34 = vpop.eup %4767  ;;  %3163 = vst [vmem:[%s6333_s3 + $0x5d8] sm:$0xff] %v4766_v33 }
 0x1fa   :  { %v4770_v1 = vpop.eup %4769  ;;  %3227 = vst [vmem:[%s6333_s3 + $0x7d8] sm:$0xff] %v4768_v34 }
 0x1fb   :  { %v4772_v35 = vpop.eup %4771  ;;  %3161 = vst [vmem:[%s6333_s3 + $0x5c8] sm:$0xff] %v4770_v1 }
 0x1fc   :  { %v4774_v36 = vpop.eup %4773  ;;  %3225 = vst [vmem:[%s6333_s3 + $0x7c8] sm:$0xff] %v4772_v35 }
 0x1fd   :  { %v4776_v37 = vpop.eup %4775  ;;  %3166 = vst [vmem:[%s6333_s3 + $0x5f0] sm:$0xff] %v4774_v36 }
 0x1fe   :  { %v4778_v38 = vpop.eup %4777  ;;  %3230 = vst [vmem:[%s6333_s3 + $0x7f0] sm:$0xff] %v4776_v37 }
 0x1ff   :  { %v4780_v39 = vpop.eup %4779  ;;  %3164 = vst [vmem:[%s6333_s3 + $0x5e0] sm:$0xff] %v4778_v38 }
 0x200   :  { %v4782_v40 = vpop.eup %4781  ;;  %3228 = vst [vmem:[%s6333_s3 + $0x7e0] sm:$0xff] %v4780_v39 }
 0x201   :  { %v4784_v41 = vpop.eup %4783  ;;  %3167 = vst [vmem:[%s6333_s3 + $0x5f8] sm:$0xff] %v4782_v40 }
 0x202   :  { %v4786_v42 = vpop.eup %4785  ;;  %3231 = vst [vmem:[%s6333_s3 + $0x7f8] sm:$0xff] %v4784_v41 }
 0x203   :  { %v4788_v43 = vpop.eup %4787  ;;  %3165 = vst [vmem:[%s6333_s3 + $0x5e8] sm:$0xff] %v4786_v42 }
 0x204   :  { %3229 = vst [vmem:[%s6333_s3 + $0x7e8] sm:$0xff] %v4788_v43 }

</bundles_post_ra>
